<compile_context>
chip_gen: v6e
topology: v6e:2x2x1
jax: 0.10.0
libtpu: 0.0.40
codegen_flags: <defaults>
</compile_context>

<pallas_src>
import functools

import numpy as np
import jax
import jax.numpy as jnp
from jax import lax
from jax.experimental import pallas as pl
from jax.experimental.pallas import tpu as pltpu

EPS = 1e-6
LANE = 128
_VMEM_LIMIT = 48 * 1024 * 1024   # fits the scoped budget on v5e/v6e and v7x's 64 MiB


def _round_up(x, m):
    return (x + m - 1) // m * m


def _pick_tile_h(H, W, CP, target_bytes=12 * 1024 * 1024):
    """Largest tile height whose stage-1 working set fits a conservative VMEM budget."""
    per_row = W * CP * 4 * 16            # rough bytes of live f32 state per image row
    th = int(max(1, min(H, target_bytes // max(per_row, 1))))
    while th > 1 and not (H % th == 0 and (th * W) % 16 == 0):
        th -= 1
    if not (H % th == 0 and (th * W) % 16 == 0):
        th = H                            # fall back to one tile per image
    return th


def _layernorm_channels(x, w, b, inv_c):
    # LayerNorm over the channel (lane) dim.  Channel padding is zero, so lane
    # sums divided by the *real* channel count give exact mean / E[x^2];
    # biased variance via E[x^2] - mu^2.  rsqrt keeps the divide on the EUP.
    s1 = jnp.sum(x, axis=-1, keepdims=True)
    s2 = jnp.sum(x * x, axis=-1, keepdims=True)
    mu = s1 * inv_c
    var = jnp.maximum(s2 * inv_c - mu * mu, 0.0)
    return (x - mu) * lax.rsqrt(var + EPS) * w + b


# --------------------------- stage 1 kernel ---------------------------------
def _stage1_kernel(x_top, x_main, x_bot,
                   ln1_w, ln1_b, w1, b1, wdw, bdw,
                   xg_out, pool_out,
                   xin_ref, ush_ref,
                   *, C, CP, CP2, TH, W):
    t = pl.program_id(1)
    T = pl.num_programs(1)
    S = TH * W
    S_ext = (TH + 2) * W
    inv_c = 1.0 / C

    # Assemble [top halo row | tile rows | bottom halo row] with aligned stores.
    xin_ref[0:W, :] = x_top[0]
    xin_ref[W:W + S, :] = x_main[0]
    xin_ref[W + S:S_ext, :] = x_bot[0]
    xcat = xin_ref[...]                                             # (S_ext, CP) f32

    # norm1
    xn = _layernorm_channels(xcat, ln1_w[...], ln1_b[...], inv_c)

    # conv1: fused 1x1, CP -> 2*CP (bf16 operands, f32 accumulate on the MXU).
    u = jnp.dot(xn.astype(jnp.bfloat16), w1[...],
                preferred_element_type=jnp.float32) + b1[...]        # (S_ext, CP2)

    # Zero the halo rows that fall outside the image (conv2 has padding=1).
    ridx = lax.broadcasted_iota(jnp.int32, (S_ext, 1), 0)
    top_ok = jnp.where(t > 0, 1.0, 0.0)
    bot_ok = jnp.where(t < T - 1, 1.0, 0.0)
    halo_mask = jnp.where(ridx < W, top_ok,
                          jnp.where(ridx >= (TH + 1) * W, bot_ok, 1.0))
    u = u * halo_mask

    # conv2: 3x3 depthwise, padding=1, on the row-flattened (S_ext, CP2) slab.
    # Stage u at an 8-aligned offset so the +/-1 column taps are two shifted
    # loads (edge-masked) and the three row taps are sublane-aligned slices.
    col = ridx % W
    lmask = col > 0
    rmask = col < (W - 1)
    ush_ref[8:8 + S_ext, :] = u
    u_l = jnp.where(lmask, ush_ref[7:7 + S_ext, :], 0.0)             # u[p-1], left edge -> 0
    u_r = jnp.where(rmask, ush_ref[9:9 + S_ext, :], 0.0)             # u[p+1], right edge -> 0
    taps = (u_l, u, u_r)

    wk = wdw[...]                                                    # (9, CP2)
    acc = jnp.zeros((S, CP2), jnp.float32)
    for di in range(3):
        lo = di * W                                                  # multiple of 8
        for dj in range(3):
            acc = acc + taps[dj][lo:lo + S, :] * wk[di * 3 + dj:di * 3 + dj + 1, :]
    acc = acc + bdw[...]

    # SimpleGate (lane-aligned split at CP).
    xg = acc[:, :CP] * acc[:, CP:]
    xg_out[0] = xg.astype(xg_out.dtype)

    # Per-channel spatial sum for SCA, accumulated across the tile axis.
    psum = jnp.sum(xg, axis=0, keepdims=True)                        # (1, CP)

    @pl.when(t == 0)
    def _():
        pool_out[0] = psum

    @pl.when(t > 0)
    def _():
        pool_out[0] = pool_out[0] + psum


# --------------------------- stage 2 kernel ---------------------------------
def _stage2_kernel(x_ref, xg_ref, pool_ref,
                   wsca, bsca, w3, b3, beta, ln2_w, ln2_b, w4, b4, w5, b5, gamma,
                   out_ref, *, C, CP, HW):
    inv_c = 1.0 / C
    inp = x_ref[0]                                                   # (S, CP) f32
    xg = xg_ref[0].astype(jnp.float32)                               # (S, CP)

    # SCA: global average pool (accumulated in stage 1) -> 1x1 conv -> rescale.
    pooled = pool_ref[0] * (1.0 / HW)                                # (1, CP)
    sca = jnp.dot(pooled.astype(jnp.bfloat16), wsca[...],
                  preferred_element_type=jnp.float32) + bsca[...]
    xg = xg * sca

    # conv3 (1x1) + beta residual.  dropout1 == Identity.
    x3 = jnp.dot(xg.astype(jnp.bfloat16), w3[...],
                 preferred_element_type=jnp.float32) + b3[...]
    y = inp + x3 * beta[...]

    # FFN branch: norm2 -> conv4 (fused 1x1 to 2*CP) -> SimpleGate -> conv5.
    yn = _layernorm_channels(y, ln2_w[...], ln2_b[...], inv_c)
    h = jnp.dot(yn.astype(jnp.bfloat16), w4[...],
                preferred_element_type=jnp.float32) + b4[...]        # (S, 2*CP)
    hg = h[:, :CP] * h[:, CP:]
    x5 = jnp.dot(hg.astype(jnp.bfloat16), w5[...],
                 preferred_element_type=jnp.float32) + b5[...]
    # dropout2 == Identity.
    out_ref[0] = y + x5 * gamma[...]


# --------------------------- parameter packing ------------------------------
def _pack_params(params, C, CP):
    f32, bf16 = jnp.float32, jnp.bfloat16

    def row(v):                       # (1, C) -> (1, CP), zero padded
        return jnp.pad(v.astype(f32), ((0, 0), (0, CP - C)))

    def row2(a, b):                   # two (R, C) halves -> (R, 2*CP)
        out = jnp.zeros((a.shape[0], 2 * CP), f32)
        out = out.at[:, :C].set(a.astype(f32))
        return out.at[:, CP:CP + C].set(b.astype(f32))

    def mat(wa):                      # (C, C) -> (CP, CP)
        return jnp.zeros((CP, CP), f32).at[:C, :C].set(wa.astype(f32))

    def mat2(wa, wb):                 # two (C, C) -> (CP, 2*CP)
        out = jnp.zeros((CP, 2 * CP), f32)
        out = out.at[:C, :C].set(wa.astype(f32))
        return out.at[:C, CP:CP + C].set(wb.astype(f32))

    return dict(
        ln1_w=row(params["ln1_w"]), ln1_b=row(params["ln1_b"]),
        w1=mat2(params["w1a"], params["w1b"]).astype(bf16),
        b1=row2(params["b1a"], params["b1b"]),
        wdw=row2(params["wdwa"], params["wdwb"]),
        bdw=row2(params["bdwa"], params["bdwb"]),
        wsca=mat(params["wsca"]).astype(bf16), bsca=row(params["bsca"]),
        w3=mat(params["w3"]).astype(bf16), b3=row(params["b3"]),
        beta=row(params["beta"]),
        ln2_w=row(params["ln2_w"]), ln2_b=row(params["ln2_b"]),
        w4=mat2(params["w4a"], params["w4b"]).astype(bf16),
        b4=row2(params["b4a"], params["b4b"]),
        w5=mat(params["w5"]).astype(bf16), b5=row(params["b5"]),
        gamma=row(params["gamma"]),
    )


def _full_spec(arr):
    nd = arr.ndim
    return pl.BlockSpec(arr.shape, lambda *_, _nd=nd: (0,) * _nd)


# --------------------------- public wrapper ----------------------------------
def nafblock_pallas(x_nchw, params, tile_h=None):
    N, C, H, W = x_nchw.shape
    HW = H * W
    assert W % 8 == 0, "W must be a multiple of 8 for the tiled NHWC layout"
    CP = _round_up(C, LANE)
    CP2 = 2 * CP

    TH = _pick_tile_h(H, W, CP) if tile_h is None else tile_h
    assert H % TH == 0, "tile height must divide H"
    assert (TH * W) % 16 == 0 or TH * W == HW, "tile rows must be 16-aligned"
    T = H // TH

    # NHWC, zero-pad channels to a lane-dense multiple of 128, flatten spatial.
    x = jnp.transpose(x_nchw, (0, 2, 3, 1)).astype(jnp.float32)
    x = jnp.pad(x, ((0, 0), (0, 0), (0, 0), (0, CP - C)))
    xf = x.reshape(N, HW, CP)

    p = _pack_params(params, C, CP)

    row_top = lambda n, t: (n, jnp.maximum(t * TH - 1, 0), 0)        # clamped halo rows
    row_bot = lambda n, t: (n, jnp.minimum((t + 1) * TH, H - 1), 0)
    tile_map = lambda n, t: (n, t, 0)

    # ---- stage 1: norm1 + conv1 + dwconv3x3 + SimpleGate (+ SCA pool sums) ----
    s1_params = [p["ln1_w"], p["ln1_b"], p["w1"], p["b1"], p["wdw"], p["bdw"]]
    xg, pool_sum = pl.pallas_call(
        functools.partial(_stage1_kernel, C=C, CP=CP, CP2=CP2, TH=TH, W=W),
        out_shape=(
            jax.ShapeDtypeStruct((N, HW, CP), jnp.bfloat16),         # gated activations
            jax.ShapeDtypeStruct((N, 1, CP), jnp.float32),           # per-channel spatial sum
        ),
        grid_spec=pltpu.PrefetchScalarGridSpec(
            num_scalar_prefetch=0,
            grid=(N, T),
            in_specs=[
                pl.BlockSpec((1, W, CP), row_top),
                pl.BlockSpec((1, TH * W, CP), tile_map),
                pl.BlockSpec((1, W, CP), row_bot),
            ] + [_full_spec(q) for q in s1_params],
            out_specs=(
                pl.BlockSpec((1, TH * W, CP), tile_map),
                pl.BlockSpec((1, 1, CP), lambda n, t: (n, 0, 0)),
            ),
            scratch_shapes=[
                pltpu.VMEM(((TH + 2) * W, CP), jnp.float32),          # halo-extended input
                pltpu.VMEM(((TH + 2) * W + 16, CP2), jnp.float32),    # 8-aligned conv1 staging
            ],
        ),
        compiler_params=pltpu.CompilerParams(
            dimension_semantics=("parallel", "arbitrary"),
            vmem_limit_bytes=_VMEM_LIMIT,
        ),
    )(xf, xf, xf, *s1_params)

    # ---- stage 2: SCA rescale + conv3 + residual + norm2 + FFN + residual ----
    s2_params = [p["wsca"], p["bsca"], p["w3"], p["b3"], p["beta"],
                 p["ln2_w"], p["ln2_b"], p["w4"], p["b4"], p["w5"], p["b5"], p["gamma"]]
    out = pl.pallas_call(
        functools.partial(_stage2_kernel, C=C, CP=CP, HW=HW),
        out_shape=jax.ShapeDtypeStruct((N, HW, CP), jnp.float32),
        grid_spec=pltpu.PrefetchScalarGridSpec(
            num_scalar_prefetch=0,
            grid=(N, T),
            in_specs=[
                pl.BlockSpec((1, TH * W, CP), tile_map),              # inp (residual)
                pl.BlockSpec((1, TH * W, CP), tile_map),              # gated activations
                pl.BlockSpec((1, 1, CP), lambda n, t: (n, 0, 0)),     # SCA pool sum
            ] + [_full_spec(q) for q in s2_params],
            out_specs=pl.BlockSpec((1, TH * W, CP), tile_map),
        ),
        compiler_params=pltpu.CompilerParams(
            dimension_semantics=("parallel", "parallel"),
            vmem_limit_bytes=_VMEM_LIMIT,
        ),
    )(xf, xg, pool_sum, *s2_params)

    out = out.reshape(N, H, W, CP)[:, :, :, :C]
    return jnp.transpose(out, (0, 3, 1, 2))


# ------------------------- pure-JAX reference --------------------------------
def nafblock_ref(x_nchw, p):
    x = jnp.transpose(x_nchw, (0, 2, 3, 1)).astype(jnp.float32)      # NHWC
    N, H, W, C = x.shape

    def ln(v, w, b):
        mu = v.mean(-1, keepdims=True)
        var = ((v - mu) ** 2).mean(-1, keepdims=True)
        return (v - mu) / jnp.sqrt(var + EPS) * w + b

    def dw(v, w9, bias):
        vp = jnp.pad(v, ((0, 0), (1, 1), (1, 1), (0, 0)))
        acc = jnp.zeros_like(v)
        for di in range(3):
            for dj in range(3):
                acc = acc + vp[:, di:di + H, dj:dj + W, :] * w9[di * 3 + dj]
        return acc + bias

    xn = ln(x, p["ln1_w"], p["ln1_b"])
    xa = xn @ p["w1a"] + p["b1a"]
    xb = xn @ p["w1b"] + p["b1b"]
    xa = dw(xa, p["wdwa"], p["bdwa"])
    xb = dw(xb, p["wdwb"], p["bdwb"])
    xg = xa * xb
    pooled = xg.mean(axis=(1, 2), keepdims=True)
    sca = pooled @ p["wsca"] + p["bsca"]
    xg = xg * sca
    x3 = xg @ p["w3"] + p["b3"]
    y = x + x3 * p["beta"]
    yn = ln(y, p["ln2_w"], p["ln2_b"])
    xg2 = (yn @ p["w4a"] + p["b4a"]) * (yn @ p["w4b"] + p["b4b"])
    x5 = xg2 @ p["w5"] + p["b5"]
    out = y + x5 * p["gamma"]
    return jnp.transpose(out, (0, 3, 1, 2))


def init_params(c, key):
    keys = iter(jax.random.split(key, 32))

    def rnd(shape, scale):
        return scale * jax.random.normal(next(keys), shape, dtype=jnp.float32)

    # Deterministic synthetic init (non-zero beta/gamma so the full path is exercised).
    return dict(
        ln1_w=1.0 + rnd((1, c), 0.1), ln1_b=rnd((1, c), 0.1),
        w1a=rnd((c, c), 0.15), w1b=rnd((c, c), 0.15),
        b1a=rnd((1, c), 0.05), b1b=rnd((1, c), 0.05),
        wdwa=rnd((9, c), 0.15), wdwb=rnd((9, c), 0.15),
        bdwa=rnd((1, c), 0.05), bdwb=rnd((1, c), 0.05),
        wsca=rnd((c, c), 0.15), bsca=rnd((1, c), 0.05),
        w3=rnd((c, c), 0.15), b3=rnd((1, c), 0.05),
        beta=rnd((1, c), 0.5),
        ln2_w=1.0 + rnd((1, c), 0.1), ln2_b=rnd((1, c), 0.1),
        w4a=rnd((c, c), 0.15), w4b=rnd((c, c), 0.15),
        b4a=rnd((1, c), 0.05), b4b=rnd((1, c), 0.05),
        w5=rnd((c, c), 0.15), b5=rnd((1, c), 0.05),
        gamma=rnd((1, c), 0.5),
    )


if __name__ == "__main__":
    key = jax.random.PRNGKey(0)
    kx, kp, kx2, kp2 = jax.random.split(key, 4)

    # Primary config: multi-tile spatial grid, cross-tile SCA pool accumulation.
    N, C, H, W = 2, 8, 16, 16
    x = jax.random.normal(kx, (N, C, H, W), dtype=jnp.float32)
    params = init_params(C, kp)
    out = jax.block_until_ready(nafblock_pallas(x, params, tile_h=8))
    ref = nafblock_ref(x, params)
    assert out.shape == x.shape
    assert bool(jnp.all(jnp.isfinite(out)))
    np.testing.assert_allclose(np.asarray(out), np.asarray(ref), rtol=3e-2, atol=3e-2)

    # Secondary config: single spatial tile (both dwconv halos are image borders),
    # tile height auto-picked.
    N2, C2, H2, W2 = 1, 4, 8, 8
    x2 = jax.random.normal(kx2, (N2, C2, H2, W2), dtype=jnp.float32)
    params2 = init_params(C2, kp2)
    out2 = jax.block_until_ready(nafblock_pallas(x2, params2))
    ref2 = nafblock_ref(x2, params2)
    assert bool(jnp.all(jnp.isfinite(out2)))
    np.testing.assert_allclose(np.asarray(out2), np.asarray(ref2), rtol=3e-2, atol=3e-2)

    print("KERNEL_OK")
</pallas_src>

<mosaic_0001>
module attributes {stable_mosaic.version = 11 : i64} {
  func.func @_stage1_kernel(%arg0: i32, %arg1: i32, %arg2: memref<1x16x128xf32, #tpu.memory_space<vmem>>, %arg3: memref<1x128x128xf32, #tpu.memory_space<vmem>>, %arg4: memref<1x16x128xf32, #tpu.memory_space<vmem>>, %arg5: memref<1x128xf32, #tpu.memory_space<vmem>>, %arg6: memref<1x128xf32, #tpu.memory_space<vmem>>, %arg7: memref<128x256xbf16, #tpu.memory_space<vmem>>, %arg8: memref<1x256xf32, #tpu.memory_space<vmem>>, %arg9: memref<9x256xf32, #tpu.memory_space<vmem>>, %arg10: memref<1x256xf32, #tpu.memory_space<vmem>>, %arg11: memref<1x128x128xbf16, #tpu.memory_space<vmem>>, %arg12: memref<1x1x128xf32, #tpu.memory_space<vmem>>, %arg13: memref<160x128xf32, #tpu.memory_space<vmem>>, %arg14: memref<176x256xf32, #tpu.memory_space<vmem>>) attributes {dimension_semantics = [#tpu.dimension_semantics<parallel>, #tpu.dimension_semantics<arbitrary>], iteration_bounds = array<i64: 2, 2>, scalar_prefetch = 0 : i64, scratch_operands = 2 : i64, tpu.core_type = #tpu.core_type<tc>, window_params = [{transform_indices = @transform_0, window_bounds = array<i64: 1, 16, 128>}, {transform_indices = @transform_1, window_bounds = array<i64: 1, 128, 128>}, {transform_indices = @transform_2, window_bounds = array<i64: 1, 16, 128>}, {pipeline_mode = #tpu.pipeline_mode<synchronous>, transform_indices = @transform_3, window_bounds = array<i64: 1, 128>}, {pipeline_mode = #tpu.pipeline_mode<synchronous>, transform_indices = @transform_4, window_bounds = array<i64: 1, 128>}, {pipeline_mode = #tpu.pipeline_mode<synchronous>, transform_indices = @transform_5, window_bounds = array<i64: 128, 256>}, {pipeline_mode = #tpu.pipeline_mode<synchronous>, transform_indices = @transform_6, window_bounds = array<i64: 1, 256>}, {pipeline_mode = #tpu.pipeline_mode<synchronous>, transform_indices = @transform_7, window_bounds = array<i64: 9, 256>}, {pipeline_mode = #tpu.pipeline_mode<synchronous>, transform_indices = @transform_8, window_bounds = array<i64: 1, 256>}, {transform_indices = @transform_9, window_bounds = array<i64: 1, 128, 128>}, {transform_indices = @transform_10, window_bounds = array<i64: 1, 1, 128>}]} {
    %c0 = arith.constant 0 : index
    %c0_0 = arith.constant 0 : index
    %c0_1 = arith.constant 0 : index
    %0 = vector.load %arg2[%c0, %c0_0, %c0_1] : memref<1x16x128xf32, #tpu.memory_space<vmem>>, vector<1x16x128xf32>
    %1 = vector.shape_cast %0 : vector<1x16x128xf32> to vector<16x128xf32>
    %c0_2 = arith.constant 0 : index
    %c0_3 = arith.constant 0 : index
    %2 = vector.load %arg13[%c0_2, %c0_3] : memref<160x128xf32, #tpu.memory_space<vmem>>, vector<16x128xf32>
    tpu.vector_store %arg13[%c0_2, %c0_3], %1 {strides = array<i32>} : memref<160x128xf32, #tpu.memory_space<vmem>>, vector<16x128xf32>,
    %c0_4 = arith.constant 0 : index
    %c0_5 = arith.constant 0 : index
    %c0_6 = arith.constant 0 : index
    %3 = vector.load %arg3[%c0_4, %c0_5, %c0_6] : memref<1x128x128xf32, #tpu.memory_space<vmem>>, vector<1x128x128xf32>
    %4 = vector.shape_cast %3 : vector<1x128x128xf32> to vector<128x128xf32>
    %c16 = arith.constant 16 : index
    %c0_7 = arith.constant 0 : index
    %5 = vector.load %arg13[%c16, %c0_7] : memref<160x128xf32, #tpu.memory_space<vmem>>, vector<128x128xf32>
    tpu.vector_store %arg13[%c16, %c0_7], %4 {strides = array<i32>} : memref<160x128xf32, #tpu.memory_space<vmem>>, vector<128x128xf32>,
    %c0_8 = arith.constant 0 : index
    %c0_9 = arith.constant 0 : index
    %c0_10 = arith.constant 0 : index
    %6 = vector.load %arg4[%c0_8, %c0_9, %c0_10] : memref<1x16x128xf32, #tpu.memory_space<vmem>>, vector<1x16x128xf32>
    %7 = vector.shape_cast %6 : vector<1x16x128xf32> to vector<16x128xf32>
    %c144 = arith.constant 144 : index
    %c0_11 = arith.constant 0 : index
    %8 = vector.load %arg13[%c144, %c0_11] : memref<160x128xf32, #tpu.memory_space<vmem>>, vector<16x128xf32>
    tpu.vector_store %arg13[%c144, %c0_11], %7 {strides = array<i32>} : memref<160x128xf32, #tpu.memory_space<vmem>>, vector<16x128xf32>,
    %c0_12 = arith.constant 0 : index
    %c0_13 = arith.constant 0 : index
    %9 = vector.load %arg13[%c0_12, %c0_13] : memref<160x128xf32, #tpu.memory_space<vmem>>, vector<160x128xf32>
    %c0_14 = arith.constant 0 : index
    %c0_15 = arith.constant 0 : index
    %10 = vector.load %arg5[%c0_14, %c0_15] : memref<1x128xf32, #tpu.memory_space<vmem>>, vector<1x128xf32>
    %c0_16 = arith.constant 0 : index
    %c0_17 = arith.constant 0 : index
    %11 = vector.load %arg6[%c0_16, %c0_17] : memref<1x128xf32, #tpu.memory_space<vmem>>, vector<1x128xf32>
    %cst = arith.constant dense<0.000000e+00> : vector<160xf32>
    %12 = vector.multi_reduction <add>, %9, %cst [1] : vector<160x128xf32> to vector<160xf32>
    %13 = vector.shape_cast %12 : vector<160xf32> to vector<160x1xf32>
    %14 = arith.mulf %9, %9 : vector<160x128xf32>
    %cst_18 = arith.constant dense<0.000000e+00> : vector<160xf32>
    %15 = vector.multi_reduction <add>, %14, %cst_18 [1] : vector<160x128xf32> to vector<160xf32>
    %16 = vector.shape_cast %15 : vector<160xf32> to vector<160x1xf32>
    %cst_19 = arith.constant 1.250000e-01 : f32
    %17 = vector.broadcast %cst_19 : f32 to vector<160x1xf32>
    %18 = arith.mulf %13, %17 : vector<160x1xf32>
    %cst_20 = arith.constant 1.250000e-01 : f32
    %19 = vector.broadcast %cst_20 : f32 to vector<160x1xf32>
    %20 = arith.mulf %16, %19 : vector<160x1xf32>
    %21 = arith.mulf %18, %18 : vector<160x1xf32>
    %22 = arith.subf %20, %21 : vector<160x1xf32>
    %cst_21 = arith.constant 0.000000e+00 : f32
    %23 = vector.broadcast %cst_21 : f32 to vector<160x1xf32>
    %24 = arith.maximumf %22, %23 : vector<160x1xf32>
    %25 = vector.broadcast %18 : vector<160x1xf32> to vector<160x128xf32>
    %26 = arith.subf %9, %25 : vector<160x128xf32>
    %cst_22 = arith.constant 9.99999997E-7 : f32
    %27 = vector.broadcast %cst_22 : f32 to vector<160x1xf32>
    %28 = arith.addf %24, %27 : vector<160x1xf32>
    %29 = math.rsqrt %28 : vector<160x1xf32>
    %30 = vector.broadcast %29 : vector<160x1xf32> to vector<160x128xf32>
    %31 = arith.mulf %26, %30 : vector<160x128xf32>
    %32 = vector.broadcast %10 : vector<1x128xf32> to vector<160x128xf32>
    %33 = arith.mulf %31, %32 : vector<160x128xf32>
    %34 = vector.broadcast %11 : vector<1x128xf32> to vector<160x128xf32>
    %35 = arith.addf %33, %34 : vector<160x128xf32>
    %36 = arith.truncf %35 : vector<160x128xf32> to vector<160x128xbf16>
    %c0_23 = arith.constant 0 : index
    %c0_24 = arith.constant 0 : index
    %37 = vector.load %arg7[%c0_23, %c0_24] : memref<128x256xbf16, #tpu.memory_space<vmem>>, vector<128x256xbf16>
    %cst_25 = arith.constant dense<0.000000e+00> : vector<160x256xf32>
    %38 = tpu.matmul %36, %37, %cst_25 {dimension_numbers = #tpu.dot_dimension_numbers<[1], [0], [0], [1], [0, 0, 1, 1], [], []>} : vector<160x128xbf16>, vector<128x256xbf16>, vector<160x256xf32> -> vector<160x256xf32>
    %c0_26 = arith.constant 0 : index
    %c0_27 = arith.constant 0 : index
    %39 = vector.load %arg8[%c0_26, %c0_27] : memref<1x256xf32, #tpu.memory_space<vmem>>, vector<1x256xf32>
    %40 = vector.broadcast %39 : vector<1x256xf32> to vector<160x256xf32>
    %41 = arith.addf %38, %40 : vector<160x256xf32>
    %42 = tpu.iota {dimensions = array<i32: 0>} : vector<160x1xi32>
    %c0_i32 = arith.constant 0 : i32
    %43 = arith.cmpi sgt, %arg1, %c0_i32 : i32
    %cst_28 = arith.constant 1.000000e+00 : f32
    %cst_29 = arith.constant 0.000000e+00 : f32
    %44 = arith.select %43, %cst_28, %cst_29 : f32
    %c1_i32 = arith.constant 1 : i32
    %45 = arith.cmpi slt, %arg1, %c1_i32 : i32
    %cst_30 = arith.constant 1.000000e+00 : f32
    %cst_31 = arith.constant 0.000000e+00 : f32
    %46 = arith.select %45, %cst_30, %cst_31 : f32
    %c16_i32 = arith.constant 16 : i32
    %47 = vector.broadcast %c16_i32 : i32 to vector<160x1xi32>
    %48 = arith.cmpi slt, %42, %47 : vector<160x1xi32>
    %c144_i32 = arith.constant 144 : i32
    %49 = vector.broadcast %c144_i32 : i32 to vector<160x1xi32>
    %50 = arith.cmpi sge, %42, %49 : vector<160x1xi32>
    %cst_32 = arith.constant 1.000000e+00 : f32
    %51 = vector.broadcast %46 : f32 to vector<160x1xf32>
    %52 = vector.broadcast %cst_32 : f32 to vector<160x1xf32>
    %53 = arith.select %50, %51, %52 : vector<160x1xi1>, vector<160x1xf32>
    %54 = vector.broadcast %44 : f32 to vector<160x1xf32>
    %55 = arith.select %48, %54, %53 : vector<160x1xi1>, vector<160x1xf32>
    %56 = vector.broadcast %55 : vector<160x1xf32> to vector<160x256xf32>
    %57 = arith.mulf %41, %56 : vector<160x256xf32>
    %c16_i32_33 = arith.constant 16 : i32
    %c0_i32_34 = arith.constant 0 : i32
    %58 = arith.cmpi eq, %c16_i32_33, %c0_i32_34 : i32
    %c1_i32_35 = arith.constant 1 : i32
    %59 = arith.select %58, %c1_i32_35, %c16_i32_33 : i32
    %60 = vector.broadcast %59 : i32 to vector<160x1xi32>
    %61 = arith.remsi %42, %60 : vector<160x1xi32>
    %c0_i32_36 = arith.constant 0 : i32
    %62 = vector.broadcast %c0_i32_36 : i32 to vector<160x1xi32>
    %63 = arith.cmpi ne, %61, %62 : vector<160x1xi32>
    %c0_i32_37 = arith.constant 0 : i32
    %64 = vector.broadcast %c0_i32_37 : i32 to vector<160x1xi32>
    %65 = arith.cmpi slt, %61, %64 : vector<160x1xi32>
    %c0_i32_38 = arith.constant 0 : i32
    %66 = arith.cmpi slt, %59, %c0_i32_38 : i32
    %67 = vector.broadcast %66 : i1 to vector<160x1xi1>
    %68 = vector.broadcast %67 : vector<160x1xi1> to vector<160x1xi1>
    %69 = arith.xori %65, %68 : vector<160x1xi1>
    %70 = arith.andi %69, %63 : vector<160x1xi1>
    %71 = vector.broadcast %59 : i32 to vector<160x1xi32>
    %72 = arith.addi %61, %71 : vector<160x1xi32>
    %73 = arith.select %70, %72, %61 : vector<160x1xi1>, vector<160x1xi32>
    %c0_i32_39 = arith.constant 0 : i32
    %74 = vector.broadcast %c0_i32_39 : i32 to vector<160x1xi32>
    %75 = arith.cmpi sgt, %73, %74 : vector<160x1xi32>
    %c15_i32 = arith.constant 15 : i32
    %76 = vector.broadcast %c15_i32 : i32 to vector<160x1xi32>
    %77 = arith.cmpi slt, %73, %76 : vector<160x1xi32>
    %c8 = arith.constant 8 : index
    %c0_40 = arith.constant 0 : index
    %78 = vector.load %arg14[%c8, %c0_40] : memref<176x256xf32, #tpu.memory_space<vmem>>, vector<160x256xf32>
    tpu.vector_store %arg14[%c8, %c0_40], %57 {strides = array<i32>} : memref<176x256xf32, #tpu.memory_space<vmem>>, vector<160x256xf32>,
    %c7 = arith.constant 7 : index
    %c0_41 = arith.constant 0 : index
    %79 = vector.load %arg14[%c7, %c0_41] : memref<176x256xf32, #tpu.memory_space<vmem>>, vector<160x256xf32>
    %cst_42 = arith.constant 0.000000e+00 : f32
    %80 = vector.shape_cast %75 : vector<160x1xi1> to vector<160x1xi1>
    %81 = vector.broadcast %80 : vector<160x1xi1> to vector<160x256xi1>
    %82 = vector.broadcast %cst_42 : f32 to vector<160x256xf32>
    %83 = arith.select %81, %79, %82 : vector<160x256xi1>, vector<160x256xf32>
    %c9 = arith.constant 9 : index
    %c0_43 = arith.constant 0 : index
    %84 = vector.load %arg14[%c9, %c0_43] : memref<176x256xf32, #tpu.memory_space<vmem>>, vector<160x256xf32>
    %cst_44 = arith.constant 0.000000e+00 : f32
    %85 = vector.shape_cast %77 : vector<160x1xi1> to vector<160x1xi1>
    %86 = vector.broadcast %85 : vector<160x1xi1> to vector<160x256xi1>
    %87 = vector.broadcast %cst_44 : f32 to vector<160x256xf32>
    %88 = arith.select %86, %84, %87 : vector<160x256xi1>, vector<160x256xf32>
    %c0_45 = arith.constant 0 : index
    %c0_46 = arith.constant 0 : index
    %89 = vector.load %arg9[%c0_45, %c0_46] : memref<9x256xf32, #tpu.memory_space<vmem>>, vector<9x256xf32>
    %cst_47 = arith.constant 0.000000e+00 : f32
    %90 = vector.broadcast %cst_47 : f32 to vector<128x256xf32>
    %91 = vector.extract_strided_slice %83 {offsets = [0, 0], sizes = [128, 256], strides = [1, 1]} : vector<160x256xf32> to vector<128x256xf32>
    %92 = vector.extract_strided_slice %89 {offsets = [0, 0], sizes = [1, 256], strides = [1, 1]} : vector<9x256xf32> to vector<1x256xf32>
    %93 = vector.broadcast %92 : vector<1x256xf32> to vector<128x256xf32>
    %94 = arith.mulf %91, %93 : vector<128x256xf32>
    %95 = arith.addf %90, %94 : vector<128x256xf32>
    %96 = vector.extract_strided_slice %57 {offsets = [0, 0], sizes = [128, 256], strides = [1, 1]} : vector<160x256xf32> to vector<128x256xf32>
    %97 = vector.extract_strided_slice %89 {offsets = [1, 0], sizes = [1, 256], strides = [1, 1]} : vector<9x256xf32> to vector<1x256xf32>
    %98 = vector.broadcast %97 : vector<1x256xf32> to vector<128x256xf32>
    %99 = arith.mulf %96, %98 : vector<128x256xf32>
    %100 = arith.addf %95, %99 : vector<128x256xf32>
    %101 = vector.extract_strided_slice %88 {offsets = [0, 0], sizes = [128, 256], strides = [1, 1]} : vector<160x256xf32> to vector<128x256xf32>
    %102 = vector.extract_strided_slice %89 {offsets = [2, 0], sizes = [1, 256], strides = [1, 1]} : vector<9x256xf32> to vector<1x256xf32>
    %103 = vector.broadcast %102 : vector<1x256xf32> to vector<128x256xf32>
    %104 = arith.mulf %101, %103 : vector<128x256xf32>
    %105 = arith.addf %100, %104 : vector<128x256xf32>
    %106 = vector.extract_strided_slice %83 {offsets = [16, 0], sizes = [128, 256], strides = [1, 1]} : vector<160x256xf32> to vector<128x256xf32>
    %107 = vector.extract_strided_slice %89 {offsets = [3, 0], sizes = [1, 256], strides = [1, 1]} : vector<9x256xf32> to vector<1x256xf32>
    %108 = vector.broadcast %107 : vector<1x256xf32> to vector<128x256xf32>
    %109 = arith.mulf %106, %108 : vector<128x256xf32>
    %110 = arith.addf %105, %109 : vector<128x256xf32>
    %111 = vector.extract_strided_slice %57 {offsets = [16, 0], sizes = [128, 256], strides = [1, 1]} : vector<160x256xf32> to vector<128x256xf32>
    %112 = vector.extract_strided_slice %89 {offsets = [4, 0], sizes = [1, 256], strides = [1, 1]} : vector<9x256xf32> to vector<1x256xf32>
    %113 = vector.broadcast %112 : vector<1x256xf32> to vector<128x256xf32>
    %114 = arith.mulf %111, %113 : vector<128x256xf32>
    %115 = arith.addf %110, %114 : vector<128x256xf32>
    %116 = vector.extract_strided_slice %88 {offsets = [16, 0], sizes = [128, 256], strides = [1, 1]} : vector<160x256xf32> to vector<128x256xf32>
    %117 = vector.extract_strided_slice %89 {offsets = [5, 0], sizes = [1, 256], strides = [1, 1]} : vector<9x256xf32> to vector<1x256xf32>
    %118 = vector.broadcast %117 : vector<1x256xf32> to vector<128x256xf32>
    %119 = arith.mulf %116, %118 : vector<128x256xf32>
    %120 = arith.addf %115, %119 : vector<128x256xf32>
    %121 = vector.extract_strided_slice %83 {offsets = [32, 0], sizes = [128, 256], strides = [1, 1]} : vector<160x256xf32> to vector<128x256xf32>
    %122 = vector.extract_strided_slice %89 {offsets = [6, 0], sizes = [1, 256], strides = [1, 1]} : vector<9x256xf32> to vector<1x256xf32>
    %123 = vector.broadcast %122 : vector<1x256xf32> to vector<128x256xf32>
    %124 = arith.mulf %121, %123 : vector<128x256xf32>
    %125 = arith.addf %120, %124 : vector<128x256xf32>
    %126 = vector.extract_strided_slice %57 {offsets = [32, 0], sizes = [128, 256], strides = [1, 1]} : vector<160x256xf32> to vector<128x256xf32>
    %127 = vector.extract_strided_slice %89 {offsets = [7, 0], sizes = [1, 256], strides = [1, 1]} : vector<9x256xf32> to vector<1x256xf32>
    %128 = vector.broadcast %127 : vector<1x256xf32> to vector<128x256xf32>
    %129 = arith.mulf %126, %128 : vector<128x256xf32>
    %130 = arith.addf %125, %129 : vector<128x256xf32>
    %131 = vector.extract_strided_slice %88 {offsets = [32, 0], sizes = [128, 256], strides = [1, 1]} : vector<160x256xf32> to vector<128x256xf32>
    %132 = vector.extract_strided_slice %89 {offsets = [8, 0], sizes = [1, 256], strides = [1, 1]} : vector<9x256xf32> to vector<1x256xf32>
    %133 = vector.broadcast %132 : vector<1x256xf32> to vector<128x256xf32>
    %134 = arith.mulf %131, %133 : vector<128x256xf32>
    %135 = arith.addf %130, %134 : vector<128x256xf32>
    %c0_48 = arith.constant 0 : index
    %c0_49 = arith.constant 0 : index
    %136 = vector.load %arg10[%c0_48, %c0_49] : memref<1x256xf32, #tpu.memory_space<vmem>>, vector<1x256xf32>
    %137 = vector.broadcast %136 : vector<1x256xf32> to vector<128x256xf32>
    %138 = arith.addf %135, %137 : vector<128x256xf32>
    %139 = vector.extract_strided_slice %138 {offsets = [0, 0], sizes = [128, 128], strides = [1, 1]} : vector<128x256xf32> to vector<128x128xf32>
    %140 = vector.extract_strided_slice %138 {offsets = [0, 128], sizes = [128, 128], strides = [1, 1]} : vector<128x256xf32> to vector<128x128xf32>
    %141 = arith.mulf %139, %140 : vector<128x128xf32>
    %142 = arith.truncf %141 : vector<128x128xf32> to vector<128x128xbf16>
    %c0_50 = arith.constant 0 : index
    %c0_51 = arith.constant 0 : index
    %c0_52 = arith.constant 0 : index
    %143 = vector.load %arg11[%c0_50, %c0_51, %c0_52] : memref<1x128x128xbf16, #tpu.memory_space<vmem>>, vector<1x128x128xbf16>
    %144 = vector.shape_cast %143 : vector<1x128x128xbf16> to vector<128x128xbf16>
    %145 = vector.shape_cast %142 : vector<128x128xbf16> to vector<1x128x128xbf16>
    tpu.vector_store %arg11[%c0_50, %c0_51, %c0_52], %145 {strides = array<i32>} : memref<1x128x128xbf16, #tpu.memory_space<vmem>>, vector<1x128x128xbf16>,
    %cst_53 = arith.constant dense<0.000000e+00> : vector<128xf32>
    %146 = vector.multi_reduction <add>, %141, %cst_53 [0] : vector<128x128xf32> to vector<128xf32>
    %147 = vector.shape_cast %146 : vector<128xf32> to vector<1x128xf32>
    %c0_i32_54 = arith.constant 0 : i32
    %148 = arith.cmpi eq, %arg1, %c0_i32_54 : i32
    %149 = arith.extui %148 : i1 to i32
    %c0_i32_55 = arith.constant 0 : i32
    %150 = arith.cmpi ne, %149, %c0_i32_55 : i32
    scf.if %150 {
      %c0_58 = arith.constant 0 : index
      %c0_59 = arith.constant 0 : index
      %c0_60 = arith.constant 0 : index
      %154 = vector.load %arg12[%c0_58, %c0_59, %c0_60] : memref<1x1x128xf32, #tpu.memory_space<vmem>>, vector<1x1x128xf32>
      %155 = vector.shape_cast %154 : vector<1x1x128xf32> to vector<1x128xf32>
      %156 = vector.shape_cast %147 : vector<1x128xf32> to vector<1x1x128xf32>
      tpu.vector_store %arg12[%c0_58, %c0_59, %c0_60], %156 {strides = array<i32>} : memref<1x1x128xf32, #tpu.memory_space<vmem>>, vector<1x1x128xf32>,
    } else {
    }
    %c0_i32_56 = arith.constant 0 : i32
    %151 = arith.cmpi sgt, %arg1, %c0_i32_56 : i32
    %152 = arith.extui %151 : i1 to i32
    %c0_i32_57 = arith.constant 0 : i32
    %153 = arith.cmpi ne, %152, %c0_i32_57 : i32
    scf.if %153 {
      %c0_58 = arith.constant 0 : index
      %c0_59 = arith.constant 0 : index
      %c0_60 = arith.constant 0 : index
      %154 = vector.load %arg12[%c0_58, %c0_59, %c0_60] : memref<1x1x128xf32, #tpu.memory_space<vmem>>, vector<1x1x128xf32>
      %155 = vector.shape_cast %154 : vector<1x1x128xf32> to vector<1x128xf32>
      %156 = arith.addf %155, %147 : vector<1x128xf32>
      %c0_61 = arith.constant 0 : index
      %c0_62 = arith.constant 0 : index
      %c0_63 = arith.constant 0 : index
      %157 = vector.load %arg12[%c0_61, %c0_62, %c0_63] : memref<1x1x128xf32, #tpu.memory_space<vmem>>, vector<1x1x128xf32>
      %158 = vector.shape_cast %157 : vector<1x1x128xf32> to vector<1x128xf32>
      %159 = vector.shape_cast %156 : vector<1x128xf32> to vector<1x1x128xf32>
      tpu.vector_store %arg12[%c0_61, %c0_62, %c0_63], %159 {strides = array<i32>} : memref<1x1x128xf32, #tpu.memory_space<vmem>>, vector<1x1x128xf32>,
    } else {
    }
    return
  }
  func.func @transform_0(%arg0: i32, %arg1: i32) -> (i32, i32, i32) {
    %c8_i32 = arith.constant 8 : i32
    %0 = arith.muli %arg1, %c8_i32 : i32
    %c1_i32 = arith.constant 1 : i32
    %1 = arith.subi %0, %c1_i32 : i32
    %c0_i32 = arith.constant 0 : i32
    %2 = arith.maxsi %1, %c0_i32 : i32
    %c0_i32_0 = arith.constant 0 : i32
    %c0_i32_1 = arith.constant 0 : i32
    return %arg0, %2, %c0_i32_0 : i32, i32, i32
  }
  func.func @transform_1(%arg0: i32, %arg1: i32) -> (i32, i32, i32) {
    %c0_i32 = arith.constant 0 : i32
    %c0_i32_0 = arith.constant 0 : i32
    return %arg0, %arg1, %c0_i32 : i32, i32, i32
  }
  func.func @transform_2(%arg0: i32, %arg1: i32) -> (i32, i32, i32) {
    %c1_i32 = arith.constant 1 : i32
    %0 = arith.addi %arg1, %c1_i32 : i32
    %c8_i32 = arith.constant 8 : i32
    %1 = arith.muli %0, %c8_i32 : i32
    %c15_i32 = arith.constant 15 : i32
    %2 = arith.minsi %1, %c15_i32 : i32
    %c0_i32 = arith.constant 0 : i32
    %c0_i32_0 = arith.constant 0 : i32
    return %arg0, %2, %c0_i32 : i32, i32, i32
  }
  func.func @transform_3(%arg0: i32, %arg1: i32) -> (i32, i32) {
    %c0_i32 = arith.constant 0 : i32
    %c0_i32_0 = arith.constant 0 : i32
    %c0_i32_1 = arith.constant 0 : i32
    return %c0_i32, %c0_i32_0 : i32, i32
  }
  func.func @transform_4(%arg0: i32, %arg1: i32) -> (i32, i32) {
    %c0_i32 = arith.constant 0 : i32
    %c0_i32_0 = arith.constant 0 : i32
    %c0_i32_1 = arith.constant 0 : i32
    return %c0_i32, %c0_i32_0 : i32, i32
  }
  func.func @transform_5(%arg0: i32, %arg1: i32) -> (i32, i32) {
    %c0_i32 = arith.constant 0 : i32
    %c0_i32_0 = arith.constant 0 : i32
    %c0_i32_1 = arith.constant 0 : i32
    return %c0_i32, %c0_i32_0 : i32, i32
  }
  func.func @transform_6(%arg0: i32, %arg1: i32) -> (i32, i32) {
    %c0_i32 = arith.constant 0 : i32
    %c0_i32_0 = arith.constant 0 : i32
    %c0_i32_1 = arith.constant 0 : i32
    return %c0_i32, %c0_i32_0 : i32, i32
  }
  func.func @transform_7(%arg0: i32, %arg1: i32) -> (i32, i32) {
    %c0_i32 = arith.constant 0 : i32
    %c0_i32_0 = arith.constant 0 : i32
    %c0_i32_1 = arith.constant 0 : i32
    return %c0_i32, %c0_i32_0 : i32, i32
  }
  func.func @transform_8(%arg0: i32, %arg1: i32) -> (i32, i32) {
    %c0_i32 = arith.constant 0 : i32
    %c0_i32_0 = arith.constant 0 : i32
    %c0_i32_1 = arith.constant 0 : i32
    return %c0_i32, %c0_i32_0 : i32, i32
  }
  func.func @transform_9(%arg0: i32, %arg1: i32) -> (i32, i32, i32) {
    %c0_i32 = arith.constant 0 : i32
    %c0_i32_0 = arith.constant 0 : i32
    return %arg0, %arg1, %c0_i32 : i32, i32, i32
  }
  func.func @transform_10(%arg0: i32, %arg1: i32) -> (i32, i32, i32) {
    %c0_i32 = arith.constant 0 : i32
    %c0_i32_0 = arith.constant 0 : i32
    %c0_i32_1 = arith.constant 0 : i32
    return %arg0, %c0_i32, %c0_i32_0 : i32, i32, i32
  }
}

</mosaic_0001>

<bundles_post_ra>
// kernel: tpu_custom_call.1
= control target key start
LH: loop header
LB: loop body
LE: loop exit
PB: predicated region body
PF: predicated region fallthrough
CT: control target
= control target key end

     0   :  { %s6352_s0 = inlined_call_operand.hbm [shape: f32[2,256,128], index: 0, kind: input, shape index: {}]   ;;  %s6353_s1 = inlined_call_operand.hbm [shape: f32[2,256,128], index: 1, kind: input, shape index: {}]   ;;  %s6354_s2 = inlined_call_operand.hbm [shape: f32[2,256,128], index: 2, kind: input, shape index: {}]   ;;  %s6355_s3 = inlined_call_operand.vmem [shape: f32[1,128], index: 3, kind: input, shape index: {}]   ;;  %s6356_s4 = inlined_call_operand.vmem [shape: f32[1,128], index: 4, kind: input, shape index: {}]   ;;  %s6357_s5 = inlined_call_operand.hbm [shape: bf16[128,256], index: 5, kind: input, shape index: {}]   ;;  %s6358_s6 = inlined_call_operand.vmem [shape: f32[1,256], index: 6, kind: input, shape index: {}]   ;;  %s6359_s7 = inlined_call_operand.hbm [shape: f32[9,256], index: 7, kind: input, shape index: {}]   ;;  %s6360_s8 = inlined_call_operand.vmem [shape: f32[1,256], index: 8, kind: input, shape index: {}]   ;;  %s6361_s9 = inlined_call_operand.hbm [shape: bf16[2,256,128], index: 9, kind: output, shape index: {0}]   ;;  %s6362_s10 = inlined_call_operand.hbm [shape: f32[2,1,128], index: 10, kind: output, shape index: {1}]  }
   0x1   :  { %6459 = sst [smem:[#allocation88_spill]] %s6352_s0 }
   0x2   :  { %6460 = sst [smem:[#allocation89_spill]] %s6353_s1 }
   0x3   :  { %6461 = sst [smem:[#allocation90_spill]] %s6354_s2 }
   0x4   :  { %6462 = sst [smem:[#allocation91_spill]] %s6355_s3 }
   0x5   :  { %6463 = sst [smem:[#allocation92_spill]] %s6356_s4 }
   0x6   :  { %6464 = sst [smem:[#allocation93_spill]] %s6357_s5 }
   0x7   :  { %6465 = sst [smem:[#allocation94_spill]] %s6358_s6 }
   0x8   :  { %6466 = sst [smem:[#allocation95_spill]] %s6359_s7 }
   0x9   :  { %6467 = sst [smem:[#allocation96_spill]] %s6360_s8 }
   0xa   :  { %6468 = sst [smem:[#allocation97_spill]] %s6361_s9 }
   0xb   :  { %6469 = sst [smem:[#allocation98_spill]] %s6362_s10 }
   0xc   :  { %16 = vsyncpa [#allocation5], 0 }
   0xd   :  { %18 = vsyncpa [#allocation5 + $0x1], 0 }
   0xe   :  { %19 = vsyncpa [#allocation8], 0 }
   0xf   :  { %21 = vsyncpa [#allocation8 + $0x1], 0 }
  0x10   :  { %22 = vsyncpa [#allocation11], 0 }
  0x11   :  { %23 = vsyncpa [#allocation6], 0 }
  0x12   :  { %25 = vsyncpa [#allocation6 + $0x1], 0 }
  0x13   :  { %26 = vsyncpa [#allocation15], 0 }
  0x14   :  { %28 = vsyncpa [#allocation15 + $0x1], 0  ;;  %s4126_s13 = smov 0   ;;  %s4128_s14 = smov 0  }
  0x15   :  { %s4130_s15 = smov 0   ;;  %s4132_s16 = smov 0  }
  0x16   :  { %s4134_s17 = smov 0   ;;  %s4136_s18 = smov 0  }
  0x17   :  { %s4138_s19 = smov 0   ;;  %s4140_s20 = smov 0  }
  0x18   :  { %s4142_s21 = smov 0   ;;  %s4144_s22 = smov 0  }
  0x19   :  { %s4146_s23 = smov 0   ;;  %s4148_s24 = smov 0  }
  0x1a   :  { %s4150_s25 = smov 0   ;;  %s4152_s26 = smov 0  }
  0x1b   :  { %s4154_s27 = smov 0   ;;  %s4156_s28 = smov 0  }
  0x1c   :  { %s4158_s29 = smov 0  }
  0x1d LB: > { %6470 = sst [smem:[#allocation22_spill]] %s3991_s13  ;;  %s4212_s30 = sadd.s32 4294967295, %s4055_s29   ;;  %s4055_s29 = sphi %s4158_s29, %s34_s29   ;;  %s4051_s28 = sphi %s4156_s28, %s6754_s28   ;;  %s4047_s27 = sphi %s4154_s27, %s6753_s27   ;;  %s4043_s26 = sphi %s4152_s26, %s6763_s26   ;;  %s4039_s25 = sphi %s4150_s25, %s6751_s25   ;;  %s4035_s24 = sphi %s4148_s24, %s6762_s24   ;;  %s4031_s23 = sphi %s4146_s23, %s6761_s23   ;;  %s4027_s22 = sphi %s4144_s22, %s6760_s22   ;;  %s4023_s21 = sphi %s4142_s21, %s6759_s21   ;;  %s4019_s20 = sphi %s4140_s20, %s6749_s20   ;;  %s4015_s19 = sphi %s4138_s19, %s6748_s19   ;;  %s4011_s18 = sphi %s4136_s18, %s6758_s18   ;;  %s4007_s17 = sphi %s4134_s17, %s6747_s17   ;;  %s4003_s16 = sphi %s4132_s16, %s6746_s16   ;;  %s3999_s15 = sphi %s4130_s15, %s6757_s15   ;;  %s3995_s14 = sphi %s4128_s14, %s6755_s14   ;;  %s3991_s13 = sphi %s4126_s13, %s6744_s13  }
  0x1e   : > { %6471 = sst [smem:[#allocation23_spill]] %s3995_s14  ;;  %p6376_p0 = scmp.eq.s32.totalorder %s4212_s30, 0 }
  0x1f   : > { %6472 = sst [smem:[#allocation24_spill]] %s4003_s16  ;;  %p292_p1 = scmp.eq.s32.totalorder %s4212_s30, 3 }
  0x20   : > { %6473 = sst [smem:[#allocation25_spill]] %s4007_s17  ;;  %p317_p2 = scmp.ne.s32.totalorder %s3999_s15, %s3995_s14 }
  0x21   : > { %6474 = sst [smem:[#allocation26_spill]] %s4011_s18  ;;  %p3294_p4 = scmp.ge.s32.totalorder %s4055_s29, 1 }
  0x22   : > { %6475 = sst [smem:[#allocation27_spill]] %s4015_s19  ;;  %p331_p5 = scmp.lt.s32.totalorder %s4055_s29, 5 }
  0x23   : > { %6476 = sst [smem:[#allocation28_spill]] %s4019_s20  ;;  %p4225_p6 = por %p317_p2, %p292_p1 }
  0x24   : > { %6477 = sst [smem:[#allocation29_spill]] %s4023_s21  ;;  %p4229_p7 = pnand %p3294_p4, %p331_p5 }
  0x25   : > { %6478 = sst [smem:[#allocation30_spill]] %s4039_s25  ;;  %s4057_s9 = smov [#allocation10]  }
  0x26   : > { %6479 = sst [smem:[#allocation31_spill]] %s4043_s26  ;;  %s349_s26 = sshll.u32 %s4057_s9, 4  ;;  %s350_s26 = int_to_ptr.vmem [resolvable:$true] %s349_s26 }
  0x27   : > { %6480 = sst [smem:[#allocation32_spill]] %s4047_s27  ;;  %p3468_p8 = pneg %p4229_p7 }
  0x28   : > { %6481 = sst [smem:[#allocation33_spill]] %s4051_s28  ;;  %p3728_p2 = scmp.lt.s32.totalorder %s350_s26, %s350_s26 }
  0x29   : > { %s6482_s12 = scalar_select %p4225_p6, 1, 0 }
  0x2a   : > { %s6484_s10 = scalar_select %p4229_p7, 1, 0 }
  0x2b   : > { %6483 = sst [smem:[#allocation34_spill]] %s6482_s12  ;;  %p4237_p9 = pnand %p3468_p8, %p6376_p0 }
  0x2c   : > { %6485 = sst [smem:[#allocation35_spill]] %s6484_s10  ;;  %s3720_s12 = scalar_lea.vmem %s350_s26, 2048 }
  0x2d   : > { %p6375_p10 = pneg %p4237_p9  ;;  %p3721_p11 = scmp.ne.s32.totalorder %s350_s26, %s3720_s12 }
  0x2e   : > { %p3729_p4 = scmp.lt.s32.totalorder %s3720_s12, %s3720_s12 }
  0x2f   : > { %p3723_p12 = pnand %p3721_p11, %p6375_p10 }
  0x30   : > { %p3730_p5 = por %p3729_p4, %p3728_p2 }
  0x31   : > { %p3724_p13 = pneg %p3723_p12 }
  0x33   : > { %p3731_p3 = pnand %p3730_p5, %p3724_p13 }
  0x35   : > { %3734 = shalt.err (!%p3731_p3)
}
  0x36   : > { %s6370_s9 = smov 128   ;;  %s6373_s8 = smov 8  }
  0x37   : > { %s6487_s5 = sld [smem:[#allocation93_spill]]  ;;  %s3287_s25 = sadd.s32 4294967294, %s4055_s29  }
  0x38   : > { %s43_s4 = sadd.s32 1, %s4047_s27  ;;  %s46_s3 = sadd.s32 1, %s4051_s28 }
  0x39   : > { %p44_p3 = scmp.ge.s32.totalorder %s43_s4, 2  ;;  %p6372_p8 = scmp.eq.s32.totalorder %s4055_s29, 0 }
  0x3a   : > { %s91_s10 = sadd.s32 1, %s4023_s21  ;;  %p98_p11 = scmp.ne.s32.totalorder %s4023_s21, %s4019_s20 }
  0x3b   : > { %s6765_s4 = smov (%p44_p3, %s43_s4), 0  ;;  %s6767_s3 = smov (!%p44_p3, %s46_s3), %s4051_s28 }
  0x3c   : > { %6488 = sst [smem:[#allocation36_spill]] %s6765_s4  ;;  %s87_s2 = ssub.s32 %s4047_s27, %s6765_s4 }
  0x3d   : > { %3471 = dma.hbm_to_vmem [thread:$0]  (!%p4237_p9), %s6487_s5, 2048, %s350_s26, [#allocation11], %s6370_s9, %s6370_s9, %s6373_s8  }
  0x3e   : > { %p48_p12 = scmp.ge.s32.totalorder %s6767_s3, 2  ;;  %p104_p13 = scmp.ne.s32.totalorder %s4019_s20, %s4015_s19 }
  0x3f   : > { %p4270_p2 = por %p98_p11, %p6372_p8  ;;  %p4276_p4 = por %p292_p1, %p98_p11 }
  0x40   : > { %s6769_s3 = smov (%p48_p12, %s6767_s3), 0  ;;  %p4284_p5 = por %p104_p13, %p6376_p0 }
  0x41   : > { %s6490_s26 = scalar_select %p4276_p4, 1, 0 }
  0x42   : > { %6492 = sst [smem:[#allocation38_spill]] %s6769_s3  ;;  %p298_p3 = scmp.eq.s32.totalorder %s3287_s25, 3 }
  0x43   : > { %6491 = sst [smem:[#allocation37_spill]] %s6490_s26  ;;  %s4290_s9 = ssub.s32 %s4051_s28, %s6769_s3 }
  0x44   : > { %s6493_s12 = scalar_select %p4284_p5, 1, 0 }
  0x45   : > { %p6391_p8 = scmp.lt.s32.totalorder %s4055_s29, 4  ;;  %s88_s8 = sor.u32 %s87_s2, %s4290_s9 }
  0x46   : > { %6494 = sst [smem:[#allocation39_spill]] %s6493_s12  ;;  %p4294_p1 = por %p298_p3, %p104_p13 }
  0x47   : > { %p89_p11 = scmp.eq.s32.totalorder %s88_s8, 0  ;;  %p305_p12 = scmp.eq.s32.totalorder %s4290_s9, 0 }
  0x48   : > { %s6495_s5 = scalar_select %p4294_p1, 1, 0 }
  0x49   : > { %p6497_p10 = scmp.ne.s32.totalorder %s3995_s14, %s3991_s13  ;;  %s4307_s25 = sshll.u32 %s4051_s28, 5 }
  0x4a   : > { %6496 = sst [smem:[#allocation40_spill]] %s6495_s5  ;;  %s6500_s26 = sadd.s32 1, %s3999_s15 }
  0x4b   : > { %p4302_p0 = por %p6497_p10, %p298_p3  ;;  %s409_s12 = sand.u32 1, %s4055_s29  }
  0x4c   : > { %s4310_s3 = scalar_select %p89_p11, %s4023_s21, %s91_s10  }
  0x4d   : > { %s6498_s19 = scalar_select %p4302_p0, 1, 0 }
  0x4e   : > { %6499 = sst [smem:[#allocation41_spill]] %s4310_s3  ;;  %s411_s20 = sand.u32 1, %s4023_s21  }
  0x4f   : > { %s4315_s2 = scalar_select %p305_p12, %s3999_s15, %s6500_s26  }
  0x50   : > { %s3304_s5 = sshll.u32 %s411_s20, 7  ;;  %s3305_s8 = sshll.u32 %s4047_s27, 4 }
  0x51   : > { %6501 = sst [smem:[#allocation42_spill]] %s4315_s2  ;;  %s419_s16 = sadd.s32 %s3305_s8, %s4307_s25 }
  0x52   : > { %s413_s17 = scalar_lea.vmem [#allocation7], %s3304_s5  ;;  %s3307_s13 = sshll.u32 %s419_s16, 7 }
  0x53   : > { %s422_s18 = sshll.u32 %s413_s17, 4  ;;  %s6502_s1 = sld [smem:[#allocation89_spill]]  ;;  %s423_s18 = int_to_ptr.vmem [resolvable:$true] %s422_s18 }
  0x54   : > { %p4328_p10 = pnand %p6391_p8, %p4270_p2  ;;  %s4060_s26 = smov [#allocation12]  }
  0x55   : > { %s365_s3 = sshll.u32 %s4060_s26, 4  ;;  %s4332_s20 = scalar_lea.sflag [#allocation8], %s409_s12  ;;  %s366_s3 = int_to_ptr.vmem [resolvable:$true] %s365_s3 }
  0x56   : > { %p3737_p13 = pneg %p4328_p10  ;;  %s3748_s5 = scalar_lea.vmem %s423_s18, 2048 }
  0x57   : > { %p3749_p3 = scmp.ne.s32.totalorder %s423_s18, %s3748_s5  ;;  %s4061_s16 = smov [#allocation7]  }
  0x58   : > { %s3753_s0 = sshll.u32 %s4061_s16, 4  ;;  %s3754_s0 = int_to_ptr.vmem [resolvable:$false] %s3753_s0 }
  0x59   : > { %s421_s28 = scalar_lea.hbm %s6502_s1, %s3307_s13  ;;  %p3751_p11 = pnand %p3749_p3, %p3737_p13 }
  0x5a   : > { %s3755_s13 = scalar_lea.vmem %s3754_s0, 4096  ;;  %p3756_p0 = scmp.lt.s32.totalorder %s423_s18, %s3754_s0 }
  0x5b   : > { %p3752_p12 = pneg %p3751_p11  ;;  %p3757_p2 = scmp.lt.s32.totalorder %s3755_s13, %s3748_s5 }
  0x5d   : > { %p3758_p8 = por %p3757_p2, %p3756_p0 }
  0x5f   : > { %p3759_p1 = pnand %p3758_p8, %p3752_p12 }
  0x61   : > { %3762 = shalt.err (!%p3759_p1)
}
  0x62   : > { %s6504_s14 = smov 8   ;;  %s6505_s17 = smov 128  }
  0x63   : > { %3481 = dma.hbm_to_vmem [thread:$0]  (!%p4328_p10), %s421_s28, 2048, %s423_s18, %s4332_s20, %s6505_s17, %s6505_s17, %s6504_s14  }
  0x64   : > { %s3774_s6 = scalar_lea.vmem %s366_s3, 512  ;;  %p6506_p3 = pneg %p4237_p9 }
  0x65   : > { %p3775_p13 = scmp.ne.s32.totalorder %s366_s3, %s3774_s6  ;;  %p3782_p4 = scmp.lt.s32.totalorder %s366_s3, %s366_s3 }
  0x66   : > { %p3783_p5 = scmp.lt.s32.totalorder %s3774_s6, %s3774_s6 }
  0x67   : > { %p3777_p11 = pnand %p3775_p13, %p6506_p3 }
  0x68   : > { %p3784_p0 = por %p3783_p5, %p3782_p4 }
  0x69   : > { %p3778_p6 = pneg %p3777_p11 }
  0x6b   : > { %p3785_p8 = pnand %p3784_p0, %p3778_p6 }
  0x6d   : > { %3788 = shalt.err (!%p3785_p8)
}
  0x6e   : > { %s4062_s12 = smov 256   ;;  %s4063_s18 = smov 16  }
  0x6f   : > { %s6507_s7 = sld [smem:[#allocation95_spill]]  ;;  %s3288_s10 = sshll.u32 %s4047_s27, 3 }
  0x70   : > { %s3290_s26 = sshll.u32 %s6765_s4, 3  ;;  %s3289_s5 = sadd.s32 4294967295, %s3288_s10 }
  0x71   : > { %s3291_s16 = sadd.s32 4294967295, %s3290_s26  ;;  %p52_p6 = scmp.gt.s32.totalorder %s3289_s5, 0 }
  0x72   : > { %p56_p4 = scmp.gt.s32.totalorder %s3291_s16, 0  ;;  %s63_s0 = sadd.s32 1, %s4035_s24 }
  0x73   : > { %p70_p5 = scmp.ne.s32.totalorder %s4035_s24, %s4031_s23  ;;  %s6771_s5 = smov (!%p52_p6, %s3289_s5), 0 }
  0x74   : > { %s6773_s16 = smov (!%p56_p4, %s3291_s16), 0  ;;  %p6508_p1 = scmp.eq.s32.totalorder %s4055_s29, 0 }
  0x75   : > { %3474 = dma.hbm_to_vmem [thread:$0]  (!%p4237_p9), %s6507_s7, 512, %s366_s3, [#allocation11], %s4062_s12, %s4062_s12, %s4063_s18  }
  0x76   : > { %p4357_p10 = por %p6508_p1, %p70_p5  ;;  %p76_p9 = scmp.ne.s32.totalorder %s4031_s23, %s4027_s22 }
  0x77   : > { %s59_s3 = ssub.s32 %s6771_s5, %s6773_s16  ;;  %s4363_s13 = sadd.s32 8, %s3288_s10 }
  0x78   : > { %s60_s6 = sor.u32 %s59_s3, %s4290_s9  ;;  %p6510_p12 = scmp.eq.s32.totalorder %s4212_s30, 0 }
  0x79   : > { %p61_p13 = scmp.eq.s32.totalorder %s60_s6, 0  ;;  %p116_p3 = scmp.lt.s32.totalorder %s4363_s13, 15 }
  0x7a   : > { %p4368_p2 = por %p6510_p12, %p76_p9  ;;  %s4373_s18 = sadd.s32 8, %s3290_s26 }
  0x7b   : > { %s382_s28 = sand.u32 1, %s4035_s24   ;;  %s3301_s10 = sshll.u32 %s6771_s5, 1 }
  0x7c   : > { %s4377_s8 = scalar_select %p61_p13, %s4035_s24, %s63_s0  }
  0x7d   : > { %s3298_s22 = sshll.u32 %s382_s28, 4  ;;  %s396_s16 = sadd.s32 %s4307_s25, %s3301_s10 }
  0x7e   : > { %s3303_s3 = sshll.u32 %s396_s16, 7  ;;  %s386_s1 = scalar_lea.vmem [#allocation4], %s3298_s22 }
  0x7f   : > { %s399_s7 = sshll.u32 %s386_s1, 4  ;;  %s6512_s21 = sld [smem:[#allocation88_spill]]  ;;  %s400_s7 = int_to_ptr.vmem [resolvable:$true] %s399_s7 }
  0x80   : > { %p6513_p0 = scmp.lt.s32.totalorder %s4055_s29, 4  ;;  %s383_s0 = scalar_lea.sflag [#allocation5], %s382_s28 }
  0x81   : > { %s3802_s5 = scalar_lea.vmem %s400_s7, 256  ;;  %s4064_s1 = smov [#allocation4]  }
  0x82   : > { %p4388_p8 = pnand %p6513_p0, %p4357_p10  ;;  %p3803_p4 = scmp.ne.s32.totalorder %s400_s7, %s3802_s5 }
  0x83   : > { %s3807_s6 = sshll.u32 %s4064_s1, 4  ;;  %s3808_s6 = int_to_ptr.vmem [resolvable:$false] %s3807_s6 }
  0x84   : > { %p3791_p6 = pneg %p4388_p8  ;;  %s3809_s4 = scalar_lea.vmem %s3808_s6, 512 }
  0x85   : > { %s398_s2 = scalar_lea.hbm %s6512_s21, %s3303_s3  ;;  %p3810_p9 = scmp.lt.s32.totalorder %s400_s7, %s3808_s6 }
  0x86   : > { %p3805_p5 = pnand %p3803_p4, %p3791_p6  ;;  %p3811_p12 = scmp.lt.s32.totalorder %s3809_s4, %s3802_s5 }
  0x88   : > { %p3806_p1 = pneg %p3805_p5  ;;  %p3812_p13 = por %p3811_p12, %p3810_p9 }
  0x8a   : > { %p3813_p11 = pnand %p3812_p13, %p3806_p1 }
  0x8c   : > { %3816 = shalt.err (!%p3813_p11)
}
  0x8d   : > { %s6515_s21 = sld [smem:[#allocation26_spill]]  ;;  %s6775_s13 = smov (!%p116_p3, %s4363_s13), 15 }
  0x8e   : > { %s6516_s27 = sld [smem:[#allocation25_spill]]  ;;  %p6518_p10 = scmp.lt.s32.totalorder %s4373_s18, 15 }
  0x8f   : > { %s6517_s11 = sld [smem:[#allocation24_spill]]  ;;  %p6519_p6 = scmp.eq.s32.totalorder %s4055_s29, 0 }
  0x90   : > { %3478 = dma.hbm_to_vmem [thread:$0]  (!%p4388_p8), %s398_s2, 256, %s400_s7, %s383_s0, %s6505_s17, %s6505_s17, %s6504_s14  }
  0x91   : > { %s6777_s18 = smov (!%p6518_p10, %s4373_s18), 15  ;;  %p6521_p1 = scmp.eq.s32.totalorder %s4212_s30, 0 }
  0x92   : > { %s123_s22 = ssub.s32 %s6775_s13, %s6777_s18  ;;  %s3310_s3 = sshll.u32 %s6775_s13, 1 }
  0x93   : > { %s127_s28 = sadd.s32 1, %s6515_s21  ;;  %s124_s10 = sor.u32 %s123_s22, %s4290_s9 }
  0x94   : > { %p134_p11 = scmp.ne.s32.totalorder %s6515_s21, %s6516_s27  ;;  %p125_p5 = scmp.eq.s32.totalorder %s124_s10, 0 }
  0x95   : > { %p140_p0 = scmp.ne.s32.totalorder %s6516_s27, %s6517_s11  ;;  %s434_s2 = sand.u32 1, %s6515_s21  }
  0x96   : > { %p4413_p4 = por %p134_p11, %p6519_p6  ;;  %s6779_s21 = smov (!%p125_p5, %s6515_s21), %s127_s28 }
  0x97   : > { %p4419_p9 = por %p140_p0, %p6521_p1  ;;  %s3308_s18 = sshll.u32 %s434_s2, 4 }
  0x98   : > { %s446_s26 = sadd.s32 %s3310_s3, %s4307_s25  ;;  %s6523_s1 = sld [smem:[#allocation90_spill]] }
  0x99   : > { %s3312_s0 = sshll.u32 %s446_s26, 7  ;;  %s436_s4 = scalar_lea.vmem [#allocation9], %s3308_s18 }
  0x9a   : > { %s449_s27 = sshll.u32 %s436_s4, 4  ;;  %p6524_p3 = scmp.lt.s32.totalorder %s4055_s29, 4  ;;  %s450_s27 = int_to_ptr.vmem [resolvable:$true] %s449_s27 }
  0x9b   : > { %s3830_s13 = scalar_lea.vmem %s450_s27, 256  ;;  %s4065_s25 = smov [#allocation9]  }
  0x9c   : > { %p4435_p8 = pnand %p6524_p3, %p4413_p4  ;;  %p3831_p13 = scmp.ne.s32.totalorder %s450_s27, %s3830_s13 }
  0x9d   : > { %s3835_s28 = sshll.u32 %s4065_s25, 4  ;;  %s3836_s28 = int_to_ptr.vmem [resolvable:$false] %s3835_s28 }
  0x9e   : > { %s448_s6 = scalar_lea.hbm %s6523_s1, %s3312_s0  ;;  %p3819_p12 = pneg %p4435_p8 }
  0x9f   : > { %s3837_s22 = scalar_lea.vmem %s3836_s28, 512  ;;  %p3838_p0 = scmp.lt.s32.totalorder %s450_s27, %s3836_s28 }
  0xa0   : > { %p3833_p10 = pnand %p3831_p13, %p3819_p12  ;;  %p3839_p6 = scmp.lt.s32.totalorder %s3837_s22, %s3830_s13 }
  0xa2   : > { %p3834_p11 = pneg %p3833_p10  ;;  %p3840_p5 = por %p3839_p6, %p3838_p0 }
  0xa4   : > { %p3841_p1 = pnand %p3840_p5, %p3834_p11 }
  0xa6   : > { %3844 = shalt.err (!%p3841_p1)
}
  0xa7   : > { %3484 = dma.hbm_to_vmem [thread:$0]  (!%p4435_p8), %s448_s6, 256, %s450_s27, %s4332_s20, %s6505_s17, %s6505_s17, %s6504_s14  }
  0xa8   : > { %461 = sbr.rel (%p4229_p7) target bundleno = 908 (0x38c), region = 56 }
  0xad   : > { %s463_s16 = sand.u32 1, %s4031_s23  }
  0xae   : > { %s3314_s2 = sshll.u32 %s463_s16, 4  ;;  %s464_s3 = scalar_lea.sflag [#allocation5], %s463_s16 }
  0xaf   : > { %s467_s18 = scalar_lea.vmem [#allocation4], %s3314_s2 }
  0xb0   : > { %3966 = dma.done.wait (%p4368_p2), %s464_s3, 256  }
  0xb1   : > { %3968 = vsyncadd (%p4368_p2), %s464_s3, 4294967040  ;;  %s6527_s26 = sld [smem:[#allocation28_spill]]  ;;  %s472_s9 = sand.u32 1, %s4212_s30  }
  0xb2   : > { %s6528_s0 = sld [smem:[#allocation39_spill]]  ;;  %s473_s14 = scalar_lea.sflag [#allocation8], %s472_s9 }
  0xb7   : > { %s4456_s5 = sand.u32 1, %s6527_s26  }
  0xb8   : > { %s3315_s20 = sshll.u32 %s4456_s5, 7  ;;  %p6529_p7 = scmp.ne.s32.totalorder %s6528_s0, 0 }
  0xb9   : > { %s4459_s17 = scalar_lea.vmem [#allocation7], %s3315_s20 }
  0xba   : > { %3970 = dma.done.wait (%p6529_p7), %s473_s14, 2048  }
  0xbb   : > { %3972 = vsyncadd (%p6529_p7), %s473_s14, 4294965248  ;;  %s6530_s1 = sld [smem:[#allocation25_spill]] }
  0xc1   : > { %s483_s12 = sand.u32 1, %s6530_s1  }
  0xc2   : > { %s4466_s6 = sshll.u32 %s483_s12, 4 }
  0xc3   : > { %s485_s4 = scalar_lea.vmem [#allocation9], %s4466_s6 }
  0xc4   : > { %3974 = dma.done.wait (%p4419_p9), %s473_s14, 256  }
  0xc5   : > { %3976 = vsyncadd (%p4419_p9), %s473_s14, 4294967040  ;;  %p6531_p2 = scmp.eq.s32.totalorder %s4212_s30, 0 }
  0xc7   : > { %3978 = dma.done.wait (%p6531_p2), [#allocation11], 2560   ;;  %p6532_p4 = pmov %p6531_p2 }
  0xc8   : > { %v4478_v0 = vld [vmem:[%s4459_s17 + $0x8] sm:$0xff]  ;;  %v4480_v1 = vld [vmem:[%s467_s18] sm:$0xff]  ;;  %v4503_v9 = vld [vmem:[%s4459_s17 + $0x18] sm:$0xff]  ;;  %s6533_s30 = sld [smem:[#allocation23_spill]]  ;;  %v4066_v44 = vmov 0   ;;  %vm1793_vm0 = vcmask 1040384  }
  0xc9   : > { %3980 = vsyncadd (%p6532_p4), [#allocation11], 4294964736  ;;  %625 = vadd.xlane.f32.xlu1 %v4478_v0  ;;  %619 = vadd.xlane.f32.xlu0 %v4480_v1  ;;  %v659_v2 = vmul.f32 %v4480_v1, %v4480_v1  ;;  %v4486_v3 = vld [vmem:[%s467_s18 + $0x8] sm:$0xff]  ;;  %v4492_v5 = vld [vmem:[%s4459_s17] sm:$0xff]  ;;  %v662_v7 = vmul.f32 %v4478_v0, %v4478_v0  ;;  %v664_v13 = vmul.f32 %v4503_v9, %v4503_v9  ;;  %s6534_s13 = sld [smem:[#allocation91_spill]]  ;;  %vm2080_vm3 = vcmask 1046528  }
  0xca   : > { %v660_v4 = vmul.f32 %v4486_v3, %v4486_v3  ;;  %v661_v6 = vmul.f32 %v4492_v5, %v4492_v5  ;;  %v4500_v8 = vld [vmem:[%s4459_s17 + $0x10] sm:$0xff]  ;;  %v3646_v14 = vld [vmem:[#allocation10 + $0x64] ss:$8 sps:$4 sm:$0xff]   ;;  %v3648_v15 = vld [vmem:[#allocation10 + $0x60] ss:$8 sps:$4 sm:$0xff]   ;;  %1101 = vmatprep.mubr.bf16.mxu0 %v4066_v44  ;;  %1151 = vmatprep.mubr.bf16.mxu1 %v4066_v44  ;;  %s6535_s22 = sld [smem:[#allocation92_spill]] }
  0xcb   : > { %v3643_v10 = vld [vmem:[#allocation10 + $0x74] ss:$8 sps:$4 sm:$0xff]   ;;  %v3645_v11 = vld [vmem:[#allocation10 + $0x70] ss:$8 sps:$4 sm:$0xff]   ;;  %v663_v12 = vmul.f32 %v4500_v8, %v4500_v8  ;;  %v4512_v16 = vld [vmem:[%s4459_s17 + $0x40] sm:$0xff]  ;;  %s6536_s10 = sld [smem:[#allocation30_spill]] }
  0xcc   : > { %1069 = vmatprep.subr.bf16.mxu0 %v3643_v10  ;;  %3434 = vmatprep.subr.bf16.mxu1 %v3643_v10  ;;  %v4515_v17 = vld [vmem:[%s4459_s17 + $0x48] sm:$0xff]  ;;  %v3649_v18 = vld [vmem:[#allocation10 + $0x54] ss:$8 sps:$4 sm:$0xff]   ;;  %v669_v19 = vmul.f32 %v4512_v16, %v4512_v16  ;;  %v3651_v21 = vld [vmem:[#allocation10 + $0x50] ss:$8 sps:$4 sm:$0xff]   ;;  %s6538_s3 = sld [smem:[#allocation94_spill]] }
  0xcd   : > { %621 = vadd.xlane.f32.xlu0 %v4486_v3  ;;  %679 = vadd.xlane.f32.xlu1 %v659_v2  ;;  %v670_v20 = vmul.f32 %v4515_v17, %v4515_v17  ;;  %v3652_v22 = vld [vmem:[#allocation10 + $0x44] ss:$8 sps:$4 sm:$0xff]   ;;  %v3654_v23 = vld [vmem:[#allocation10 + $0x40] ss:$8 sps:$4 sm:$0xff]   ;;  %v3655_v26 = vld [vmem:[#allocation10 + $0x34] ss:$8 sps:$4 sm:$0xff]  }
  0xce   : > { %1070 = vmatpush1.bf16.msra.mxu0 %v3645_v11  ;;  %3442 = vmatpush1.bf16.msra.mxu1 %v3645_v11  ;;  %s542_s7 = sand.u32 1, %s6533_s30   ;;  %v4525_v24 = vld [vmem:[%s4459_s17 + $0x20] sm:$0xff]  ;;  %v4528_v25 = vld [vmem:[%s4459_s17 + $0x28] sm:$0xff]  ;;  %v3657_v29 = vld [vmem:[#allocation10 + $0x30] ss:$8 sps:$4 sm:$0xff]   ;;  %s6545_s9 = sld [smem:[#allocation96_spill]] }
  0xcf   : > { %1071 = vmatprep.subr.bf16.mxu0 %v3646_v14  ;;  %3435 = vmatprep.subr.bf16.mxu1 %v3646_v14  ;;  %v665_v27 = vmul.f32 %v4525_v24, %v4525_v24  ;;  %v666_v28 = vmul.f32 %v4528_v25, %v4528_v25  ;;  %v3658_v30 = vld [vmem:[#allocation10 + $0x24] ss:$8 sps:$4 sm:$0xff]   ;;  %v3660_v31 = vld [vmem:[#allocation10 + $0x20] ss:$8 sps:$4 sm:$0xff]   ;;  %v4537_v32 = vld [vmem:[%s4459_s17 + $0x50] sm:$0xff]  ;;  %s3319_s20 = sshll.u32 %s4456_s5, 6 }
  0xd0   : > { %v4540_v33 = vld [vmem:[%s4459_s17 + $0x58] sm:$0xff]  ;;  %v671_v35 = vmul.f32 %v4537_v32, %v4537_v32  ;;  %v3664_v38 = vld [vmem:[#allocation10 + $0x4] ss:$8 sps:$4 sm:$0xff]   ;;  %v3666_v39 = vld [vmem:[#allocation10] ss:$8 sps:$4 sm:$0xff]   ;;  %s5467_s14 = scalar_lea.vmem [#allocation13], %s3319_s20 }
  0xd1   : > { %623 = vadd.xlane.f32.xlu0 %v4492_v5  ;;  %681 = vadd.xlane.f32.xlu1 %v660_v4  ;;  %v3661_v34 = vld [vmem:[#allocation10 + $0x14] ss:$8 sps:$4 sm:$0xff]   ;;  %v672_v36 = vmul.f32 %v4540_v33, %v4540_v33  ;;  %v3663_v37 = vld [vmem:[#allocation10 + $0x10] ss:$8 sps:$4 sm:$0xff]   ;;  %v4563_v45 = vld [vmem:[%s4459_s17 + $0x60] sm:$0xff]  ;;  %p1223_p9 = scmp.gt.s32.totalorder %s6536_s10, 0 }
  0xd2   : > { %1072 = vmatpush1.bf16.msra.mxu0 %v3648_v15  ;;  %3443 = vmatpush1.bf16.msra.mxu1 %v3648_v15  ;;  %v4549_v40 = vld [vmem:[%s4459_s17 + $0x30] sm:$0xff]  ;;  %v4552_v41 = vld [vmem:[%s4459_s17 + $0x38] sm:$0xff]  ;;  %v4566_v46 = vld [vmem:[%s4459_s17 + $0x68] sm:$0xff]  ;;  %v673_v47 = vmul.f32 %v4563_v45, %v4563_v45  ;;  %p1225_p3 = scmp.lt.s32.totalorder %s6536_s10, 1  ;;  %s6229_s1 = scalar_lea.vmem [#allocation14], %s542_s7 }
  0xd3   : > { %1073 = vmatprep.subr.bf16.mxu0 %v3649_v18  ;;  %3436 = vmatprep.subr.bf16.mxu1 %v3649_v18  ;;  %v667_v42 = vmul.f32 %v4549_v40, %v4549_v40  ;;  %v668_v43 = vmul.f32 %v4552_v41, %v4552_v41  ;;  %v674_v48 = vmul.f32 %v4566_v46, %v4566_v46  ;;  %v4575_v49 = vld [vmem:[%s4459_s17 + $0x70] sm:$0xff]  ;;  %v4578_v50 = vld [vmem:[%s4459_s17 + $0x78] sm:$0xff]  ;;  %s1224_s18 = scalar_select %p1223_p9, 1.0, 0.0 }
  0xd4   : > { %v675_v51 = vmul.f32 %v4575_v49, %v4575_v49  ;;  %v676_v52 = vmul.f32 %v4578_v50, %v4578_v50  ;;  %v4588_v53 = vld [vmem:[%s485_s4] sm:$0xff]  ;;  %v4592_v54 = vld [vmem:[%s485_s4 + $0x8] sm:$0xff]  ;;  %s1226_s17 = scalar_select %p1225_p3, 1.0, 0.0 }
  0xd5   : > { %683 = vadd.xlane.f32.xlu0 %v661_v6  ;;  %685 = vadd.xlane.f32.xlu1 %v662_v7  ;;  %v677_v55 = vmul.f32 %v4588_v53, %v4588_v53  ;;  %v678_v56 = vmul.f32 %v4592_v54, %v4592_v54  ;;  %p3356_p8 = scmp.ne.s32.totalorder %s6536_s10, 0 }
  0xd6   : > { %1074 = vmatpush1.bf16.msra.mxu0 %v3651_v21  ;;  %3444 = vmatpush1.bf16.msra.mxu1 %v3651_v21 }
  0xd7   : > { %1075 = vmatprep.subr.bf16.mxu0 %v3652_v22  ;;  %3437 = vmatprep.subr.bf16.mxu1 %v3652_v22 }
  0xd9   : > { %627 = vadd.xlane.f32.xlu0 %v4500_v8  ;;  %629 = vadd.xlane.f32.xlu1 %v4503_v9 }
  0xda   : > { %1076 = vmatpush1.bf16.msra.mxu0 %v3654_v23  ;;  %3445 = vmatpush1.bf16.msra.mxu1 %v3654_v23 }
  0xdb   : > { %1077 = vmatprep.subr.bf16.mxu0 %v3655_v26  ;;  %3438 = vmatprep.subr.bf16.mxu1 %v3655_v26 }
  0xdd   : > { %687 = vadd.xlane.f32.xlu0 %v663_v12  ;;  %689 = vadd.xlane.f32.xlu1 %v664_v13 }
  0xde   : > { %1078 = vmatpush1.bf16.msra.mxu0 %v3657_v29  ;;  %3446 = vmatpush1.bf16.msra.mxu1 %v3657_v29 }
  0xdf   : > { %1079 = vmatprep.subr.bf16.mxu0 %v3658_v30  ;;  %3439 = vmatprep.subr.bf16.mxu1 %v3658_v30 }
  0xe1   : > { %639 = vadd.xlane.f32.xlu0 %v4512_v16  ;;  %641 = vadd.xlane.f32.xlu1 %v4515_v17 }
  0xe2   : > { %1080 = vmatpush1.bf16.msra.mxu0 %v3660_v31  ;;  %3447 = vmatpush1.bf16.msra.mxu1 %v3660_v31 }
  0xe3   : > { %1081 = vmatprep.subr.bf16.mxu0 %v3661_v34  ;;  %3440 = vmatprep.subr.bf16.mxu1 %v3661_v34 }
  0xe5   : > { %699 = vadd.xlane.f32.xlu0 %v669_v19  ;;  %701 = vadd.xlane.f32.xlu1 %v670_v20 }
  0xe6   : > { %1082 = vmatpush1.bf16.msra.mxu0 %v3663_v37  ;;  %3448 = vmatpush1.bf16.msra.mxu1 %v3663_v37 }
  0xe7   : > { %1083 = vmatprep.subr.bf16.mxu0 %v3664_v38  ;;  %3441 = vmatprep.subr.bf16.mxu1 %v3664_v38 }
  0xe9   : > { %631 = vadd.xlane.f32.xlu0 %v4525_v24  ;;  %633 = vadd.xlane.f32.xlu1 %v4528_v25 }
  0xea   : > { %1084 = vmatpush1.bf16.msra.mxu0 %v3666_v39  ;;  %3449 = vmatpush1.bf16.msra.mxu1 %v3666_v39 }
  0xed   : > { %691 = vadd.xlane.f32.xlu0 %v665_v27  ;;  %693 = vadd.xlane.f32.xlu1 %v666_v28 }
  0xf1   : > { %643 = vadd.xlane.f32.xlu0 %v4537_v32  ;;  %645 = vadd.xlane.f32.xlu1 %v4540_v33 }
  0xf5   : > { %703 = vadd.xlane.f32.xlu0 %v671_v35  ;;  %705 = vadd.xlane.f32.xlu1 %v672_v36 }
  0xf9   : > { %635 = vadd.xlane.f32.xlu0 %v4549_v40  ;;  %637 = vadd.xlane.f32.xlu1 %v4552_v41 }
  0xfd   : > { %695 = vadd.xlane.f32.xlu0 %v667_v42  ;;  %697 = vadd.xlane.f32.xlu1 %v668_v43 }
 0x101   : > { %647 = vadd.xlane.f32.xlu0 %v4563_v45  ;;  %649 = vadd.xlane.f32.xlu1 %v4566_v46 }
 0x105   : > { %707 = vadd.xlane.f32.xlu0 %v673_v47  ;;  %709 = vadd.xlane.f32.xlu1 %v674_v48 }
 0x109   : > { %651 = vadd.xlane.f32.xlu0 %v4575_v49  ;;  %653 = vadd.xlane.f32.xlu1 %v4578_v50 }
 0x10d   : > { %711 = vadd.xlane.f32.xlu0 %v675_v51  ;;  %713 = vadd.xlane.f32.xlu1 %v676_v52 }
 0x111   : > { %655 = vadd.xlane.f32.xlu0 %v4588_v53  ;;  %657 = vadd.xlane.f32.xlu1 %v4592_v54 }
 0x115   : > { %715 = vadd.xlane.f32.xlu0 %v677_v55  ;;  %717 = vadd.xlane.f32.xlu1 %v678_v56 }
 0x152   : > { %v626_v57 = vpop.xlane.xlu1 %625  ;;  %v620_v58 = vpop.xlane.xlu0 %619 }
 0x153   : > { %v719_v59 = vmul.f32 0.125, %v620_v58  ;;  %v4602_v6 = vmul.f32 0.125, %v626_v57 }
 0x155   : > { %v759_v62 = vmul.f32 %v719_v59, %v719_v59  ;;  %v762_v19 = vmul.f32 %v4602_v6, %v4602_v6 }
 0x156   : > { %v622_v60 = vpop.xlane.xlu0 %621  ;;  %v680_v61 = vpop.xlane.xlu1 %679 }
 0x157   : > { %v4600_v63 = vmul.f32 0.125, %v622_v60  ;;  %v739_v2 = vmul.f32 0.125, %v680_v61 }
 0x159   : > { %v779_v4 = vsub.f32 %v739_v2, %v759_v62  ;;  %v760_v11 = vmul.f32 %v4600_v63, %v4600_v63 }
 0x15a   : > { %v624_v7 = vpop.xlane.xlu0 %623  ;;  %v682_v10 = vpop.xlane.xlu1 %681 }
 0x15b   : > { %v799_v12 = vmax.f32 %v779_v4, 0.0  ;;  %v4606_v13 = vmul.f32 0.125, %v624_v7  ;;  %v740_v14 = vmul.f32 0.125, %v682_v10  ;;  %v819_v10 = vsub.f32 %v4480_v1, %v719_v59 }
 0x15d   : > { %v839_v15 = vadd.f32 1e-06, %v799_v12  ;;  %v780_v18 = vsub.f32 %v740_v14, %v760_v11  ;;  %v761_v20 = vmul.f32 %v4606_v13, %v4606_v13  ;;  %v820_v14 = vsub.f32 %v4486_v3, %v4600_v63 }
 0x15e   : > { %v684_v21 = vpop.xlane.xlu0 %683  ;;  %v686_v22 = vpop.xlane.xlu1 %685 }
 0x15f   : > { %3667 = vrsqrt.f32 %v839_v15  ;;  %v800_v23 = vmax.f32 %v780_v18, 0.0  ;;  %v741_v26 = vmul.f32 0.125, %v684_v21  ;;  %v742_v27 = vmul.f32 0.125, %v686_v22 }
 0x161   : > { %v840_v28 = vadd.f32 1e-06, %v800_v23  ;;  %v781_v29 = vsub.f32 %v741_v26, %v761_v20  ;;  %v782_v30 = vsub.f32 %v742_v27, %v762_v19  ;;  %v4632_v20 = vld [vmem:[%s6534_s13] ss:$0 sm:$0xff] }
 0x162   : > { %v628_v31 = vpop.xlane.xlu0 %627  ;;  %v630_v34 = vpop.xlane.xlu1 %629 }
 0x163   : > { %3669 = vrsqrt.f32 %v840_v28  ;;  %v801_v35 = vmax.f32 %v781_v29, 0.0  ;;  %v802_v36 = vmax.f32 %v782_v30, 0.0  ;;  %v4612_v37 = vmul.f32 0.125, %v628_v31  ;;  %v4640_v30 = vld [vmem:[%s6535_s22] ss:$0 sm:$0xff] }
 0x164   : > { %v4614_v38 = vmul.f32 0.125, %v630_v34 }
 0x165   : > { %v841_v39 = vadd.f32 1e-06, %v801_v35  ;;  %v842_v42 = vadd.f32 1e-06, %v802_v36  ;;  %v763_v43 = vmul.f32 %v4612_v37, %v4612_v37 }
 0x166   : > { %v688_v47 = vpop.xlane.xlu0 %687  ;;  %v690_v48 = vpop.xlane.xlu1 %689  ;;  %v764_v51 = vmul.f32 %v4614_v38, %v4614_v38 }
 0x167   : > { %3671 = vrsqrt.f32 %v841_v39  ;;  %v743_v52 = vmul.f32 0.125, %v688_v47  ;;  %v744_v55 = vmul.f32 0.125, %v690_v48  ;;  %v822_v48 = vsub.f32 %v4478_v0, %v4602_v6 }
 0x168   : > { %3673 = vrsqrt.f32 %v842_v42  ;;  %v821_v42 = vsub.f32 %v4492_v5, %v4606_v13 }
 0x169   : > { %v783_v56 = vsub.f32 %v743_v52, %v763_v43  ;;  %v784_v57 = vsub.f32 %v744_v55, %v764_v51 }
 0x16a   : > { %v640_v58 = vpop.xlane.xlu0 %639  ;;  %v642_v60 = vpop.xlane.xlu1 %641 }
 0x16b   : > { %v803_v61 = vmax.f32 %v783_v56, 0.0  ;;  %v804_v62 = vmax.f32 %v784_v57, 0.0  ;;  %v4620_v2 = vmul.f32 0.125, %v640_v58  ;;  %v4622_v4 = vmul.f32 0.125, %v642_v60 }
 0x16c   : > { %v3668_v7 = vpop.eup %3667 }
 0x16d   : > { %v843_v11 = vadd.f32 1e-06, %v803_v61  ;;  %v844_v12 = vadd.f32 1e-06, %v804_v62  ;;  %v769_v15 = vmul.f32 %v4620_v2, %v4620_v2  ;;  %v879_v21 = vmul.f32 %v3668_v7, %v819_v10 }
 0x16e   : > { %v700_v18 = vpop.xlane.xlu0 %699  ;;  %v702_v19 = vpop.xlane.xlu1 %701  ;;  %v770_v1 = vmul.f32 %v4622_v4, %v4622_v4 }
 0x16f   : > { %3675 = vrsqrt.f32 %v843_v11  ;;  %v749_v59 = vmul.f32 0.125, %v700_v18  ;;  %v750_v22 = vmul.f32 0.125, %v702_v19  ;;  %v905_v27 = vmul.f32 %v4632_v20, %v879_v21 }
 0x170   : > { %v3670_v23 = vpop.eup %3669  ;;  %3677 = vrsqrt.f32 %v844_v12 }
 0x171   : > { %v789_v3 = vsub.f32 %v749_v59, %v769_v15  ;;  %v790_v63 = vsub.f32 %v750_v22, %v770_v1  ;;  %v880_v26 = vmul.f32 %v3670_v23, %v820_v14  ;;  %v931_v55 = vadd.f32 %v4640_v30, %v905_v27 }
 0x172   : > { %v632_v28 = vpop.xlane.xlu0 %631  ;;  %v634_v29 = vpop.xlane.xlu1 %633  ;;  %v823_v22 = vsub.f32 %v4500_v8, %v4612_v37 }
 0x173   : > { %v809_v31 = vmax.f32 %v789_v3, 0.0  ;;  %v810_v34 = vmax.f32 %v790_v63, 0.0  ;;  %v4642_v35 = vmul.f32 0.125, %v632_v28  ;;  %v4644_v36 = vmul.f32 0.125, %v634_v29 }
 0x174   : > { %v3672_v39 = vpop.eup %3671  ;;  %v906_v43 = vmul.f32 %v4632_v20, %v880_v26  ;;  %v824_v26 = vsub.f32 %v4503_v9, %v4614_v38 }
 0x175   : > { %v3674_v47 = vpop.eup %3673  ;;  %v849_v51 = vadd.f32 1e-06, %v809_v31  ;;  %v850_v52 = vadd.f32 1e-06, %v810_v34  ;;  %v765_v56 = vmul.f32 %v4642_v35, %v4642_v35  ;;  %v766_v57 = vmul.f32 %v4644_v36, %v4644_v36 }
 0x176   : > { %v692_v58 = vpop.xlane.xlu0 %691  ;;  %v694_v60 = vpop.xlane.xlu1 %693  ;;  %v932_v5 = vadd.f32 %v4640_v30, %v906_v43  ;;  %v881_v13 = vmul.f32 %v3672_v39, %v821_v42  ;;  %v882_v7 = vmul.f32 %v3674_v47, %v822_v48 }
 0x177   : > { %3679 = vrsqrt.f32 %v849_v51  ;;  %v745_v61 = vmul.f32 0.125, %v692_v58  ;;  %v746_v62 = vmul.f32 0.125, %v694_v60 }
 0x178   : > { %3681 = vrsqrt.f32 %v850_v52  ;;  %v951_v0 = vpack.c.bf16 %v932_v5, %v931_v55  ;;  %v907_v6 = vmul.f32 %v4632_v20, %v881_v13  ;;  %v908_v12 = vmul.f32 %v4632_v20, %v882_v7 }
 0x179   : > { %v785_v10 = vsub.f32 %v745_v61, %v765_v56  ;;  %v786_v11 = vsub.f32 %v746_v62, %v766_v57  ;;  %v829_v13 = vsub.f32 %v4512_v16, %v4620_v2 }
 0x17a   : > { %1102 = vmatmul.mubr.bf16.vlgmr.msra.gmra.mxu0 %v951_v0  ;;  %v644_v14 = vpop.xlane.xlu0 %643  ;;  %v646_v15 = vpop.xlane.xlu1 %645  ;;  %v933_v23 = vadd.f32 %v4640_v30, %v907_v6  ;;  %v934_v3 = vadd.f32 %v4640_v30, %v908_v12  ;;  %v830_v0 = vsub.f32 %v4515_v17, %v4622_v4 }
 0x17b   : > { %v805_v18 = vmax.f32 %v785_v10, 0.0  ;;  %v806_v19 = vmax.f32 %v786_v11, 0.0  ;;  %v4659_v21 = vmul.f32 0.125, %v644_v14  ;;  %v4661_v1 = vmul.f32 0.125, %v646_v15  ;;  %1111 = vmatprep.mubr.bf16.mxu0 %v4066_v44 }
 0x17c   : > { %v3676_v59 = vpop.eup %3675  ;;  %v952_v47 = vpack.c.bf16 %v934_v3, %v933_v23 }
 0x17d   : > { %v3678_v63 = vpop.eup %3677  ;;  %v845_v27 = vadd.f32 1e-06, %v805_v18  ;;  %v846_v28 = vadd.f32 1e-06, %v806_v19  ;;  %v771_v29 = vmul.f32 %v4659_v21, %v4659_v21  ;;  %v772_v31 = vmul.f32 %v4661_v1, %v4661_v1 }
 0x17e   : > { %v704_v34 = vpop.xlane.xlu0 %703  ;;  %v706_v39 = vpop.xlane.xlu1 %705  ;;  %v883_v42 = vmul.f32 %v3676_v59, %v823_v22  ;;  %v884_v43 = vmul.f32 %v3678_v63, %v824_v26 }
 0x17f   : > { %3683 = vrsqrt.f32 %v845_v27  ;;  %v751_v8 = vmul.f32 0.125, %v704_v34  ;;  %v752_v37 = vmul.f32 0.125, %v706_v39  ;;  %v825_v39 = vsub.f32 %v4525_v24, %v4642_v35 }
 0x180   : > { %3685 = vrsqrt.f32 %v846_v28  ;;  %v909_v48 = vmul.f32 %v4632_v20, %v883_v42  ;;  %v910_v51 = vmul.f32 %v4632_v20, %v884_v43 }
 0x181   : > { %v791_v9 = vsub.f32 %v751_v8, %v771_v29  ;;  %v792_v38 = vsub.f32 %v752_v37, %v772_v31  ;;  %v826_v37 = vsub.f32 %v4528_v25, %v4644_v36 }
 0x182   : > { %1112 = vmatmul.mubr.bf16.gmra.mxu0 %v952_v47  ;;  %v636_v52 = vpop.xlane.xlu0 %635  ;;  %v638_v55 = vpop.xlane.xlu1 %637  ;;  %v935_v61 = vadd.f32 %v4640_v30, %v909_v48  ;;  %v936_v62 = vadd.f32 %v4640_v30, %v910_v51 }
 0x183   : > { %v811_v56 = vmax.f32 %v791_v9, 0.0  ;;  %v812_v57 = vmax.f32 %v792_v38, 0.0  ;;  %v4676_v58 = vmul.f32 0.125, %v636_v52  ;;  %v4678_v60 = vmul.f32 0.125, %v638_v55  ;;  %1121 = vmatprep.mubr.bf16.mxu0 %v4066_v44 }
 0x184   : > { %v3680_v5 = vpop.eup %3679  ;;  %v953_v59 = vpack.c.bf16 %v936_v62, %v935_v61 }
 0x185   : > { %v3682_v7 = vpop.eup %3681  ;;  %v851_v6 = vadd.f32 1e-06, %v811_v56  ;;  %v852_v10 = vadd.f32 1e-06, %v812_v57  ;;  %v767_v11 = vmul.f32 %v4676_v58, %v4676_v58  ;;  %v768_v12 = vmul.f32 %v4678_v60, %v4678_v60 }
 0x186   : > { %v696_v14 = vpop.xlane.xlu0 %695  ;;  %v698_v15 = vpop.xlane.xlu1 %697  ;;  %v889_v18 = vmul.f32 %v3680_v5, %v829_v13  ;;  %v890_v19 = vmul.f32 %v3682_v7, %v830_v0 }
 0x187   : > { %3687 = vrsqrt.f32 %v851_v6  ;;  %v747_v16 = vmul.f32 0.125, %v696_v14  ;;  %v748_v2 = vmul.f32 0.125, %v698_v15 }
 0x188   : > { %3689 = vrsqrt.f32 %v852_v10  ;;  %v915_v22 = vmul.f32 %v4632_v20, %v889_v18  ;;  %v916_v23 = vmul.f32 %v4632_v20, %v890_v19  ;;  %v832_v18 = vsub.f32 %v4540_v33, %v4661_v1 }
 0x189   : > { %v787_v17 = vsub.f32 %v747_v16, %v767_v11  ;;  %v788_v4 = vsub.f32 %v748_v2, %v768_v12  ;;  %v831_v12 = vsub.f32 %v4537_v32, %v4659_v21 }
 0x18a   : > { %1122 = vmatmul.mubr.bf16.gmra.mxu0 %v953_v59  ;;  %v648_v3 = vpop.xlane.xlu0 %647  ;;  %v650_v63 = vpop.xlane.xlu1 %649  ;;  %v941_v26 = vadd.f32 %v4640_v30, %v915_v22  ;;  %v942_v42 = vadd.f32 %v4640_v30, %v916_v23 }
 0x18b   : > { %v807_v27 = vmax.f32 %v787_v17, 0.0  ;;  %v808_v28 = vmax.f32 %v788_v4, 0.0  ;;  %v4694_v29 = vmul.f32 0.125, %v648_v3  ;;  %v4696_v31 = vmul.f32 0.125, %v650_v63  ;;  %1131 = vmatprep.mubr.bf16.mxu0 %v4066_v44 }
 0x18c   : > { %v3684_v34 = vpop.eup %3683  ;;  %v956_v38 = vpack.c.bf16 %v942_v42, %v941_v26 }
 0x18d   : > { %v3686_v8 = vpop.eup %3685  ;;  %v847_v43 = vadd.f32 1e-06, %v807_v27  ;;  %v848_v47 = vadd.f32 1e-06, %v808_v28  ;;  %v773_v48 = vmul.f32 %v4694_v29, %v4694_v29  ;;  %v774_v9 = vmul.f32 %v4696_v31, %v4696_v31 }
 0x18e   : > { %v708_v51 = vpop.xlane.xlu0 %707  ;;  %v710_v52 = vpop.xlane.xlu1 %709  ;;  %v885_v55 = vmul.f32 %v3684_v34, %v825_v39  ;;  %v886_v56 = vmul.f32 %v3686_v8, %v826_v37  ;;  %1152 = vmatmul.mubr.bf16.vlgmr.msra.gmra.mxu1 %v956_v38  ;;  %v828_v38 = vsub.f32 %v4552_v41, %v4678_v60 }
 0x18f   : > { %3691 = vrsqrt.f32 %v847_v43  ;;  %v753_v24 = vmul.f32 0.125, %v708_v51  ;;  %v754_v35 = vmul.f32 0.125, %v710_v52  ;;  %1161 = vmatprep.mubr.bf16.mxu1 %v4066_v44 }
 0x190   : > { %3693 = vrsqrt.f32 %v848_v47  ;;  %v911_v25 = vmul.f32 %v4632_v20, %v885_v55  ;;  %v912_v5 = vmul.f32 %v4632_v20, %v886_v56  ;;  %v827_v47 = vsub.f32 %v4549_v40, %v4676_v58 }
 0x191   : > { %v793_v36 = vsub.f32 %v753_v24, %v773_v48  ;;  %v794_v57 = vsub.f32 %v754_v35, %v774_v9 }
 0x192   : > { %v652_v13 = vpop.xlane.xlu0 %651  ;;  %v654_v61 = vpop.xlane.xlu1 %653  ;;  %v937_v62 = vadd.f32 %v4640_v30, %v911_v25  ;;  %v938_v14 = vadd.f32 %v4640_v30, %v912_v5 }
 0x193   : > { %v813_v7 = vmax.f32 %v793_v36, 0.0  ;;  %v814_v0 = vmax.f32 %v794_v57, 0.0  ;;  %v4712_v6 = vmul.f32 0.125, %v652_v13  ;;  %v4714_v10 = vmul.f32 0.125, %v654_v61 }
 0x194   : > { %v3688_v11 = vpop.eup %3687  ;;  %v954_v22 = vpack.c.bf16 %v938_v14, %v937_v62  ;;  %v833_v62 = vsub.f32 %v4563_v45, %v4694_v29  ;;  %v834_v14 = vsub.f32 %v4566_v46, %v4696_v31 }
 0x195   : > { %v3690_v15 = vpop.eup %3689  ;;  %v853_v16 = vadd.f32 1e-06, %v813_v7  ;;  %v854_v2 = vadd.f32 1e-06, %v814_v0  ;;  %v775_v19 = vmul.f32 %v4712_v6, %v4712_v6  ;;  %v776_v59 = vmul.f32 %v4714_v10, %v4714_v10 }
 0x196   : > { %v712_v17 = vpop.xlane.xlu0 %711  ;;  %v714_v4 = vpop.xlane.xlu1 %713  ;;  %v891_v23 = vmul.f32 %v3688_v11, %v831_v12  ;;  %v892_v3 = vmul.f32 %v3690_v15, %v832_v18  ;;  %1132 = vmatmul.mubr.bf16.gmra.mxu0 %v954_v22  ;;  %v835_v46 = vsub.f32 %v4575_v49, %v4712_v6 }
 0x197   : > { %3695 = vrsqrt.f32 %v853_v16  ;;  %v755_v32 = vmul.f32 0.125, %v712_v17  ;;  %v756_v21 = vmul.f32 0.125, %v714_v4  ;;  %1141 = vmatprep.mubr.bf16.mxu0 %v4066_v44  ;;  %v836_v4 = vsub.f32 %v4578_v50, %v4714_v10 }
 0x198   : > { %3697 = vrsqrt.f32 %v854_v2  ;;  %v917_v33 = vmul.f32 %v4632_v20, %v891_v23  ;;  %v918_v26 = vmul.f32 %v4632_v20, %v892_v3 }
 0x199   : > { %v795_v1 = vsub.f32 %v755_v32, %v775_v19  ;;  %v796_v63 = vsub.f32 %v756_v21, %v776_v59 }
 0x19a   : > { %v656_v27 = vpop.xlane.xlu0 %655  ;;  %v658_v28 = vpop.xlane.xlu1 %657  ;;  %v943_v34 = vadd.f32 %v4640_v30, %v917_v33  ;;  %v944_v48 = vadd.f32 %v4640_v30, %v918_v26 }
 0x19b   : > { %v815_v39 = vmax.f32 %v795_v1, 0.0  ;;  %v816_v42 = vmax.f32 %v796_v63, 0.0  ;;  %v4729_v8 = vmul.f32 0.125, %v656_v27  ;;  %v4731_v37 = vmul.f32 0.125, %v658_v28 }
 0x19c   : > { %v3692_v43 = vpop.eup %3691  ;;  %v957_v35 = vpack.c.bf16 %v944_v48, %v943_v34 }
 0x19d   : > { %v3694_v9 = vpop.eup %3693  ;;  %v855_v51 = vadd.f32 1e-06, %v815_v39  ;;  %v856_v52 = vadd.f32 1e-06, %v816_v42  ;;  %v777_v55 = vmul.f32 %v4729_v8, %v4729_v8  ;;  %v778_v24 = vmul.f32 %v4731_v37, %v4731_v37 }
 0x19e   : > { %v716_v56 = vpop.xlane.xlu0 %715  ;;  %v718_v25 = vpop.xlane.xlu1 %717  ;;  %v887_v36 = vmul.f32 %v3692_v43, %v827_v47  ;;  %v888_v57 = vmul.f32 %v3694_v9, %v828_v38  ;;  %1162 = vmatmul.mubr.bf16.gmra.mxu1 %v957_v35  ;;  %v837_v49 = vsub.f32 %v4588_v53, %v4729_v8  ;;  %v838_v50 = vsub.f32 %v4592_v54, %v4731_v37  ;;  %v4786_v9 = vld [vmem:[#allocation3 + $0x78] sm:$0x80]  ;;  %v2244_v38 = vld [vmem:[#allocation12 + $0x8] sm:$0xff] }
 0x19f   : > { %3699 = vrsqrt.f32 %v855_v51  ;;  %v757_v40 = vmul.f32 0.125, %v716_v56  ;;  %v758_v58 = vmul.f32 0.125, %v718_v25  ;;  %1171 = vmatprep.mubr.bf16.mxu1 %v4066_v44  ;;  %v979_v47 = vlaneseq }
 0x1a0   : > { %3701 = vrsqrt.f32 %v856_v52  ;;  %v913_v41 = vmul.f32 %v4632_v20, %v887_v36  ;;  %v914_v13 = vmul.f32 %v4632_v20, %v888_v57  ;;  %v4798_v56 = vstv %s1224_s18 }
 0x1a1   : > { %v797_v60 = vsub.f32 %v757_v40, %v777_v55  ;;  %v798_v5 = vsub.f32 %v758_v58, %v778_v24  ;;  %v4773_v48 = vshrl.u32 %v979_v47, 7  ;;  %v4794_v55 = vld [vmem:[#allocation3] sm:$0x80]  ;;  %v1794_v58 = vrot.slane %v4786_v9, 7 }
 0x1a2   : > { %v939_v61 = vadd.f32 %v4640_v30, %v913_v41  ;;  %v940_v11 = vadd.f32 %v4640_v30, %v914_v13  ;;  %v1797_v13 = vrot.slane %v4794_v55, 7 }
 0x1a3   : > { %v817_v7 = vmax.f32 %v797_v60, 0.0  ;;  %v818_v0 = vmax.f32 %v798_v5, 0.0  ;;  %6537 = vst [vmem:[#allocation43_spill] sm:$0xff] %v4773_v48  ;;  %v4777_v54 = vsub.s32 0, %v4773_v48  ;;  %v4780_v37 = vsub.s32 1, %v4773_v48 }
 0x1a4   : > { %v3696_v12 = vpop.eup %3695  ;;  %v955_v2 = vpack.c.bf16 %v940_v11, %v939_v61  ;;  %v1205_v24 = vadd.s32 16, %v4773_v48  ;;  %v2537_v35 = vsub.s32 4, %v4773_v48  ;;  %v2393_v36 = vsub.s32 2, %v4773_v48 }
 0x1a5   : > { %v3698_v15 = vpop.eup %3697  ;;  %v857_v18 = vadd.f32 1e-06, %v817_v7  ;;  %v858_v16 = vadd.f32 1e-06, %v818_v0  ;;  %v893_v19 = vmul.f32 %v3696_v12, %v833_v62  ;;  %v2465_v40 = vsub.s32 3, %v4773_v48 }
 0x1a6   : > { %v894_v59 = vmul.f32 %v3698_v15, %v834_v14  ;;  %1142 = vmatmul.mubr.bf16.gmra.mxu0 %v955_v2  ;;  %v4810_v41 = vrot.slane %v2244_v38, %v4780_v37  ;;  %v4813_v60 = vadd.s32 8, %v4773_v48  ;;  %v4821_v61 = vadd.s32 32, %v4773_v48 }
 0x1a7   : > { %3703 = vrsqrt.f32 %v857_v18  ;;  %v919_v22 = vmul.f32 %v4632_v20, %v893_v19  ;;  %v2609_v62 = vsub.s32 5, %v4773_v48  ;;  %v2753_v7 = vsub.s32 7, %v4773_v48 }
 0x1a8   : > { %3705 = vrsqrt.f32 %v858_v16  ;;  %v920_v45 = vmul.f32 %v4632_v20, %v894_v59  ;;  %v4826_v0 = vrot.slane %v2244_v38, %v4777_v54  ;;  %v1367_v11 = vand.u32 15, %v1205_v24 }
 0x1a9   : > { %v945_v29 = vadd.f32 %v4640_v30, %v919_v22  ;;  %v2681_v14 = vsub.s32 6, %v4773_v48  ;;  %v4835_v16 = vrot.slane %v2244_v38, %v2537_v35  ;;  %v4838_v2 = vadd.s32 24, %v4773_v48 }
 0x1aa   : > { %v946_v17 = vadd.f32 %v4640_v30, %v920_v45  ;;  %v4840_v59 = vrot.slane %v2244_v38, %v2393_v36  ;;  %v4842_v22 = vrot.slane %v2244_v38, %v2465_v40  ;;  %v1360_v45 = vand.u32 15, %v4813_v60 }
 0x1ab   : > { %vm4871_vm2 = vcmp.gt.s32.totalorder %v1367_v11, 0  ;;  %v4898_v9 = vadd.s32 72, %v4773_v48 }
 0x1ac   : > { %v3700_v31 = vpop.eup %3699  ;;  %v958_v23 = vpack.c.bf16 %v946_v17, %v945_v29  ;;  %v4846_v29 = vadd.s32 48, %v4773_v48  ;;  %vm4930_vm4 = vcmp.lt.s32.totalorder %v1360_v45, 15 }
 0x1ad   : > { %v3702_v32 = vpop.eup %3701  ;;  %v895_v21 = vmul.f32 %v3700_v31, %v835_v46  ;;  %v1381_v46 = vand.u32 15, %v4821_v61  ;;  %6550 = vst [vmem:[#allocation50_spill] sm:$0xff] %v4898_v9 }
 0x1ae   : > { %1172 = vmatmul.mubr.bf16.gmra.mxu1 %v958_v23  ;;  %v896_v3 = vmul.f32 %v3702_v32, %v836_v4 }
 0x1af   : > { %1181 = vmatprep.mubr.bf16.mxu1 %v4066_v44  ;;  %v921_v33 = vmul.f32 %v4632_v20, %v895_v21  ;;  %v4856_v21 = vrot.slane %v2244_v38, %v2609_v62  ;;  %vm4980_vm5 = vcmp.gt.s32.totalorder %v1381_v46, 0 }
 0x1b0   : > { %v922_v1 = vmul.f32 %v4632_v20, %v896_v3  ;;  %v4858_v3 = vrot.slane %v2244_v38, %v2753_v7 }
 0x1b1   : > { %v947_v63 = vadd.f32 %v4640_v30, %v921_v33  ;;  %v4861_v33 = vadd.s32 40, %v4773_v48 }
 0x1b2   : > { %v948_v26 = vadd.f32 %v4640_v30, %v922_v1  ;;  %6544 = vst [vmem:[#allocation47_spill] sm:$0xff] %v4858_v3 }
 0x1b4   : > { %v3704_v6 = vpop.eup %3703  ;;  %v959_v10 = vpack.c.bf16 %v948_v26, %v947_v63  ;;  %v4865_v26 = vrot.slane %v2244_v38, %v2681_v14 }
 0x1b5   : > { %v3706_v27 = vpop.eup %3705  ;;  %v897_v28 = vmul.f32 %v3704_v6, %v837_v49  ;;  %v2895_v6 = vld [vmem:[%s6545_s9] sm:$0x3] }
 0x1b6   : > { %1182 = vmatmul.mubr.bf16.gmra.mxu1 %v959_v10  ;;  %v898_v34 = vmul.f32 %v3706_v27, %v838_v50 }
 0x1b7   : > { %1191 = vmatprep.mubr.bf16.mxu1 %v4066_v44  ;;  %v923_v39 = vmul.f32 %v4632_v20, %v897_v28  ;;  %v977_v44 = vld [vmem:[%s6538_s3] sm:$0x3]  ;;  %v4877_v28 = vadd.s32 96, %v4773_v48 }
 0x1b8   : > { %v924_v42 = vmul.f32 %v4632_v20, %v898_v34  ;;  %v2243_v20 = vld [vmem:[#allocation12] sm:$0xff]  ;;  %v4789_v51 = vrot.slane %v977_v44, %v4777_v54  ;;  %v4792_v52 = vrot.slane %v977_v44, %v4780_v37  ;;  %v4880_v34 = vadd.s32 88, %v4773_v48 }
 0x1b9   : > { %v949_v43 = vadd.f32 %v4640_v30, %v923_v39  ;;  %v4801_v25 = vrot.slane %v2243_v20, %v4780_v37  ;;  %v4807_v57 = vrot.slane %v2243_v20, %v4777_v54  ;;  %v4828_v12 = vrot.slane %v2243_v20, %v2537_v35 }
 0x1ba   : > { %v950_v53 = vadd.f32 %v4640_v30, %v924_v42  ;;  %v1353_v30 = vand.u32 15, %v4773_v48  ;;  %6539 = vst [vmem:[#allocation44_spill] sm:$0xff] %v4789_v51  ;;  %v4831_v15 = vrot.slane %v2243_v20, %v2393_v36  ;;  %v4833_v18 = vrot.slane %v2243_v20, %v2465_v40 }
 0x1bb   : > { %6540 = vst [vmem:[#allocation45_spill] sm:$0xff] %v4801_v25  ;;  %v4850_v31 = vrot.slane %v2243_v20, %v2609_v62  ;;  %v4852_v4 = vrot.slane %v2243_v20, %v2753_v7  ;;  %v4854_v32 = vrot.slane %v2243_v20, %v2681_v14  ;;  %v4883_v39 = vadd.s32 64, %v4773_v48 }
 0x1bc   : > { %v960_v8 = vpack.c.bf16 %v950_v53, %v949_v43  ;;  %vm4815_vm1 = vcmp.gt.s32.totalorder %v1353_v30, 0  ;;  %6543 = vst [vmem:[#allocation46_spill] sm:$0xff] %v4831_v15  ;;  %v4891_v44 = vrot.slane %v2895_v6, %v4777_v54  ;;  %v4894_v20 = vrot.slane %v2895_v6, %v4780_v37 }
 0x1bd   : > { %6548 = vst [vmem:[#allocation48_spill] sm:$0xff] %v4883_v39  ;;  %v4905_v35 = vadd.s32 80, %v4773_v48 }
 0x1be   : > { %1192 = vmatmul.mubr.bf16.gmra.mxu1 %v960_v8  ;;  %v4888_v8 = vadd.s32 56, %v4773_v48 }
 0x1bf   : > { %6551 = vst [vmem:[#allocation51_spill] sm:$0xff] %v4905_v35 }
 0x1c0   : > { %6549 = vst [vmem:[#allocation49_spill] sm:$0xff] %v4888_v8 }
 0x23a   : > { %v1103_v19 = vpop.f32.mrf.mxu0 }
 0x23b   : > { %v1104_v17 = vadd.f32 %v1103_v19, %v4789_v51 }
 0x23c   : > { %v1105_v23 = vpop.f32.mrf.mxu0 }
 0x23d   : > { %v1309_v1 = vmul.f32 %v4798_v56, %v1104_v17  ;;  %v1106_v63 = vadd.f32 %v1105_v23, %v4792_v52 }
 0x23e   : > { %v1107_v50 = vpop.f32.mrf.mxu0 }
 0x23f   : > { %1629 = vst [vmem:[#allocation3 + $0xc0] sm:$0xff] %v1309_v1  ;;  %v1795_v42 = vrot.slane %v1309_v1, 7  ;;  %v1310_v43 = vmul.f32 %v4798_v56, %v1106_v63  ;;  %v1108_v53 = vadd.f32 %v1107_v50, %v4789_v51  ;;  %v2327_v5 = vmul.f32 %v4801_v25, %v1309_v1 }
 0x240   : > { %v1109_v47 = vpop.f32.mrf.mxu0 }
 0x241   : > { %v1796_v38 = vsel %vm1793_vm0, %v1794_v58, %v1795_v42  ;;  %1630 = vst [vmem:[#allocation3 + $0xe0] sm:$0xff] %v1310_v43  ;;  %v1798_v55 = vrot.slane %v1310_v43, 7  ;;  %v4902_v24 = vmul.f32 %v4798_v56, %v1108_v53  ;;  %v1110_v37 = vadd.f32 %v1109_v47, %v4792_v52 }
 0x242   : > { %v1916_v54 = vsel %vm4815_vm1, %v1796_v38, 0.0  ;;  %v1113_v36 = vpop.f32.mrf.mxu0  ;;  %v2328_v47 = vmul.f32 %v4810_v41, %v1310_v43 }
 0x243   : > { %v1799_v58 = vsel %vm1793_vm0, %v1797_v13, %v1798_v55  ;;  %v1800_v62 = vrot.slane %v4902_v24, 7  ;;  %v4919_v19 = vmul.f32 %v4798_v56, %v1110_v37  ;;  %v4922_v17 = vadd.f32 %v1113_v36, %v4789_v51 }
 0x244   : > { %v1917_v14 = vsel %vm4815_vm1, %v1799_v58, 0.0  ;;  %v1115_v23 = vpop.f32.mrf.mxu0  ;;  %v2255_v13 = vmul.f32 %v4807_v57, %v1916_v54  ;;  %v2329_v45 = vmul.f32 %v4801_v25, %v4902_v24 }
 0x245   : > { %v1801_v6 = vsel %vm1793_vm0, %v1795_v42, %v1800_v62  ;;  %v4928_v50 = vadd.f32 %v1115_v23, %v4792_v52  ;;  %v1802_v38 = vrot.slane %v4919_v19, 7  ;;  %v1804_v37 = vrot.slane %v4922_v17, 7 }
 0x246   : > { %v1956_v54 = vld [vmem:[#allocation3 + $0xc0] sm:$0xfe]  ;;  %v1117_v36 = vpop.f32.mrf.mxu0  ;;  %v2256_v42 = vmul.f32 %v4826_v0, %v1917_v14  ;;  %v2082_v23 = vrot.slane %v4902_v24, 1  ;;  %v2257_v63 = vmul.f32 %v4807_v57, %v1801_v6  ;;  %v2359_v60 = vadd.f32 %v2327_v5, %v2255_v13 }
 0x247   : > { %v2081_v58 = vrot.slane %v1956_v54, 1  ;;  %v1803_v1 = vsel %vm1793_vm0, %v1798_v55, %v1802_v38  ;;  %v1805_v43 = vsel %vm1793_vm0, %v1800_v62, %v1804_v37  ;;  %v1806_v11 = vrot.slane %v4928_v50, 7 }
 0x248   : > { %v1957_v56 = vld [vmem:[#allocation3 + $0xe0] sm:$0xfe]  ;;  %v1119_v7 = vpop.f32.mrf.mxu0  ;;  %v1920_v14 = vsel %vm4871_vm2, %v1805_v43, 0.0  ;;  %v2258_v54 = vmul.f32 %v4826_v0, %v1803_v1  ;;  %v2330_v24 = vmul.f32 %v4810_v41, %v4919_v19  ;;  %v2360_v6 = vadd.f32 %v2328_v47, %v2256_v42 }
 0x249   : > { %v2083_v40 = vsel %vm2080_vm3, %v2081_v58, %v2082_v23  ;;  %v2084_v30 = vrot.slane %v1957_v56, 1  ;;  %v1807_v62 = vsel %vm1793_vm0, %v1802_v38, %v1806_v11  ;;  %v2259_v27 = vmul.f32 %v4807_v57, %v1920_v14 }
 0x24a   : > { %v2399_v55 = vmul.f32 %v4831_v15, %v2083_v40  ;;  %v1921_v13 = vsel %vm4871_vm2, %v1807_v62, 0.0  ;;  %v2085_v5 = vrot.slane %v4919_v19, 1  ;;  %v1123_v43 = vpop.f32.mrf.mxu0  ;;  %v2361_v58 = vadd.f32 %v2329_v45, %v2257_v63 }
 0x24b   : > { %v2331_v56 = vmul.f32 %v4801_v25, %v4922_v17  ;;  %v2543_v49 = vmul.f32 %v4828_v12, %v4922_v17  ;;  %v2471_v40 = vmul.f32 %v4833_v18, %v1920_v14  ;;  %v4966_v38 = vadd.f32 %v1117_v36, %v4789_v51 }
 0x24c   : > { %v2431_v1 = vadd.f32 %v2399_v55, %v2359_v60  ;;  %v2086_v47 = vsel %vm2080_vm3, %v2084_v30, %v2085_v5  ;;  %v2087_v10 = vrot.slane %v4922_v17, 1  ;;  %v2362_v42 = vadd.f32 %v2330_v24, %v2258_v54  ;;  %v1125_v36 = vpop.f32.mrf.mxu0 }
 0x24d   : > { %v2260_v19 = vmul.f32 %v4826_v0, %v1921_v13  ;;  %v2400_v63 = vmul.f32 %v4840_v59, %v2086_v47  ;;  %v4972_v45 = vadd.f32 %v1119_v7, %v4792_v52  ;;  %v2363_v60 = vadd.f32 %v2331_v56, %v2259_v27 }
 0x24e   : > { %v2332_v55 = vmul.f32 %v4810_v41, %v4928_v50  ;;  %v1808_v14 = vrot.slane %v4966_v38, 7  ;;  %v2088_v30 = vsel %vm2080_vm3, %v2082_v23, %v2087_v10  ;;  %v2503_v54 = vadd.f32 %v2471_v40, %v2431_v1  ;;  %v1153_v9 = vpop.f32.mrf.mxu1 }
 0x24f   : > { %v2432_v24 = vadd.f32 %v2400_v63, %v2360_v6  ;;  %v2205_v7 = vsel %vm4930_vm4, %v2088_v30, 0.0  ;;  %v1810_v27 = vrot.slane %v4972_v45, 7  ;;  %v2472_v62 = vmul.f32 %v4842_v22, %v1921_v13 }
 0x250   : > { %v1809_v56 = vsel %vm1793_vm0, %v1804_v37, %v1808_v14  ;;  %v2401_v23 = vmul.f32 %v4831_v15, %v2205_v7  ;;  %v2089_v61 = vrot.slane %v4928_v50, 1  ;;  %v2364_v46 = vadd.f32 %v2332_v55, %v2260_v19  ;;  %v1127_v37 = vpop.f32.mrf.mxu0 }
 0x251   : > { %v2544_v47 = vmul.f32 %v4835_v16, %v4928_v50  ;;  %v2333_v6 = vmul.f32 %v4801_v25, %v4966_v38  ;;  %v1811_v1 = vsel %vm1793_vm0, %v1806_v11, %v1810_v27  ;;  %v2504_v40 = vadd.f32 %v2472_v62, %v2432_v24 }
 0x252   : > { %v2433_v63 = vadd.f32 %v2401_v23, %v2361_v58  ;;  %v2473_v30 = vmul.f32 %v4833_v18, %v1809_v56  ;;  %v2090_v13 = vsel %vm2080_vm3, %v2085_v5, %v2089_v61  ;;  %v2575_v48 = vadd.f32 %v2543_v49, %v2503_v54 }
 0x253   : > { %v2261_v7 = vmul.f32 %v4807_v57, %v1809_v56  ;;  %v2545_v19 = vmul.f32 %v4828_v12, %v4966_v38  ;;  %v2206_v50 = vsel %vm4930_vm4, %v2090_v13, 0.0  ;;  %v2262_v55 = vmul.f32 %v4826_v0, %v1811_v1 }
 0x254   : > { %v2334_v11 = vmul.f32 %v4810_v41, %v4972_v45  ;;  %v2402_v58 = vmul.f32 %v4840_v59, %v2206_v50  ;;  %v5008_v24 = vadd.f32 %v1123_v43, %v4789_v51  ;;  %v2091_v49 = vrot.slane %v4966_v38, 1 }
 0x255   : > { %v5012_v5 = vadd.f32 %v1125_v36, %v4792_v52  ;;  %v5016_v53 = vadd.f32 %v1127_v37, %v4789_v51  ;;  %v2576_v62 = vadd.f32 %v2544_v47, %v2504_v40  ;;  %v2505_v56 = vadd.f32 %v2473_v30, %v2433_v63 }
 0x256   : > { %v2474_v23 = vmul.f32 %v4842_v22, %v1811_v1  ;;  %v1812_v13 = vrot.slane %v5008_v24, 7  ;;  %v5020_v50 = vadd.f32 %v2333_v6, %v2261_v7  ;;  %v2546_v43 = vmul.f32 %v4835_v16, %v4972_v45 }
 0x257   : > { %v2092_v38 = vsel %vm2080_vm3, %v2087_v10, %v2091_v49  ;;  %v6401_v36 = vrot.slane %v5012_v5, 7  ;;  %v5026_v54 = vadd.f32 %v2334_v11, %v2262_v55  ;;  %v2434_v37 = vadd.f32 %v2402_v58, %v2362_v42 }
 0x258   : > { %v1813_v47 = vsel %vm1793_vm0, %v1808_v14, %v1812_v13  ;;  %v2403_v40 = vmul.f32 %v4831_v15, %v2092_v38  ;;  %v6556_v1 = vand.u32 15, %v4838_v2  ;;  %v2615_v10 = vmul.f32 %v4850_v31, %v2092_v38 }
 0x259   : > { %v1924_v63 = vsel %vm4980_vm5, %v1813_v47, 0.0  ;;  %v1815_v30 = vsel %vm1793_vm0, %v1810_v27, %v6401_v36  ;;  %v6559_v42 = vrot.slane %v4972_v45, 1  ;;  %v2577_v7 = vadd.f32 %v2545_v19, %v2505_v56  ;;  %v1155_v27 = vpop.f32.mrf.mxu1 }
 0x25a   : > { %vm5032_vm6 = vcmp.lt.s32.totalorder %v6556_v1, 15  ;;  %v2435_v55 = vadd.f32 %v2403_v40, %v2363_v60  ;;  %v2475_v2 = vmul.f32 %v4833_v18, %v1924_v63  ;;  %v2547_v11 = vmul.f32 %v4828_v12, %v5008_v24 }
 0x25b   : > { %v2094_v14 = vsel %vm2080_vm3, %v2089_v61, %v6559_v42  ;;  %v2647_v58 = vadd.f32 %v2615_v10, %v2575_v48  ;;  %v2687_v47 = vmul.f32 %v4854_v32, %v1924_v63  ;;  %v1925_v38 = vsel %vm4980_vm5, %v1815_v30, 0.0 }
 0x25c   : > { %v2404_v1 = vmul.f32 %v4840_v59, %v2094_v14  ;;  %v2506_v36 = vadd.f32 %v2474_v23, %v2434_v37  ;;  %v2263_v8 = vmul.f32 %v4807_v57, %v1924_v63  ;;  %v2507_v61 = vadd.f32 %v2475_v2, %v2435_v55  ;;  %v1157_v2 = vpop.f32.mrf.mxu1 }
 0x25d   : > { %v2476_v60 = vmul.f32 %v4842_v22, %v1925_v38  ;;  %v2335_v19 = vmul.f32 %v4801_v25, %v5008_v24  ;;  %v2264_v56 = vmul.f32 %v4826_v0, %v1925_v38  ;;  %v2616_v40 = vmul.f32 %v4856_v21, %v2094_v14 }
 0x25e   : > { %v2436_v48 = vadd.f32 %v2404_v1, %v2364_v46  ;;  %v5058_v10 = vadd.f32 %v2547_v11, %v2507_v61  ;;  %v2719_v17 = vadd.f32 %v2687_v47, %v2647_v58  ;;  %v2336_v30 = vmul.f32 %v4810_v41, %v5012_v5  ;;  %v1129_v61 = vpop.f32.mrf.mxu0 }
 0x25f   : > { %v2548_v23 = vmul.f32 %v4835_v16, %v5012_v5  ;;  %v2648_v63 = vadd.f32 %v2616_v40, %v2576_v62  ;;  %v2688_v42 = vmul.f32 %v4865_v26, %v1925_v38  ;;  %v6404_v55 = vrot.slane %v5016_v53, 7 }
 0x260   : > { %v2508_v37 = vadd.f32 %v2476_v60, %v2436_v48  ;;  %v2578_v35 = vadd.f32 %v2546_v43, %v2506_v36  ;;  %v5066_v46 = vadd.f32 %v2335_v19, %v2263_v8  ;;  %v2759_v14 = vmul.f32 %v4852_v4, %v5008_v24 }
 0x261   : > { %v6407_v11 = vrot.slane %v5008_v24, 1  ;;  %v5071_v58 = vadd.f32 %v2336_v30, %v2264_v56  ;;  %v1817_v62 = vsel %vm1793_vm0, %v1812_v13, %v6404_v55  ;;  %v5079_v38 = vadd.f32 %v1153_v9, %v4789_v51  ;;  %v1159_v56 = vpop.f32.mrf.mxu1 }
 0x262   : > { %v5073_v47 = vadd.f32 %v2548_v23, %v2508_v37  ;;  %v5081_v1 = vadd.f32 %v2759_v14, %v2719_v17  ;;  %v2760_v8 = vmul.f32 %v4858_v3, %v5012_v5  ;;  %v2337_v36 = vmul.f32 %v4801_v25, %v5016_v53 }
 0x263   : > { %6560 = vst [vmem:[#allocation52_spill] sm:$0xff] %v5079_v38  ;;  %v2096_v43 = vsel %vm2080_vm3, %v2091_v49, %v6407_v11  ;;  %v2720_v60 = vadd.f32 %v2688_v42, %v2648_v63  ;;  %v2265_v9 = vmul.f32 %v4807_v57, %v1817_v62  ;;  %v2549_v19 = vmul.f32 %v4828_v12, %v5016_v53 }
 0x264   : > { %v2209_v13 = vsel %vm5032_vm6, %v2096_v43, 0.0  ;;  %v2477_v40 = vmul.f32 %v4833_v18, %v1817_v62  ;;  %v2689_v17 = vmul.f32 %v4854_v32, %v1817_v62  ;;  %v5100_v30 = vadd.f32 %v1129_v61, %v4792_v52 }
 0x265   : > { %v2405_v48 = vmul.f32 %v4831_v15, %v2209_v13  ;;  %v2617_v49 = vmul.f32 %v4850_v31, %v2209_v13  ;;  %v6406_v23 = vrot.slane %v5012_v5, 1  ;;  %v5104_v37 = vadd.f32 %v1155_v27, %v4792_v52 }
 0x266   : > { %v5107_v63 = vadd.f32 %v1157_v2, %v4789_v51  ;;  %v2761_v43 = vmul.f32 %v4852_v4, %v5016_v53  ;;  %v5113_v13 = vadd.f32 %v1159_v56, %v4792_v52  ;;  %v5115_v62 = vadd.f32 %v2760_v8, %v2720_v60 }
 0x267   : > { %6561 = vst [vmem:[#allocation53_spill] sm:$0xff] %v5104_v37  ;;  %v2437_v42 = vadd.f32 %v2405_v48, %v5020_v50  ;;  %v2649_v14 = vadd.f32 %v2617_v49, %v2577_v7  ;;  %v5119_v61 = vmul.f32 %v4801_v25, %v5079_v38  ;;  %v6405_v27 = vrot.slane %v5100_v30, 7 }
 0x268   : > { %6562 = vst [vmem:[#allocation54_spill] sm:$0xff] %v5107_v63  ;;  %6563 = vst [vmem:[#allocation55_spill] sm:$0xff] %v5113_v13  ;;  %v6565_v2 = vrot.slane %v4972_v45, 1  ;;  %v5127_v7 = vadd.f32 %v2337_v36, %v2265_v9  ;;  %v5131_v56 = vmul.f32 %v4828_v12, %v5079_v38  ;;  %v6567_v49 = vrot.slane %v5012_v5, 7 }
 0x269   : > { %6564 = vst [vmem:[#allocation56_spill] sm:$0xff] %v5119_v61  ;;  %v2509_v48 = vadd.f32 %v2477_v40, %v2437_v42  ;;  %v2721_v60 = vadd.f32 %v2689_v17, %v2649_v14  ;;  %v5146_v40 = vmul.f32 %v4852_v4, %v5079_v38  ;;  %v1133_v42 = vpop.f32.mrf.mxu0  ;;  %v6569_v14 = vand.u32 15, %v4846_v29 }
 0x26a   : > { %v2098_v50 = vsel %vm2080_vm3, %v6565_v2, %v6406_v23  ;;  %6566 = vst [vmem:[#allocation57_spill] sm:$0xff] %v5131_v56  ;;  %v1819_v55 = vsel %vm1793_vm0, %v6567_v49, %v6405_v27  ;;  %v2338_v49 = vmul.f32 %v4810_v41, %v5100_v30  ;;  %v2550_v27 = vmul.f32 %v4835_v16, %v5100_v30 }
 0x26b   : > { %v2210_v8 = vsel %vm5032_vm6, %v2098_v50, 0.0  ;;  %v5142_v9 = vadd.f32 %v2549_v19, %v2509_v48  ;;  %6568 = vst [vmem:[#allocation58_spill] sm:$0xff] %v5146_v40  ;;  %v2266_v6 = vmul.f32 %v4826_v0, %v1819_v55  ;;  %v2478_v17 = vmul.f32 %v4842_v22, %v1819_v55 }
 0x26c   : > { %v2406_v45 = vmul.f32 %v4840_v59, %v2210_v8  ;;  %v2618_v36 = vmul.f32 %v4856_v21, %v2210_v8  ;;  %vm5152_vm7 = vcmp.gt.s32.totalorder %v6569_v14, 0  ;;  %v2690_v19 = vmul.f32 %v4865_v26, %v1819_v55 }
 0x26d   : > { %v6408_v48 = vrot.slane %v5079_v38, 7  ;;  %v2762_v29 = vmul.f32 %v4858_v3, %v5100_v30  ;;  %v6409_v14 = vrot.slane %v5107_v63, 7  ;;  %v5166_v23 = vadd.f32 %v2761_v43, %v2721_v60 }
 0x26e   : > { %v2438_v50 = vadd.f32 %v2406_v45, %v5026_v54  ;;  %v2650_v8 = vadd.f32 %v2618_v36, %v2578_v35  ;;  %v5170_v35 = vmul.f32 %v4810_v41, %v5104_v37  ;;  %v5174_v54 = vmul.f32 %v4835_v16, %v5104_v37  ;;  %v1135_v36 = vpop.f32.mrf.mxu0 }
 0x26f   : > { %v5176_v55 = vadd.f32 %v2338_v49, %v2266_v6  ;;  %v5183_v45 = vsel %vm1793_vm0, %v6408_v48, %v6409_v14  ;;  %v2349_v43 = vmul.f32 %v4801_v25, %v5107_v63  ;;  %v6411_v60 = vrot.slane %v5113_v13, 7 }
 0x270   : > { %v2510_v11 = vadd.f32 %v2478_v17, %v2438_v50  ;;  %6572 = vst [vmem:[#allocation59_spill] sm:$0xff] %v5170_v35  ;;  %6573 = vst [vmem:[#allocation60_spill] sm:$0xff] %v5174_v54  ;;  %v2722_v50 = vadd.f32 %v2690_v19, %v2650_v8  ;;  %v2277_v6 = vmul.f32 %v4807_v57, %v5183_v45  ;;  %v6410_v49 = vrot.slane %v5104_v37, 7 }
 0x271   : > { %6574 = vst [vmem:[#allocation61_spill] sm:$0xff] %v5183_v45  ;;  %v5195_v54 = vmul.f32 %v4858_v3, %v5104_v37  ;;  %v5199_v48 = vmul.f32 %v4828_v12, %v5107_v63  ;;  %v5202_v14 = vadd.f32 %v1133_v42, %v4789_v51  ;;  %v5215_v19 = vadd.f32 %v1135_v36, %v4792_v52 }
 0x272   : > { %v5188_v17 = vadd.f32 %v2550_v27, %v2510_v11  ;;  %v2099_v11 = vrot.slane %v5016_v53, 1  ;;  %v5205_v27 = vadd.f32 %v2349_v43, %v2277_v6  ;;  %v5212_v8 = vsel %vm1793_vm0, %v6410_v49, %v6411_v60 }
 0x273   : > { %6576 = vst [vmem:[#allocation63_spill] sm:$0xff] %v5195_v54  ;;  %6577 = vst [vmem:[#allocation64_spill] sm:$0xff] %v5199_v48  ;;  %v5220_v42 = vmul.f32 %v4852_v4, %v5107_v63  ;;  %v2350_v43 = vmul.f32 %v4810_v41, %v5113_v13  ;;  %v1820_v6 = vrot.slane %v5202_v14, 7  ;;  %v6581_v56 = vrot.slane %v5008_v24, 1 }
 0x274   : > { %6575 = vst [vmem:[#allocation62_spill] sm:$0xff] %v5188_v17  ;;  %6578 = vst [vmem:[#allocation65_spill] sm:$0xff] %v5205_v27  ;;  %v5228_v49 = vadd.f32 %v2762_v29, %v2722_v50  ;;  %v5232_v36 = vmul.f32 %v4835_v16, %v5113_v13  ;;  %v6584_v54 = vand.u32 15, %v4861_v33  ;;  %v2278_v24 = vmul.f32 %v4826_v0, %v5212_v8  ;;  %v5247_v50 = vld [vmem:[#allocation12 + $0x10] ss:$0 sm:$0xff] }
 0x275   : > { %6579 = vst [vmem:[#allocation66_spill] sm:$0xff] %v5212_v8  ;;  %6580 = vst [vmem:[#allocation67_spill] sm:$0xff] %v5220_v42  ;;  %v2100_v61 = vsel %vm2080_vm3, %v6581_v56, %v2099_v11  ;;  %v6587_v56 = vrot.slane %v5016_v53, 7  ;;  %v6588_v42 = vrot.slane %v5100_v30, 1  ;;  %v6589_v37 = vrot.slane %v5012_v5, 1 }
 0x276   : > { %6582 = vst [vmem:[#allocation68_spill] sm:$0xff] %v5228_v49  ;;  %6583 = vst [vmem:[#allocation69_spill] sm:$0xff] %v5232_v36  ;;  %v2407_v60 = vmul.f32 %v4831_v15, %v2100_v61  ;;  %v2619_v35 = vmul.f32 %v4850_v31, %v2100_v61  ;;  %vm5238_vm8 = vcmp.lt.s32.totalorder %v6584_v54, 15  ;;  %v5257_v54 = vmul.f32 %v4858_v3, %v5113_v13  ;;  %v1137_v36 = vpop.f32.mrf.mxu0 }
 0x277   : > { %v1821_v29 = vsel %vm1793_vm0, %v6587_v56, %v1820_v6  ;;  %v2102_v33 = vsel %vm2080_vm3, %v6589_v37, %v6588_v42  ;;  %v2339_v53 = vmul.f32 %v4801_v25, %v5202_v14  ;;  %v2551_v56 = vmul.f32 %v4828_v12, %v5202_v14 }
 0x278   : > { %6590 = vst [vmem:[#allocation70_spill] sm:$0xff] %v5257_v54  ;;  %v1928_v8 = vsel %vm5152_vm7, %v1821_v29, 0.0  ;;  %v2439_v48 = vadd.f32 %v2407_v60, %v5066_v46  ;;  %v2651_v37 = vadd.f32 %v2619_v35, %v5058_v10  ;;  %v2831_v54 = vmul.f32 %v5247_v50, %v2100_v61  ;;  %v5281_v35 = vld [vmem:[#allocation12 + $0x18] ss:$0 sm:$0xff]  ;;  %v1139_v49 = vpop.f32.mrf.mxu0 }
 0x279   : > { %v2479_v5 = vmul.f32 %v4833_v18, %v1928_v8  ;;  %v2691_v42 = vmul.f32 %v4854_v32, %v1928_v8  ;;  %v6591_v45 = vrot.slane %v5215_v19, 7  ;;  %v6592_v29 = vrot.slane %v5100_v30, 7  ;;  %6593 = vst [vmem:[#allocation71_spill] sm:$0xff] %v5281_v35 }
 0x27a   : > { %v2408_v27 = vmul.f32 %v4840_v59, %v2102_v33  ;;  %v2620_v39 = vmul.f32 %v4856_v21, %v2102_v33  ;;  %v5277_v13 = vadd.f32 %v2350_v43, %v2278_v24  ;;  %v2763_v10 = vmul.f32 %v4852_v4, %v5202_v14 }
 0x27b   : > { %v1823_v38 = vsel %vm1793_vm0, %v6592_v29, %v6591_v45  ;;  %v2511_v46 = vadd.f32 %v2479_v5, %v2439_v48  ;;  %v2723_v60 = vadd.f32 %v2691_v42, %v2651_v37  ;;  %v2267_v61 = vmul.f32 %v4807_v57, %v1928_v8 }
 0x27c   : > { %v2863_v63 = vadd.f32 %v2831_v54, %v5081_v1  ;;  %v1929_v45 = vsel %vm5152_vm7, %v1823_v38, 0.0  ;;  %v2440_v29 = vadd.f32 %v2408_v27, %v5071_v58  ;;  %v2652_v24 = vadd.f32 %v2620_v39, %v5073_v47 }
 0x27d   : > { %v5288_v17 = vadd.f32 %v2551_v56, %v2511_v46  ;;  %v5290_v43 = vadd.f32 %v2763_v10, %v2723_v60  ;;  %v2480_v48 = vmul.f32 %v4842_v22, %v1929_v45  ;;  %v2692_v5 = vmul.f32 %v4865_v26, %v1929_v45  ;;  %v1163_v56 = vpop.f32.mrf.mxu1 }
 0x27e   : > { %v2832_v8 = vmul.f32 %v5281_v35, %v2102_v33  ;;  %v5297_v1 = vadd.f32 %v1137_v36, %v4789_v51  ;;  %v6428_v38 = vrot.slane %v5202_v14, 1  ;;  %v2552_v58 = vmul.f32 %v4835_v16, %v5215_v19 }
 0x27f   : > { %v2512_v2 = vadd.f32 %v2480_v48, %v2440_v29  ;;  %v2764_v27 = vmul.f32 %v4858_v3, %v5215_v19  ;;  %v5305_v54 = vadd.f32 %v1139_v49, %v4792_v52  ;;  %v2724_v39 = vadd.f32 %v2692_v5, %v2652_v24 }
 0x280   : > { %v2864_v47 = vadd.f32 %v2832_v8, %v5115_v62  ;;  %v6427_v33 = vrot.slane %v5297_v1, 7  ;;  %v2104_v36 = vsel %vm2080_vm3, %v2099_v11, %v6428_v38  ;;  %v2268_v37 = vmul.f32 %v4826_v0, %v1929_v45 }
 0x281   : > { %v5313_v42 = vadd.f32 %v2552_v58, %v2512_v2  ;;  %v2213_v46 = vsel %vm5238_vm8, %v2104_v36, 0.0  ;;  %v6425_v49 = vrot.slane %v5215_v19, 1  ;;  %v2340_v60 = vmul.f32 %v4810_v41, %v5215_v19 }
 0x282   : > { %v5320_v62 = vadd.f32 %v2764_v27, %v2724_v39  ;;  %v1825_v10 = vsel %vm1793_vm0, %v1820_v6, %v6427_v33  ;;  %v2409_v11 = vmul.f32 %v4831_v15, %v2213_v46  ;;  %v5326_v29 = vadd.f32 %v2339_v53, %v2267_v61  ;;  %v1165_v53 = vpop.f32.mrf.mxu1  ;;  %v6618_v27 = vld [vmem:[#allocation48_spill] sm:$0xff] }
 0x283   : > { %v2481_v45 = vmul.f32 %v4833_v18, %v1825_v10  ;;  %v2621_v48 = vmul.f32 %v4850_v31, %v2213_v46  ;;  %v2693_v24 = vmul.f32 %v4854_v32, %v1825_v10  ;;  %v2907_v5 = vadd.f32 %v4891_v44, %v2863_v63 }
 0x284   : > { %v2908_v8 = vadd.f32 %v4894_v20, %v2864_v47  ;;  %v2269_v2 = vmul.f32 %v4807_v57, %v1825_v10  ;;  %v2441_v58 = vadd.f32 %v2409_v11, %v5127_v7  ;;  %v6594_v6 = vand.u32 15, %v4877_v28 }
 0x285   : > { %v5341_v61 = vadd.f32 %v2340_v60, %v2268_v37  ;;  %v2653_v39 = vadd.f32 %v2621_v48, %v5142_v9  ;;  %v6426_v36 = vrot.slane %v5305_v54, 7  ;;  %v6597_v63 = vrot.slane %v5100_v30, 1 }
 0x286   : > { %vm5337_vm9 = vcmp.gt.s32.totalorder %v6594_v6, 0  ;;  %v2341_v28 = vmul.f32 %v4801_v25, %v5297_v1  ;;  %v2513_v7 = vadd.f32 %v2481_v45, %v2441_v58  ;;  %v2833_v10 = vmul.f32 %v5247_v50, %v2213_v46 }
 0x287   : > { %v2106_v47 = vsel %vm2080_vm3, %v6597_v63, %v6425_v49  ;;  %v2725_v60 = vadd.f32 %v2693_v24, %v2653_v39  ;;  %v2765_v9 = vmul.f32 %v4852_v4, %v5297_v1  ;;  %v6598_v11 = vrot.slane %v5215_v19, 7  ;;  %v1167_v24 = vpop.f32.mrf.mxu1 }
 0x288   : > { %v2214_v37 = vsel %vm5238_vm8, %v2106_v47, 0.0  ;;  %v5363_v6 = vmul.f32 %v2908_v8, %v2907_v5  ;;  %v5365_v45 = vadd.f32 %v2341_v28, %v2269_v2  ;;  %v2553_v40 = vmul.f32 %v4828_v12, %v5297_v1 }
 0x289   : > { %v1827_v30 = vsel %vm1793_vm0, %v6598_v11, %v6426_v36  ;;  %v2410_v48 = vmul.f32 %v4840_v59, %v2214_v37  ;;  %v5370_v58 = vadd.f32 %v2765_v9, %v2725_v60  ;;  %v2622_v63 = vmul.f32 %v4856_v21, %v2214_v37  ;;  %v6604_v9 = vld [vmem:[#allocation62_spill] sm:$0xff] }
 0x28a   : > { %6599 = vst [vmem:[#allocation72_spill] sm:$0xff] %v5363_v6  ;;  %v2482_v46 = vmul.f32 %v4842_v22, %v1827_v30  ;;  %v2694_v47 = vmul.f32 %v4865_v26, %v1827_v30  ;;  %v6600_v11 = vand.u32 15, %v4880_v34  ;;  %v2865_v8 = vadd.f32 %v2833_v10, %v5166_v23 }
 0x28b   : > { %v2442_v39 = vadd.f32 %v2410_v48, %v5176_v55  ;;  %v2270_v2 = vmul.f32 %v4826_v0, %v1827_v30  ;;  %v2834_v28 = vmul.f32 %v5281_v35, %v2214_v37  ;;  %v5385_v60 = vadd.f32 %v1163_v56, %v4789_v51  ;;  %v6607_v30 = vld [vmem:[#allocation68_spill] sm:$0xff] }
 0x28c   : > { %vm5377_vm10 = vcmp.lt.s32.totalorder %v6600_v11, 15  ;;  %v2342_v55 = vmul.f32 %v4810_v41, %v5305_v54  ;;  %v2654_v48 = vadd.f32 %v2622_v63, %v6604_v9  ;;  %v5391_v34 = vadd.f32 %v1165_v53, %v4792_v52 }
 0x28d   : > { %6603 = vst [vmem:[#allocation73_spill] sm:$0xff] %v5385_v60  ;;  %v5394_v11 = vadd.f32 %v1167_v24, %v4789_v51  ;;  %v2514_v23 = vadd.f32 %v2482_v46, %v2442_v39  ;;  %v2554_v10 = vmul.f32 %v4835_v16, %v5305_v54  ;;  %v2866_v37 = vadd.f32 %v2834_v28, %v6607_v30  ;;  %v6608_v39 = vld [vmem:[#allocation54_spill] sm:$0xff] }
 0x28e   : > { %6605 = vst [vmem:[#allocation62_spill] sm:$0xff] %v5391_v34  ;;  %v1844_v56 = vrot.slane %v5385_v60, 7  ;;  %v5400_v49 = vadd.f32 %v2553_v40, %v2513_v7  ;;  %v2726_v36 = vadd.f32 %v2694_v47, %v2654_v48  ;;  %v2766_v63 = vmul.f32 %v4858_v3, %v5305_v54  ;;  %v6611_v47 = vld [vmem:[#allocation55_spill] sm:$0xff] }
 0x28f   : > { %6606 = vst [vmem:[#allocation74_spill] sm:$0xff] %v5394_v11  ;;  %v1846_v53 = vrot.slane %v5391_v34, 7  ;;  %v2909_v9 = vadd.f32 %v4891_v44, %v2865_v8  ;;  %v5407_v24 = vadd.f32 %v2342_v55, %v2270_v2  ;;  %v2910_v46 = vadd.f32 %v4894_v20, %v2866_v37 }
 0x290   : > { %v6609_v33 = vrot.slane %v6608_v39, 7  ;;  %v5413_v30 = vadd.f32 %v2766_v63, %v2726_v36  ;;  %v2351_v40 = vmul.f32 %v4801_v25, %v5385_v60  ;;  %v6612_v48 = vrot.slane %v6611_v47, 7  ;;  %v1143_v36 = vpop.f32.mrf.mxu0 }
 0x291   : > { %v5422_v2 = vadd.f32 %v2554_v10, %v2514_v23  ;;  %v5424_v55 = vmul.f32 %v2910_v46, %v2909_v9  ;;  %v5457_v23 = vmul.f32 %v4852_v4, %v5385_v60 }
 0x292   : > { %v1845_v28 = vsel %vm1793_vm0, %v6609_v33, %v1844_v56  ;;  %6610 = vst [vmem:[#allocation68_spill] sm:$0xff] %v5413_v30  ;;  %v1847_v8 = vsel %vm1793_vm0, %v6612_v48, %v1846_v53  ;;  %v5429_v33 = vmul.f32 %v4828_v12, %v5385_v60  ;;  %v2352_v48 = vmul.f32 %v4810_v41, %v5391_v34 }
 0x293   : > { %v1940_v7 = vsel %vm5337_vm9, %v1845_v28, 0.0  ;;  %6613 = vst [vmem:[#allocation54_spill] sm:$0xff] %v5422_v2  ;;  %6614 = vst [vmem:[#allocation55_spill] sm:$0xff] %v5424_v55  ;;  %v5433_v63 = vsel %vm5337_vm9, %v1847_v8, 0.0  ;;  %v6430_v28 = vrot.slane %v5394_v11, 7  ;;  %v3390_v10 = vpack.c.bf16 %v5424_v55, %v5363_v6 }
 0x294   : > { %v2279_v37 = vmul.f32 %v4807_v57, %v1940_v7  ;;  %6615 = vst [vmem:[#allocation75_spill] sm:$0xff] %v5429_v33  ;;  %6616 = vst [vmem:[#allocation76_spill] sm:$0xff] %v5433_v63  ;;  %v2280_v46 = vmul.f32 %v4826_v0, %v5433_v63  ;;  %v6619_v8 = vand.u32 15, %v6618_v27  ;;  %v5453_v38 = vmul.f32 %v4833_v18, %v1940_v7 }
 0x295   : > { %6623 = vst [vmem:[#allocation78_spill] sm:$0xff] %v5457_v23  ;;  %3391 = vst [vmem:[%s5467_s14] sm:$0xff] %v3390_v10   ;;  %v5498_v6 = vadd.f32 %v1143_v36, %v4789_v51 }
 0x296   : > { %v5440_v9 = vadd.f32 %v2351_v40, %v2279_v37  ;;  %vm5448_vm11 = vcmp.gt.s32.totalorder %v6619_v8, 0  ;;  %6622 = vst [vmem:[#allocation48_spill] sm:$0xff] %v5453_v38  ;;  %v1849_v40 = vsel %vm1793_vm0, %v1844_v56, %v6430_v28  ;;  %v6624_v37 = vrot.slane %v5385_v60, 1  ;;  %v1169_v8 = vpop.f32.mrf.mxu1  ;;  %v1145_v28 = vpop.f32.mrf.mxu0 }
 0x297   : > { %v5470_v38 = vadd.f32 %v2352_v48, %v2280_v46  ;;  %v2281_v55 = vmul.f32 %v4807_v57, %v1849_v40  ;;  %v2353_v56 = vmul.f32 %v4801_v25, %v5394_v11  ;;  %v5480_v60 = vmul.f32 %v4854_v32, %v1940_v7  ;;  %v6631_v7 = vld [vmem:[#allocation65_spill] sm:$0xff] }
 0x298   : > { %6617 = vst [vmem:[#allocation77_spill] sm:$0xff] %v5440_v9  ;;  %v6625_v9 = vrot.slane %v6608_v39, 1  ;;  %v2493_v46 = vmul.f32 %v4833_v18, %v1849_v40 }
 0x299   : > { %6626 = vst [vmem:[#allocation79_spill] sm:$0xff] %v5470_v38  ;;  %6627 = vst [vmem:[#allocation80_spill] sm:$0xff] %v5480_v60  ;;  %v5489_v48 = vadd.f32 %v2353_v56, %v2281_v55  ;;  %v6434_v38 = vrot.slane %v5391_v34, 1  ;;  %v2565_v55 = vmul.f32 %v4828_v12, %v5394_v11 }
 0x29a   : > { %v2128_v27 = vsel %vm2080_vm3, %v6625_v9, %v6624_v37  ;;  %v5484_v9 = vmul.f32 %v4842_v22, %v5433_v63  ;;  %v5492_v37 = vadd.f32 %v1169_v8, %v4792_v52  ;;  %v5502_v63 = vadd.f32 %v1145_v28, %v4792_v52 }
 0x29b   : > { %v5474_v23 = vsel %vm5377_vm10, %v2128_v27, 0.0  ;;  %6629 = vst [vmem:[#allocation82_spill] sm:$0xff] %v5489_v48  ;;  %v6435_v27 = vrot.slane %v6611_v47, 1  ;;  %v5507_v8 = vmul.f32 %v4854_v32, %v1849_v40 }
 0x29c   : > { %6628 = vst [vmem:[#allocation81_spill] sm:$0xff] %v5484_v9  ;;  %v2421_v10 = vmul.f32 %v4831_v15, %v5474_v23  ;;  %6630 = vst [vmem:[#allocation83_spill] sm:$0xff] %v5492_v37  ;;  %v6436_v56 = vrot.slane %v5492_v37, 7  ;;  %v2354_v48 = vmul.f32 %v4810_v41, %v5492_v37  ;;  %v5545_v34 = vmul.f32 %v4858_v3, %v5492_v37 }
 0x29d   : > { %v2130_v36 = vsel %vm2080_vm3, %v6435_v27, %v6434_v38  ;;  %v6634_v38 = vrot.slane %v5202_v14, 1  ;;  %v6638_v14 = vrot.slane %v5297_v1, 7 }
 0x29e   : > { %v2453_v60 = vadd.f32 %v2421_v10, %v6631_v7  ;;  %v5517_v7 = vmul.f32 %v4852_v4, %v5394_v11  ;;  %v5521_v28 = vsel %vm5377_vm10, %v2130_v36, 0.0  ;;  %v1851_v9 = vsel %vm1793_vm0, %v1846_v53, %v6436_v56  ;;  %6636 = vst [vmem:[#allocation85_spill] sm:$0xff] %v5545_v34 }
 0x29f   : > { %6632 = vst [vmem:[#allocation65_spill] sm:$0xff] %v5521_v28  ;;  %v2282_v27 = vmul.f32 %v4826_v0, %v1851_v9  ;;  %v2494_v40 = vmul.f32 %v4842_v22, %v1851_v9  ;;  %v2566_v53 = vmul.f32 %v4835_v16, %v5492_v37  ;;  %v6637_v11 = vrot.slane %v5498_v6, 7 }
 0x2a0   : > { %v2525_v10 = vadd.f32 %v2493_v46, %v2453_v60  ;;  %v2422_v60 = vmul.f32 %v4840_v59, %v5521_v28  ;;  %v6633_v46 = vrot.slane %v5297_v1, 1 }
 0x2a2   : > { %v2108_v5 = vsel %vm2080_vm3, %v6634_v38, %v6633_v46  ;;  %v5536_v36 = vadd.f32 %v2565_v55, %v2525_v10  ;;  %v2454_v56 = vadd.f32 %v2422_v60, %v5277_v13  ;;  %v1829_v38 = vsel %vm1793_vm0, %v6638_v14, %v6637_v11 }
 0x2a3   : > { %v2411_v55 = vmul.f32 %v4831_v15, %v2108_v5  ;;  %v5553_v10 = vadd.f32 %v2354_v48, %v2282_v27  ;;  %v1932_v46 = vsel %vm5448_vm11, %v1829_v38, 0.0  ;;  %v2343_v13 = vmul.f32 %v4801_v25, %v5498_v6  ;;  %v6640_v38 = vld [vmem:[#allocation51_spill] sm:$0xff] }
 0x2a4   : > { %6635 = vst [vmem:[#allocation84_spill] sm:$0xff] %v5536_v36  ;;  %v2623_v60 = vmul.f32 %v4850_v31, %v2108_v5  ;;  %v2526_v36 = vadd.f32 %v2494_v40, %v2454_v56  ;;  %v2271_v37 = vmul.f32 %v4807_v57, %v1932_v46  ;;  %v2483_v30 = vmul.f32 %v4833_v18, %v1932_v46 }
 0x2a5   : > { %6639 = vst [vmem:[#allocation86_spill] sm:$0xff] %v5553_v10  ;;  %v2443_v34 = vadd.f32 %v2411_v55, %v5326_v29  ;;  %v2695_v48 = vmul.f32 %v4854_v32, %v1932_v46  ;;  %v2835_v27 = vmul.f32 %v5247_v50, %v2108_v5  ;;  %v6443_v14 = vrot.slane %v5502_v63, 7  ;;  %v6646_v55 = vld [vmem:[#allocation49_spill] sm:$0xff] }
 0x2a6   : > { %v2655_v11 = vadd.f32 %v2623_v60, %v5288_v17  ;;  %v6641_v10 = vand.u32 15, %v6640_v38  ;;  %v5573_v56 = vadd.f32 %v2566_v53, %v2526_v36  ;;  %v5576_v29 = vmul.f32 %v4865_v26, %v1851_v9  ;;  %v6650_v60 = vld [vmem:[#allocation50_spill] sm:$0xff] }
 0x2a7   : > { %v2515_v40 = vadd.f32 %v2483_v30, %v2443_v34  ;;  %v6444_v17 = vrot.slane %v5305_v54, 1  ;;  %v6647_v46 = vand.u32 15, %v6646_v55  ;;  %v6651_v38 = vand.u32 15, %v6650_v60 }
 0x2a8   : > { %vm5569_vm12 = vcmp.gt.s32.totalorder %v6641_v10, 0  ;;  %6644 = vst [vmem:[#allocation51_spill] sm:$0xff] %v5573_v56  ;;  %6645 = vst [vmem:[#allocation87_spill] sm:$0xff] %v5576_v29  ;;  %v2555_v36 = vmul.f32 %v4828_v12, %v5498_v6  ;;  %v2727_v9 = vadd.f32 %v2695_v48, %v2655_v11  ;;  %v2867_v34 = vadd.f32 %v2835_v27, %v5290_v43  ;;  %v1147_v43 = vpop.f32.mrf.mxu0  ;;  %v6658_v56 = vld [vmem:[#allocation52_spill] sm:$0xff] }
 0x2a9   : > { %vm5581_vm13 = vcmp.lt.s32.totalorder %v6647_v46, 15  ;;  %vm5587_vm14 = vcmp.lt.s32.totalorder %v6651_v38, 15  ;;  %v6654_v30 = vrot.slane %v5305_v54, 7  ;;  %v2375_v55 = vadd.f32 %v2343_v13, %v2271_v37 }
 0x2aa   : > { %v2767_v46 = vmul.f32 %v4852_v4, %v5498_v6  ;;  %v6655_v38 = vrot.slane %v5215_v19, 1  ;;  %v2587_v48 = vadd.f32 %v2555_v36, %v2515_v40  ;;  %v2119_v29 = vrot.slane %v6658_v56, 1 }
 0x2ab   : > { %v1831_v53 = vsel %vm1793_vm0, %v6654_v30, %v6443_v14  ;;  %v2344_v30 = vmul.f32 %v4810_v41, %v5502_v63  ;;  %v1148_v14 = vadd.f32 %v1147_v43, %v4789_v51  ;;  %v6661_v51 = vld [vmem:[#allocation61_spill] sm:$0xff] }
 0x2ac   : > { %v1933_v60 = vsel %vm5448_vm11, %v1831_v53, 0.0  ;;  %v2110_v11 = vsel %vm2080_vm3, %v6655_v38, %v6444_v17  ;;  %v5612_v13 = vadd.f32 %v2767_v46, %v2727_v9  ;;  %v2556_v53 = vmul.f32 %v4835_v16, %v5502_v63 }
 0x2ad   : > { %v2272_v27 = vmul.f32 %v4826_v0, %v1933_v60  ;;  %v2412_v37 = vmul.f32 %v4840_v59, %v2110_v11  ;;  %v2484_v33 = vmul.f32 %v4842_v22, %v1933_v60  ;;  %v2624_v19 = vmul.f32 %v4856_v21, %v2110_v11 }
 0x2ae   : > { %6656 = vst [vmem:[#allocation49_spill] sm:$0xff] %v5612_v13  ;;  %v5619_v38 = vadd.f32 %v4891_v44, %v2867_v34  ;;  %v2696_v40 = vmul.f32 %v4865_v26, %v1933_v60  ;;  %v2836_v36 = vmul.f32 %v5281_v35, %v2110_v11  ;;  %v2768_v9 = vmul.f32 %v4858_v3, %v5502_v63 }
 0x2af   : > { %v2444_v17 = vadd.f32 %v2412_v37, %v5341_v61  ;;  %v2111_v46 = vrot.slane %v5498_v6, 1  ;;  %v5629_v13 = vadd.f32 %v2344_v30, %v2272_v27  ;;  %v2656_v34 = vadd.f32 %v2624_v19, %v5313_v42 }
 0x2b0   : > { %6657 = vst [vmem:[#allocation50_spill] sm:$0xff] %v5619_v38  ;;  %v1832_v38 = vrot.slane %v1148_v14, 7  ;;  %v2115_v28 = vrot.slane %v1148_v14, 1  ;;  %v6659_v11 = vrot.slane %v5297_v1, 1  ;;  %v6660_v61 = vrot.slane %v6608_v39, 1 }
 0x2b1   : > { %v2516_v60 = vadd.f32 %v2484_v33, %v2444_v17  ;;  %v2489_v35 = vmul.f32 %v4833_v18, %v6661_v51  ;;  %v2728_v3 = vadd.f32 %v2696_v40, %v2656_v34  ;;  %v2868_v27 = vadd.f32 %v2836_v36, %v5320_v62 }
 0x2b2   : > { %v2112_v43 = vsel %vm2080_vm3, %v6659_v11, %v2111_v46  ;;  %v5638_v37 = vsel %vm2080_vm3, %v2119_v29, %v6660_v61  ;;  %v6662_v42 = vrot.slane %v5498_v6, 7  ;;  %v6663_v17 = vrot.slane %v6658_v56, 7 }
 0x2b3   : > { %v5654_v33 = vsel %vm2080_vm3, %v2111_v46, %v2115_v28  ;;  %v2120_v19 = vsel %vm2080_vm3, %v2115_v28, %v2119_v29  ;;  %v2345_v40 = vmul.f32 %v4801_v25, %v1148_v14  ;;  %v2217_v62 = vsel %vm5581_vm13, %v2112_v43, 0.0 }
 0x2b4   : > { %v1833_v30 = vsel %vm1793_vm0, %v6662_v42, %v1832_v38  ;;  %v1837_v1 = vsel %vm1793_vm0, %v1832_v38, %v6663_v17  ;;  %v2221_v6 = vsel %vm5587_vm14, %v2120_v19, 0.0  ;;  %v2415_v38 = vmul.f32 %v4831_v15, %v5654_v33 }
 0x2b5   : > { %v5651_v39 = vsel %vm5569_vm12, %v1837_v1, 0.0  ;;  %v2273_v56 = vmul.f32 %v4807_v57, %v1833_v30  ;;  %v2413_v36 = vmul.f32 %v4831_v15, %v2217_v62  ;;  %v2417_v46 = vmul.f32 %v4831_v15, %v2221_v6 }
 0x2b6   : > { %v2485_v34 = vmul.f32 %v4833_v18, %v1833_v30  ;;  %v2487_v28 = vmul.f32 %v4833_v18, %v5651_v39  ;;  %v5670_v29 = vadd.f32 %v2556_v53, %v2516_v60  ;;  %v2447_v43 = vadd.f32 %v2415_v38, %v2375_v55 }
 0x2b7   : > { %v2377_v11 = vadd.f32 %v2345_v40, %v2273_v56  ;;  %v2625_v61 = vmul.f32 %v4850_v31, %v2217_v62  ;;  %v5673_v42 = vadd.f32 %v2768_v9, %v2728_v3  ;;  %v5676_v17 = vadd.f32 %v4894_v20, %v2868_v27  ;;  %v1149_v27 = vpop.f32.mrf.mxu0 }
 0x2b8   : > { %v2445_v1 = vadd.f32 %v2413_v36, %v5365_v45  ;;  %v2627_v19 = vmul.f32 %v4850_v31, %v5654_v33  ;;  %v5681_v15 = vadd.f32 %v2487_v28, %v2447_v43  ;;  %v2557_v53 = vmul.f32 %v4828_v12, %v1148_v14 }
 0x2b9   : > { %v2449_v25 = vadd.f32 %v2417_v46, %v2377_v11  ;;  %v2657_v60 = vadd.f32 %v2625_v61, %v5400_v49  ;;  %v2697_v3 = vmul.f32 %v4854_v32, %v1833_v30  ;;  %v2699_v9 = vmul.f32 %v4854_v32, %v5651_v39 }
 0x2ba   : > { %v2517_v55 = vadd.f32 %v2485_v34, %v2445_v1  ;;  %v2659_v40 = vadd.f32 %v2627_v19, %v2587_v48  ;;  %v2629_v45 = vmul.f32 %v4850_v31, %v2221_v6  ;;  %v2633_v38 = vmul.f32 %v4850_v31, %v5474_v23  ;;  %v6664_v48 = vld [vmem:[#allocation64_spill] sm:$0xff] }
 0x2bb   : > { %v2521_v56 = vadd.f32 %v2489_v35, %v2449_v25  ;;  %v2837_v36 = vmul.f32 %v5247_v50, %v2217_v62  ;;  %v2729_v28 = vadd.f32 %v2697_v3, %v2657_v60  ;;  %v2769_v49 = vmul.f32 %v4852_v4, %v1148_v14  ;;  %v6666_v3 = vld [vmem:[#allocation53_spill] sm:$0xff] }
 0x2bc   : > { %v2589_v46 = vadd.f32 %v2557_v53, %v2517_v55  ;;  %v2731_v11 = vadd.f32 %v2699_v9, %v2659_v40  ;;  %v2701_v30 = vmul.f32 %v4854_v32, %v6661_v51  ;;  %v2841_v43 = vmul.f32 %v5247_v50, %v2221_v6 }
 0x2bd   : > { %v2593_v34 = vadd.f32 %v6664_v48, %v2521_v56  ;;  %v1150_v25 = vadd.f32 %v1149_v27, %v4792_v52  ;;  %v2801_v61 = vadd.f32 %v2769_v49, %v2729_v28  ;;  %v2869_v1 = vadd.f32 %v2837_v36, %v5370_v58  ;;  %v6669_v36 = vld [vmem:[#allocation67_spill] sm:$0xff] }
 0x2be   : > { %v2661_v35 = vadd.f32 %v2629_v45, %v2589_v46  ;;  %v2113_v62 = vrot.slane %v5502_v63, 1  ;;  %v2845_v53 = vmul.f32 %v5247_v50, %v5474_v23  ;;  %v6665_v51 = vrot.slane %v5305_v54, 1 }
 0x2bf   : > { %v2665_v19 = vadd.f32 %v2633_v38, %v2593_v34  ;;  %v1834_v14 = vrot.slane %v1150_v25, 7  ;;  %v2117_v60 = vrot.slane %v1150_v25, 1  ;;  %v2873_v40 = vadd.f32 %v2841_v43, %v2801_v61 }
 0x2c0   : > { %v2733_v55 = vadd.f32 %v2701_v30, %v2661_v35  ;;  %v2114_v6 = vsel %vm2080_vm3, %v6665_v51, %v2113_v62  ;;  %v2121_v9 = vrot.slane %v6666_v3, 1  ;;  %v6667_v58 = vrot.slane %v5502_v63, 7 }
 0x2c1   : > { %v2737_v27 = vadd.f32 %v5507_v8, %v2665_v19  ;;  %v6668_v45 = vrot.slane %v6666_v3, 7  ;;  %v2118_v38 = vsel %vm2080_vm3, %v2113_v62, %v2117_v60  ;;  %v5716_v54 = vadd.f32 %v4891_v44, %v2869_v1 }
 0x2c2   : > { %v1835_v56 = vsel %vm1793_vm0, %v6667_v58, %v1834_v14  ;;  %v2805_v46 = vadd.f32 %v6669_v36, %v2733_v55  ;;  %v2122_v8 = vsel %vm2080_vm3, %v2117_v60, %v2121_v9  ;;  %v2218_v49 = vsel %vm5581_vm13, %v2114_v6, 0.0 }
 0x2c3   : > { %v1839_v23 = vsel %vm1793_vm0, %v1834_v14, %v6668_v45  ;;  %v5724_v63 = vadd.f32 %v5517_v7, %v2737_v27  ;;  %v2222_v48 = vsel %vm5587_vm14, %v2122_v8, 0.0  ;;  %v2274_v34 = vmul.f32 %v4826_v0, %v1835_v56  ;;  %v6671_v14 = vld [vmem:[#allocation66_spill] sm:$0xff]  ;;  %v6672_v27 = vld [vmem:[#allocation65_spill] sm:$0xff] }
 0x2c4   : > { %v5720_v28 = vsel %vm5569_vm12, %v1839_v23, 0.0  ;;  %v2877_v30 = vadd.f32 %v2845_v53, %v2805_v46  ;;  %v2346_v43 = vmul.f32 %v4810_v41, %v1150_v25  ;;  %v2414_v2 = vmul.f32 %v4840_v59, %v2218_v49  ;;  %v6673_v45 = vld [vmem:[#allocation54_spill] sm:$0xff] }
 0x2c5   : > { %v2416_v35 = vmul.f32 %v4840_v59, %v2118_v38  ;;  %v2917_v61 = vadd.f32 %v4891_v44, %v2873_v40  ;;  %v6670_v7 = vrot.slane %v6611_v47, 1  ;;  %v2418_v5 = vmul.f32 %v4840_v59, %v2222_v48 }
 0x2c6   : > { %v2486_v10 = vmul.f32 %v4842_v22, %v1835_v56  ;;  %v2378_v62 = vadd.f32 %v2346_v43, %v2274_v34  ;;  %v2446_v19 = vadd.f32 %v2414_v2, %v5407_v24  ;;  %v5745_v53 = vmul.f32 %v4842_v22, %v5720_v28  ;;  %v6674_v2 = vld [vmem:[#allocation47_spill] sm:$0xff] }
 0x2c7   : > { %v5738_v1 = vsel %vm2080_vm3, %v2121_v9, %v6670_v7  ;;  %v2490_v60 = vmul.f32 %v4842_v22, %v6671_v14  ;;  %v2921_v55 = vadd.f32 %v4891_v44, %v2877_v30  ;;  %v5751_v47 = vadd.f32 %v2416_v35, %v5629_v13  ;;  %v6675_v7 = vld [vmem:[#allocation58_spill] sm:$0xff] }
 0x2c8   : > { %v2626_v40 = vmul.f32 %v4856_v21, %v2218_v49  ;;  %v2628_v51 = vmul.f32 %v4856_v21, %v2118_v38  ;;  %v2450_v6 = vadd.f32 %v2418_v5, %v2378_v62  ;;  %v2518_v3 = vadd.f32 %v2486_v10, %v2446_v19  ;;  %v6676_v10 = vld [vmem:[#allocation71_spill] sm:$0xff]  ;;  %v6677_v19 = vld [vmem:[#allocation69_spill] sm:$0xff] }
 0x2c9   : > { %v2558_v24 = vmul.f32 %v4835_v16, %v1150_v25  ;;  %v2630_v9 = vmul.f32 %v4856_v21, %v2222_v48  ;;  %v2634_v58 = vmul.f32 %v4856_v21, %v6672_v27  ;;  %v2698_v13 = vmul.f32 %v4865_v26, %v1835_v56 }
 0x2ca   : > { %v2658_v23 = vadd.f32 %v2626_v40, %v6673_v45  ;;  %v2660_v36 = vadd.f32 %v2628_v51, %v5670_v29  ;;  %v2522_v46 = vadd.f32 %v2490_v60, %v2450_v6  ;;  %v2700_v34 = vmul.f32 %v4865_v26, %v5720_v28 }
 0x2cb   : > { %v2590_v8 = vadd.f32 %v2558_v24, %v2518_v3  ;;  %v2702_v30 = vmul.f32 %v4865_v26, %v6671_v14  ;;  %v2770_v35 = vmul.f32 %v6674_v2, %v1150_v25  ;;  %v2803_v5 = vadd.f32 %v6675_v7, %v2731_v11  ;;  %v6678_v11 = vld [vmem:[#allocation63_spill] sm:$0xff] }
 0x2cc   : > { %v2730_v43 = vadd.f32 %v2698_v13, %v2658_v23  ;;  %v2838_v62 = vmul.f32 %v6676_v10, %v2218_v49  ;;  %v2594_v40 = vadd.f32 %v6677_v19, %v2522_v46  ;;  %v2732_v51 = vadd.f32 %v2700_v34, %v2660_v36  ;;  %v6679_v23 = vld [vmem:[#allocation68_spill] sm:$0xff]  ;;  %v6680_v36 = vld [vmem:[#allocation49_spill] sm:$0xff] }
 0x2cd   : > { %v2662_v29 = vadd.f32 %v2630_v9, %v2590_v8  ;;  %v2839_v56 = vmul.f32 %v5247_v50, %v5654_v33  ;;  %v2840_v6 = vmul.f32 %v6676_v10, %v2118_v38  ;;  %v2842_v3 = vmul.f32 %v6676_v10, %v2222_v48  ;;  %v6681_v48 = vld [vmem:[#allocation87_spill] sm:$0xff]  ;;  %v6682_v8 = vld [vmem:[#allocation70_spill] sm:$0xff] }
 0x2ce   : > { %v2802_v60 = vadd.f32 %v2770_v35, %v2730_v43  ;;  %v2843_v14 = vmul.f32 %v5247_v50, %v5638_v37  ;;  %v2666_v25 = vadd.f32 %v2634_v58, %v2594_v40  ;;  %v2804_v45 = vadd.f32 %v6678_v11, %v2732_v51  ;;  %v6683_v40 = vld [vmem:[#allocation85_spill] sm:$0xff]  ;;  %v6686_v11 = vld [vmem:[#allocation55_spill] sm:$0xff] }
 0x2cf   : > { %v2734_v24 = vadd.f32 %v2702_v30, %v2662_v29  ;;  %v2844_v49 = vmul.f32 %v6676_v10, %v5738_v1  ;;  %v2846_v9 = vmul.f32 %v6676_v10, %v6672_v27  ;;  %v2870_v33 = vadd.f32 %v2838_v62, %v6679_v23  ;;  %v1173_v27 = vpop.f32.mrf.mxu1 }
 0x2d0   : > { %v2871_v13 = vadd.f32 %v2839_v56, %v6680_v36  ;;  %v2872_v38 = vadd.f32 %v2840_v6, %v5673_v42  ;;  %v2738_v46 = vadd.f32 %v6681_v48, %v2666_v25  ;;  %v2874_v58 = vadd.f32 %v2842_v3, %v2802_v60  ;;  %v6684_v60 = vld [vmem:[#allocation50_spill] sm:$0xff]  ;;  %v6688_v36 = vld [vmem:[#allocation43_spill] sm:$0xff] }
 0x2d1   : > { %v2806_v34 = vadd.f32 %v6682_v8, %v2734_v24  ;;  %v2875_v30 = vadd.f32 %v2843_v14, %v2803_v5  ;;  %v2876_v43 = vadd.f32 %v2844_v49, %v2804_v45  ;;  %v2914_v35 = vadd.f32 %v4894_v20, %v2870_v33  ;;  %v6685_v24 = vld [vmem:[#allocation72_spill] sm:$0xff] }
 0x2d2   : > { %v2915_v7 = vadd.f32 %v4891_v44, %v2871_v13  ;;  %v2916_v19 = vadd.f32 %v4894_v20, %v2872_v38  ;;  %v5790_v62 = vadd.f32 %v6683_v40, %v2738_v46  ;;  %v2918_v42 = vadd.f32 %v4894_v20, %v2874_v58  ;;  %v6687_v49 = vld [vmem:[#allocation44_spill] sm:$0xff]  ;;  %v6689_v38 = vld [vmem:[#allocation74_spill] sm:$0xff]  ;;  %v6690_v58 = vld [vmem:[#allocation73_spill] sm:$0xff] }
 0x2d3   : > { %v2878_v29 = vadd.f32 %v2846_v9, %v2806_v34  ;;  %v2919_v51 = vadd.f32 %v4891_v44, %v2875_v30  ;;  %v2920_v56 = vadd.f32 %v4894_v20, %v2876_v43  ;;  %v2941_v5 = vmul.f32 %v5676_v17, %v6684_v60 }
 0x2d4   : > { %v2942_v6 = vmul.f32 %v2914_v35, %v5716_v54  ;;  %v2943_v3 = vmul.f32 %v2916_v19, %v2915_v7  ;;  %v2944_v25 = vmul.f32 %v2918_v42, %v2917_v61  ;;  %v3035_v45 = vadd.f32 %v6686_v11, %v6685_v24  ;;  %v6695_v42 = vld [vmem:[#allocation56_spill] sm:$0xff] }
 0x2d5   : > { %v2922_v14 = vadd.f32 %v4894_v20, %v2878_v29  ;;  %v5802_v9 = vadd.f32 %v1173_v27, %v6687_v49  ;;  %v2945_v23 = vmul.f32 %v2920_v56, %v2919_v51  ;;  %v1217_v13 = vadd.s32 112, %v6688_v36 }
 0x2d6   : > { %v3395_v33 = vpack.c.bf16 %v2942_v6, %v2941_v5  ;;  %v2131_v17 = vrot.slane %v6689_v38, 1  ;;  %v3400_v46 = vpack.c.bf16 %v2944_v25, %v2943_v3  ;;  %v3036_v54 = vadd.f32 %v3035_v45, %v2941_v5  ;;  %v6697_v5 = vld [vmem:[#allocation45_spill] sm:$0xff] }
 0x2d7   : > { %v2946_v48 = vmul.f32 %v2922_v14, %v2921_v55  ;;  %v1852_v8 = vrot.slane %v5802_v9, 7  ;;  %v2631_v61 = vmul.f32 %v4850_v31, %v5638_v37  ;;  %v1451_v34 = vand.u32 15, %v1217_v13  ;;  %v6698_v14 = vld [vmem:[#allocation57_spill] sm:$0xff] }
 0x2d8   : > { %3427 = vst [vmem:[%s5467_s14 + $0x8] sm:$0xff] %v3395_v33   ;;  %v6691_v30 = vrot.slane %v6690_v58, 1  ;;  %v2275_v35 = vmul.f32 %v4807_v57, %v5651_v39  ;;  %v2520_v55 = vadd.f32 %v5745_v53, %v5751_v47  ;;  %3428 = vst [vmem:[%s5467_s14 + $0x10] sm:$0xff] %v3400_v46   ;;  %v3037_v19 = vadd.f32 %v3036_v54, %v2942_v6  ;;  %v6696_v39 = vld [vmem:[#allocation46_spill] sm:$0xff]  ;;  %v6699_v33 = vld [vmem:[#allocation77_spill] sm:$0xff]  ;;  %v1175_v46 = vpop.f32.mrf.mxu1 }
 0x2d9   : > { %v3405_v7 = vpack.c.bf16 %v2946_v48, %v2945_v23  ;;  %v6692_v27 = vrot.slane %v6689_v38, 7  ;;  %vm5825_vm15 = vcmp.gt.s32.totalorder %v1451_v34, 0  ;;  %v2419_v56 = vmul.f32 %v6696_v39, %v5638_v37 }
 0x2da   : > { %v2132_v43 = vsel %vm2080_vm3, %v6691_v30, %v2131_v17  ;;  %v2379_v51 = vadd.f32 %v6695_v42, %v2275_v35  ;;  %v3038_v47 = vadd.f32 %v3037_v19, %v2943_v3  ;;  %v2355_v6 = vmul.f32 %v6697_v5, %v5802_v9  ;;  %v6700_v35 = vld [vmem:[#allocation48_spill] sm:$0xff] }
 0x2db   : > { %v1853_v40 = vsel %vm1793_vm0, %v6692_v27, %v1852_v8  ;;  %v2423_v53 = vmul.f32 %v6696_v39, %v2132_v43  ;;  %3429 = vst [vmem:[%s5467_s14 + $0x18] sm:$0xff] %v3405_v7   ;;  %v2591_v24 = vadd.f32 %v6698_v14, %v5681_v15  ;;  %v2567_v3 = vmul.f32 %v4828_v12, %v5802_v9 }
 0x2dc   : > { %v1944_v60 = vsel %vm5825_vm15, %v1853_v40, 0.0  ;;  %v2451_v45 = vadd.f32 %v2419_v56, %v2379_v51  ;;  %v3039_v54 = vadd.f32 %v3038_v47, %v2944_v25  ;;  %v2635_v34 = vmul.f32 %v4850_v31, %v2132_v43  ;;  %v6701_v40 = vld [vmem:[#allocation80_spill] sm:$0xff]  ;;  %v6702_v25 = vld [vmem:[#allocation83_spill] sm:$0xff] }
 0x2dd   : > { %v2283_v11 = vmul.f32 %v4807_v57, %v1944_v60  ;;  %v2455_v13 = vadd.f32 %v2423_v53, %v6699_v33  ;;  %v2495_v37 = vmul.f32 %v4833_v18, %v1944_v60  ;;  %v2663_v58 = vadd.f32 %v2631_v61, %v2591_v24  ;;  %v6703_v53 = vld [vmem:[#allocation75_spill] sm:$0xff] }
 0x2de   : > { %v2523_v7 = vadd.f32 %v6700_v35, %v2451_v45  ;;  %v2707_v19 = vmul.f32 %v4854_v32, %v1944_v60  ;;  %v3040_v27 = vadd.f32 %v3039_v54, %v2945_v23  ;;  %v5852_v51 = vadd.f32 %v1175_v46, %v4792_v52  ;;  %v6704_v60 = vld [vmem:[#allocation78_spill] sm:$0xff]  ;;  %v6707_v46 = vld [vmem:[#allocation59_spill] sm:$0xff] }
 0x2df   : > { %v5846_v30 = vadd.f32 %v2355_v6, %v2283_v11  ;;  %v2527_v15 = vadd.f32 %v2495_v37, %v2455_v13  ;;  %v2735_v42 = vadd.f32 %v6701_v40, %v2663_v58  ;;  %v2133_v56 = vrot.slane %v6702_v25, 1  ;;  %v6705_v45 = vld [vmem:[#allocation62_spill] sm:$0xff]  ;;  %v1177_v58 = vpop.f32.mrf.mxu1 }
 0x2e0   : > { %v2595_v47 = vadd.f32 %v6703_v53, %v2523_v7  ;;  %v2847_v61 = vmul.f32 %v5247_v50, %v2132_v43  ;;  %v2276_v6 = vmul.f32 %v4826_v0, %v5720_v28  ;;  %v5861_v24 = vadd.f32 %v3040_v27, %v2946_v48  ;;  %v6710_v53 = vld [vmem:[#allocation79_spill] sm:$0xff] }
 0x2e1   : > { %v5856_v14 = vadd.f32 %v2567_v3, %v2527_v15  ;;  %v2807_v23 = vadd.f32 %v6704_v60, %v2735_v42  ;;  %v1854_v11 = vrot.slane %v5852_v51, 7  ;;  %v6706_v33 = vrot.slane %v6705_v45, 1  ;;  %v6709_v15 = vld [vmem:[#allocation60_spill] sm:$0xff] }
 0x2e2   : > { %v2667_v37 = vadd.f32 %v2635_v34, %v2595_v47  ;;  %v2380_v54 = vadd.f32 %v6707_v46, %v2276_v6  ;;  %v2420_v3 = vmul.f32 %v4840_v59, %v5738_v1  ;;  %v2632_v28 = vmul.f32 %v4856_v21, %v5738_v1  ;;  %v6711_v60 = vld [vmem:[#allocation76_spill] sm:$0xff] }
 0x2e3   : > { %v2134_v13 = vsel %vm2080_vm3, %v6706_v33, %v2133_v56  ;;  %v2879_v48 = vadd.f32 %v2847_v61, %v2807_v23  ;;  %v6708_v35 = vrot.slane %v6702_v25, 7  ;;  %v2592_v34 = vadd.f32 %v6709_v15, %v2520_v55  ;;  %v1179_v33 = vpop.f32.mrf.mxu1 }
 0x2e4   : > { %v2424_v43 = vmul.f32 %v4840_v59, %v2134_v13  ;;  %v2739_v27 = vadd.f32 %v2707_v19, %v2667_v37  ;;  %v2452_v42 = vadd.f32 %v2420_v3, %v2380_v54  ;;  %v2356_v1 = vmul.f32 %v4810_v41, %v5852_v51  ;;  %v6712_v19 = vld [vmem:[#allocation81_spill] sm:$0xff] }
 0x2e5   : > { %v1855_v7 = vsel %vm1793_vm0, %v6708_v35, %v1854_v11  ;;  %v2564_v25 = vmul.f32 %v4835_v16, %v6705_v45  ;;  %v2704_v55 = vmul.f32 %v4865_v26, %v6711_v60  ;;  %v2664_v29 = vadd.f32 %v2632_v28, %v2592_v34 }
 0x2e6   : > { %v1945_v40 = vsel %vm5825_vm15, %v1855_v7, 0.0  ;;  %v2456_v47 = vadd.f32 %v2424_v43, %v6710_v53  ;;  %v2524_v23 = vadd.f32 %v6712_v19, %v2452_v42  ;;  %v2776_v37 = vmul.f32 %v6674_v2, %v6705_v45 }
 0x2e7   : > { %v2284_v6 = vmul.f32 %v4826_v0, %v1945_v40  ;;  %v2496_v61 = vmul.f32 %v4842_v22, %v1945_v40  ;;  %v2636_v3 = vmul.f32 %v4856_v21, %v2134_v13  ;;  %v2736_v35 = vadd.f32 %v2704_v55, %v2664_v29  ;;  %v1183_v29 = vpop.f32.mrf.mxu1 }
 0x2e8   : > { %v2596_v43 = vadd.f32 %v2564_v25, %v2524_v23  ;;  %v5898_v7 = vadd.f32 %v1177_v58, %v6687_v49  ;;  %v1216_v15 = vadd.s32 104, %v6688_v36  ;;  %v2708_v53 = vmul.f32 %v4865_v26, %v1945_v40 }
 0x2e9   : > { %v5894_v46 = vadd.f32 %v2356_v1, %v2284_v6  ;;  %v2528_v54 = vadd.f32 %v2496_v61, %v2456_v47  ;;  %v2135_v28 = vrot.slane %v5802_v9, 1  ;;  %v5904_v34 = vadd.f32 %v1179_v33, %v4792_v52 }
 0x2ea   : > { %v2668_v45 = vadd.f32 %v2636_v3, %v2596_v43  ;;  %v2808_v42 = vadd.f32 %v2776_v37, %v2736_v35  ;;  %v2848_v47 = vmul.f32 %v6676_v10, %v2134_v13  ;;  %v1444_v6 = vand.u32 15, %v1216_v15  ;;  %v6713_v37 = vld [vmem:[#allocation82_spill] sm:$0xff]  ;;  %v6714_v43 = vld [vmem:[#allocation84_spill] sm:$0xff] }
 0x2eb   : > { %v2136_v1 = vsel %vm2080_vm3, %v2131_v17, %v2135_v28  ;;  %v2137_v58 = vrot.slane %v5852_v51, 1  ;;  %v1856_v40 = vrot.slane %v5898_v7, 7  ;;  %v2923_v55 = vadd.f32 %v4891_v44, %v2879_v48 }
 0x2ec   : > { %v2740_v61 = vadd.f32 %v2708_v53, %v2668_v45  ;;  %v2880_v25 = vadd.f32 %v2848_v47, %v2808_v42  ;;  %vm1622_vm1 = vcmp.lt.s32.totalorder %v1444_v6, 15  ;;  %v6715_v42 = vld [vmem:[#allocation86_spill] sm:$0xff] }
 0x2ed   : > { %v2229_v60 = vsel %vm1622_vm1, %v2136_v1, 0.0  ;;  %v2138_v17 = vsel %vm2080_vm3, %v2133_v56, %v2137_v58  ;;  %v1857_v15 = vsel %vm1793_vm0, %v1852_v8, %v1856_v40  ;;  %v2779_v56 = vmul.f32 %v4852_v4, %v5802_v9  ;;  %v1185_v1 = vpop.f32.mrf.mxu1 }
 0x2ee   : > { %v2924_v19 = vadd.f32 %v4894_v20, %v2880_v25  ;;  %v2425_v23 = vmul.f32 %v6696_v39, %v2229_v60  ;;  %v2637_v13 = vmul.f32 %v4850_v31, %v2229_v60  ;;  %v2849_v38 = vmul.f32 %v5247_v50, %v2229_v60 }
 0x2ef   : > { %v2230_v48 = vsel %vm1622_vm1, %v2138_v17, 0.0  ;;  %v6457_v50 = vrot.slane %v5904_v34, 7  ;;  %v2811_v25 = vadd.f32 %v2779_v56, %v2739_v27  ;;  %v2568_v60 = vmul.f32 %v4835_v16, %v5852_v51 }
 0x2f0   : > { %v5920_v33 = vmul.f32 %v2924_v19, %v2923_v55  ;;  %v2457_v3 = vadd.f32 %v2425_v23, %v6713_v37  ;;  %v2669_v35 = vadd.f32 %v2637_v13, %v6714_v43  ;;  %v2881_v53 = vadd.f32 %v2849_v38, %v5724_v63  ;;  %v6716_v19 = vld [vmem:[#allocation51_spill] sm:$0xff] }
 0x2f1   : > { %v2426_v45 = vmul.f32 %v4840_v59, %v2230_v48  ;;  %v2638_v6 = vmul.f32 %v4856_v21, %v2230_v48  ;;  %v2780_v8 = vmul.f32 %v6674_v2, %v5852_v51  ;;  %v2497_v63 = vmul.f32 %v4833_v18, %v1857_v15 }
 0x2f2   : > { %v2709_v55 = vmul.f32 %v4854_v32, %v1857_v15  ;;  %v1859_v9 = vsel %vm1793_vm0, %v1854_v11, %v6457_v50  ;;  %v2850_v27 = vmul.f32 %v6676_v10, %v2230_v48  ;;  %v5948_v13 = vadd.f32 %v1183_v29, %v6687_v49 }
 0x2f3   : > { %v2458_v47 = vadd.f32 %v2426_v45, %v6715_v42  ;;  %v2670_v23 = vadd.f32 %v2638_v6, %v6716_v19  ;;  %v1219_v38 = vadd.s32 128, %v6688_v36  ;;  %v2139_v17 = vrot.slane %v5898_v7, 1 }
 0x2f4   : > { %v5953_v37 = vadd.f32 %v1185_v1, %v4792_v52  ;;  %v5955_v43 = vadd.f32 %v2568_v60, %v2528_v54  ;;  %v2357_v45 = vmul.f32 %v6697_v5, %v5898_v7  ;;  %v2569_v11 = vmul.f32 %v4828_v12, %v5898_v7 }
 0x2f5   : > { %v2882_v10 = vadd.f32 %v2850_v27, %v5790_v62  ;;  %v2285_v29 = vmul.f32 %v4807_v57, %v1857_v15  ;;  %v2498_v48 = vmul.f32 %v4842_v22, %v1859_v9  ;;  %v1465_v56 = vand.u32 15, %v1219_v38  ;;  %v1187_v38 = vpop.f32.mrf.mxu1 }
 0x2f6   : > { %v1860_v42 = vrot.slane %v5948_v13, 7  ;;  %v2781_v6 = vmul.f32 %v4852_v4, %v5898_v7  ;;  %v2925_v54 = vadd.f32 %v4891_v44, %v2881_v53  ;;  %v2141_v5 = vrot.slane %v5904_v34, 1 }
 0x2f7   : > { %v2926_v1 = vadd.f32 %v4894_v20, %v2882_v10  ;;  %v2812_v60 = vadd.f32 %v2780_v8, %v2740_v61  ;;  %v2529_v19 = vadd.f32 %v2497_v63, %v2457_v3  ;;  %v2741_v50 = vadd.f32 %v2709_v55, %v2669_v35  ;;  %v5991_v63 = vld [vmem:[#allocation12 + $0x10] ss:$0 sm:$0xff] }
 0x2f8   : > { %v2140_v57 = vsel %vm2080_vm3, %v2135_v28, %v2139_v17  ;;  %v2286_v62 = vmul.f32 %v4826_v0, %v1859_v9  ;;  %vm5976_vm2 = vcmp.gt.s32.totalorder %v1465_v56, 0  ;;  %v1861_v53 = vsel %vm1793_vm0, %v1856_v40, %v1860_v42  ;;  %v6010_v56 = vld [vmem:[#allocation12 + $0x18] ss:$0 sm:$0xff] }
 0x2f9   : > { %v5974_v15 = vmul.f32 %v2926_v1, %v2925_v54  ;;  %v5983_v61 = vadd.f32 %v2357_v45, %v2285_v29  ;;  %v2530_v3 = vadd.f32 %v2498_v48, %v2458_v47  ;;  %v2710_v35 = vmul.f32 %v4865_v26, %v1859_v9 }
 0x2fa   : > { %v6458_v28 = vrot.slane %v5953_v37, 7  ;;  %v2358_v0 = vmul.f32 %v4810_v41, %v5904_v34  ;;  %v2851_v55 = vmul.f32 %v5991_v63, %v2140_v57  ;;  %v2142_v40 = vsel %vm2080_vm3, %v2137_v58, %v2141_v5  ;;  %v1189_v58 = vpop.f32.mrf.mxu1 }
 0x2fb   : > { %v3410_v8 = vpack.c.bf16 %v5974_v15, %v5920_v33  ;;  %v5999_v47 = vadd.f32 %v2569_v11, %v2529_v19  ;;  %v2813_v9 = vadd.f32 %v2781_v6, %v2741_v50  ;;  %v2570_v45 = vmul.f32 %v4835_v16, %v5904_v34 }
 0x2fc   : > { %v1948_v41 = vsel %vm5976_vm2, %v1861_v53, 0.0  ;;  %v6005_v10 = vadd.f32 %v2358_v0, %v2286_v62  ;;  %v2782_v29 = vmul.f32 %v6674_v2, %v5904_v34  ;;  %v2883_v48 = vadd.f32 %v2851_v55, %v2811_v25 }
 0x2fd   : > { %3430 = vst [vmem:[%s5467_s14 + $0x20] sm:$0xff] %v3410_v8   ;;  %v2852_v51 = vmul.f32 %v6010_v56, %v2142_v40  ;;  %v6013_v11 = vadd.f32 %v2570_v45, %v2530_v3  ;;  %v2742_v50 = vadd.f32 %v2710_v35, %v2670_v23  ;;  %v2427_v6 = vmul.f32 %v6696_v39, %v2140_v57 }
 0x2fe   : > { %v6719_v54 = vrot.slane %v5904_v34, 7  ;;  %v2499_v19 = vmul.f32 %v4833_v18, %v1948_v41  ;;  %v2639_v25 = vmul.f32 %v4850_v31, %v2140_v57  ;;  %v6024_v53 = vadd.f32 %v1187_v38, %v6687_v49 }
 0x2ff   : > { %v2884_v62 = vadd.f32 %v2852_v51, %v2812_v60  ;;  %v2711_v3 = vmul.f32 %v4854_v32, %v1948_v41  ;;  %v1218_v23 = vadd.s32 120, %v6688_v36  ;;  %v2143_v35 = vrot.slane %v5948_v13, 1 }
 0x300   : > { %v1863_v1 = vsel %vm1793_vm0, %v6719_v54, %v6458_v28  ;;  %v6030_v0 = vadd.f32 %v1189_v58, %v4792_v52  ;;  %v2927_v8 = vadd.f32 %v4891_v44, %v2883_v48  ;;  %v2145_v60 = vrot.slane %v5953_v37, 1 }
 0x301   : > { %v1949_v55 = vsel %vm5976_vm2, %v1863_v1, 0.0  ;;  %v2928_v57 = vadd.f32 %v4894_v20, %v2884_v62  ;;  %v2428_v38 = vmul.f32 %v4840_v59, %v2142_v40  ;;  %v2640_v45 = vmul.f32 %v4856_v21, %v2142_v40 }
 0x302   : > { %v1458_v41 = vand.u32 15, %v1218_v23  ;;  %v2144_v51 = vsel %vm2080_vm3, %v2139_v17, %v2143_v35  ;;  %v2459_v48 = vadd.f32 %v2427_v6, %v5846_v30  ;;  %v2571_v27 = vmul.f32 %v4828_v12, %v5948_v13  ;;  %v1193_v23 = vpop.f32.mrf.mxu1 }
 0x303   : > { %v2671_v58 = vadd.f32 %v2639_v25, %v5856_v14  ;;  %v6047_v54 = vmul.f32 %v2928_v57, %v2927_v8  ;;  %v2500_v1 = vmul.f32 %v4842_v22, %v1949_v55  ;;  %v2712_v62 = vmul.f32 %v4865_v26, %v1949_v55 }
 0x304   : > { %vm1624_vm4 = vcmp.lt.s32.totalorder %v1458_v41, 15  ;;  %v1864_v40 = vrot.slane %v6024_v53, 7  ;;  %v2814_v7 = vadd.f32 %v2782_v29, %v2742_v50  ;;  %v2531_v28 = vadd.f32 %v2499_v19, %v2459_v48 }
 0x305   : > { %v2233_v17 = vsel %vm1624_vm4, %v2144_v51, 0.0  ;;  %v2146_v30 = vsel %vm2080_vm3, %v2141_v5, %v2145_v60  ;;  %v2743_v14 = vadd.f32 %v2711_v3, %v2671_v58  ;;  %v2460_v6 = vadd.f32 %v2428_v38, %v5894_v46 }
 0x306   : > { %v2672_v25 = vadd.f32 %v2640_v45, %v5955_v43  ;;  %v2853_v8 = vmul.f32 %v5991_v63, %v2233_v17  ;;  %v2783_v29 = vmul.f32 %v4852_v4, %v5948_v13  ;;  %v2572_v50 = vmul.f32 %v4835_v16, %v5953_v37 }
 0x307   : > { %v2234_v19 = vsel %vm1624_vm4, %v2146_v30, 0.0  ;;  %v1194_v34 = vadd.f32 %v1193_v23, %v6687_v49  ;;  %v2532_v55 = vadd.f32 %v2500_v1, %v2460_v6  ;;  %v2784_v3 = vmul.f32 %v6674_v2, %v5953_v37  ;;  %v1195_v1 = vpop.f32.mrf.mxu1 }
 0x308   : > { %v2744_v5 = vadd.f32 %v2712_v62, %v2672_v25  ;;  %v1865_v46 = vsel %vm1793_vm0, %v1860_v42, %v1864_v40  ;;  %v2885_v43 = vadd.f32 %v2853_v8, %v2813_v9  ;;  %v2854_v57 = vmul.f32 %v6010_v56, %v2234_v19 }
 0x309   : > { %v1221_v38 = vadd.s32 144, %v6688_v36  ;;  %v6074_v45 = vstv %s1226_s17  ;;  %v2603_v41 = vadd.f32 %v2571_v27, %v2531_v28  ;;  %v2815_v51 = vadd.f32 %v2783_v29, %v2743_v14 }
 0x30a   : > { %v6078_v48 = vmul.f32 %v4828_v12, %v6024_v53  ;;  %v1866_v58 = vrot.slane %v6030_v0, 7  ;;  %v6083_v13 = vmul.f32 %v4852_v4, %v6024_v53  ;;  %v2886_v42 = vadd.f32 %v2854_v57, %v2814_v7 }
 0x30b   : > { %v6086_v9 = vmul.f32 %v6074_v45, %v1194_v34  ;;  %v1479_v62 = vand.u32 15, %v1221_v38  ;;  %v2604_v23 = vadd.f32 %v2572_v50, %v2532_v55  ;;  %v2816_v30 = vadd.f32 %v2784_v3, %v2744_v5  ;;  %v1197_v34 = vpop.f32.mrf.mxu1 }
 0x30c   : > { %v2501_v28 = vmul.f32 %v4833_v18, %v1865_v46  ;;  %v2147_v27 = vrot.slane %v6024_v53, 1  ;;  %v2429_v12 = vmul.f32 %v6696_v39, %v2233_v17  ;;  %v2929_v14 = vadd.f32 %v4891_v44, %v2885_v43 }
 0x30d   : > { %v2930_v6 = vadd.f32 %v4894_v20, %v2886_v42  ;;  %v1868_v25 = vrot.slane %v6086_v9, 7  ;;  %v2713_v7 = vmul.f32 %v4854_v32, %v1865_v46  ;;  %v6720_v8 = vrot.slane %v5953_v37, 7 }
 0x30e   : > { %v2148_v50 = vsel %vm2080_vm3, %v2143_v35, %v2147_v27  ;;  %v1196_v18 = vadd.f32 %v1195_v1, %v4792_v52  ;;  %v6102_v39 = vmul.f32 %v6674_v2, %v6030_v0  ;;  %vm6106_vm5 = vcmp.gt.s32.totalorder %v1479_v62, 0 }
 0x30f   : > { %v1867_v29 = vsel %vm1793_vm0, %v6720_v8, %v1866_v58  ;;  %v6104_v53 = vmul.f32 %v2930_v6, %v2929_v14  ;;  %v1869_v5 = vsel %vm1793_vm0, %v1864_v40, %v1868_v25  ;;  %v2641_v35 = vmul.f32 %v4850_v31, %v2233_v17 }
 0x310   : > { %v2855_v3 = vmul.f32 %v5991_v63, %v2148_v50  ;;  %v6116_v46 = vmul.f32 %v6074_v45, %v1196_v18  ;;  %v2149_v43 = vrot.slane %v6030_v0, 1  ;;  %v2461_v57 = vadd.f32 %v2429_v12, %v5983_v61 }
 0x311   : > { %v2714_v38 = vmul.f32 %v4865_v26, %v1867_v29  ;;  %v3415_v1 = vpack.c.bf16 %v6104_v53, %v6047_v54  ;;  %v1198_v42 = vadd.f32 %v1197_v34, %v6687_v49  ;;  %v2642_v40 = vmul.f32 %v4856_v21, %v2234_v19 }
 0x312   : > { %v1952_v17 = vsel %vm6106_vm5, %v1869_v5, 0.0  ;;  %v1870_v62 = vrot.slane %v6116_v46, 7  ;;  %v2150_v14 = vsel %vm2080_vm3, %v2145_v60, %v2149_v43  ;;  %v2643_v61 = vmul.f32 %v4850_v31, %v2148_v50 }
 0x313   : > { %3431 = vst [vmem:[%s5467_s14 + $0x28] sm:$0xff] %v3415_v1   ;;  %v2887_v12 = vadd.f32 %v2855_v3, %v2815_v51  ;;  %v2856_v6 = vmul.f32 %v6010_v56, %v2150_v14  ;;  %v1220_v8 = vadd.s32 136, %v6688_v36  ;;  %v2673_v49 = vadd.f32 %v2641_v35, %v5999_v47 }
 0x314   : > { %v2430_v18 = vmul.f32 %v4840_v59, %v2234_v19  ;;  %v1871_v34 = vsel %vm1793_vm0, %v1866_v58, %v1870_v62  ;;  %v6141_v37 = vmul.f32 %v6074_v45, %v1198_v42  ;;  %v2533_v60 = vadd.f32 %v2501_v28, %v2461_v57  ;;  %v1199_v42 = vpop.f32.mrf.mxu1 }
 0x315   : > { %v2715_v5 = vmul.f32 %v4854_v32, %v1952_v17  ;;  %v1953_v51 = vsel %vm6106_vm5, %v1871_v34, 0.0  ;;  %v2888_v50 = vadd.f32 %v2856_v6, %v2816_v30  ;;  %v2674_v3 = vadd.f32 %v2642_v40, %v6013_v11 }
 0x316   : > { %v2644_v47 = vmul.f32 %v4856_v21, %v2150_v14  ;;  %v1472_v35 = vand.u32 15, %v1220_v8  ;;  %1667 = vst [vmem:[#allocation3 + $0x38] sm:$0xff] %v6141_v37  ;;  %v2151_v59 = vrot.slane %v6086_v9, 1  ;;  %v2675_v19 = vadd.f32 %v2643_v61, %v2603_v41 }
 0x317   : > { %v2931_v58 = vadd.f32 %v4891_v44, %v2887_v12  ;;  %v2932_v28 = vadd.f32 %v4894_v20, %v2888_v50  ;;  %v2155_v57 = vrot.slane %v6141_v37, 1  ;;  %v2502_v55 = vmul.f32 %v4842_v22, %v1867_v29 }
 0x318   : > { %v2716_v30 = vmul.f32 %v4865_v26, %v1953_v51  ;;  %vm6155_vm6 = vcmp.lt.s32.totalorder %v1472_v35, 15  ;;  %v2152_v1 = vsel %vm2080_vm3, %v2147_v27, %v2151_v59  ;;  %v2745_v40 = vadd.f32 %v2713_v7, %v2673_v49 }
 0x319   : > { %v2747_v17 = vadd.f32 %v2715_v5, %v2675_v19  ;;  %v6160_v41 = vmul.f32 %v2932_v28, %v2931_v58  ;;  %v2237_v14 = vsel %vm6155_vm6, %v2152_v1, 0.0  ;;  %v2605_v61 = vadd.f32 %v6078_v48, %v2533_v60 }
 0x31a   : > { %v2462_v22 = vadd.f32 %v2430_v18, %v6005_v10  ;;  %v2676_v29 = vadd.f32 %v2644_v47, %v2604_v23  ;;  %v2156_v12 = vsel %vm2080_vm3, %v2151_v59, %v2155_v57  ;;  %v2746_v6 = vadd.f32 %v2714_v38, %v2674_v3  ;;  %v1997_v59 = vld [vmem:[#allocation3 + $0x40] sm:$0x1] }
 0x31b   : > { %v2787_v8 = vmul.f32 %v4852_v4, %v6086_v9  ;;  %v1200_v27 = vadd.f32 %v1199_v42, %v4792_v52  ;;  %v2153_v7 = vrot.slane %v6116_v46, 1  ;;  %v1222_v34 = vadd.s32 152, %v6688_v36  ;;  %v1996_v36 = vld [vmem:[#allocation3 + $0xd0] sm:$0x1] }
 0x31c   : > { %v2748_v49 = vadd.f32 %v2716_v30, %v2676_v29  ;;  %v2857_v5 = vmul.f32 %v5991_v63, %v2237_v14  ;;  %v3042_v48 = vadd.f32 %v5861_v24, %v5920_v33  ;;  %v2859_v60 = vmul.f32 %v5991_v63, %v2156_v12 }
 0x31d   : > { %v2819_v10 = vadd.f32 %v2787_v8, %v2747_v17  ;;  %v1709_v23 = vld [vmem:[#allocation3 + $0x38] sm:$0x7f]  ;;  %v1348_v18 = vmul.f32 %v6074_v45, %v1200_v27  ;;  %v2154_v38 = vsel %vm2080_vm3, %v2149_v43, %v2153_v7  ;;  %v2817_v52 = vadd.f32 %v6083_v13, %v2745_v40 }
 0x31e   : > { %v2788_v51 = vmul.f32 %v6674_v2, %v6116_v46  ;;  %v1872_v50 = vrot.slane %v1709_v23, 7  ;;  %v2238_v3 = vsel %vm6155_vm6, %v2154_v38, 0.0  ;;  %v2818_v24 = vadd.f32 %v6102_v39, %v2746_v6 }
 0x31f   : > { %v2645_v33 = vmul.f32 %v4850_v31, %v2237_v14  ;;  %1668 = vst [vmem:[#allocation3 + $0x50] sm:$0xff] %v1348_v18  ;;  %v2157_v45 = vrot.slane %v1348_v18, 1  ;;  %v2858_v43 = vmul.f32 %v6010_v56, %v2238_v3  ;;  %v2889_v35 = vadd.f32 %v2857_v5, %v2817_v52 }
 0x320   : > { %v2820_v47 = vadd.f32 %v2788_v51, %v2748_v49  ;;  %v1873_v13 = vsel %vm1793_vm0, %v1868_v25, %v1872_v50  ;;  %v3043_v19 = vadd.f32 %v3042_v48, %v5974_v15  ;;  %v1486_v58 = vand.u32 15, %v1222_v34 }
 0x321   : > { %v2159_v28 = vrot.slane %v1996_v36, 1  ;;  %v2158_v30 = vsel %vm2080_vm3, %v2153_v7, %v2157_v45  ;;  %v2891_v39 = vadd.f32 %v2859_v60, %v2819_v10  ;;  %v2717_v31 = vmul.f32 %v4854_v32, %v1873_v13 }
 0x322   : > { %v2860_v11 = vmul.f32 %v6010_v56, %v2158_v30  ;;  %v2890_v1 = vadd.f32 %v2858_v43, %v2818_v24  ;;  %v3044_v42 = vadd.f32 %v3043_v19, %v6047_v54  ;;  %v2534_v40 = vadd.f32 %v2502_v55, %v2462_v22 }
 0x323   : > { %v2574_v9 = vmul.f32 %v4835_v16, %v6030_v0  ;;  %v2677_v25 = vadd.f32 %v2645_v33, %v2605_v61  ;;  %v2161_v17 = vrot.slane %v1997_v59, 1  ;;  %v2933_v15 = vadd.f32 %v4891_v44, %v2889_v35 }
 0x324   : > { %v2892_v14 = vadd.f32 %v2860_v11, %v2820_v47  ;;  %v2934_v29 = vadd.f32 %v4894_v20, %v2890_v1  ;;  %v3045_v12 = vadd.f32 %v3044_v42, %v6104_v53  ;;  %vm6199_vm7 = vcmp.lt.s32.totalorder %v1486_v58, 15 }
 0x325   : > { %v2160_v6 = vsel %vm2080_vm3, %v2155_v57, %v2159_v28  ;;  %v2646_v54 = vmul.f32 %v4856_v21, %v2238_v3  ;;  %v2935_v55 = vadd.f32 %v4891_v44, %v2891_v39  ;;  %v2749_v16 = vadd.f32 %v2717_v31, %v2677_v25 }
 0x326   : > { %v1710_v0 = vld [vmem:[#allocation3 + $0x50] sm:$0x7f]  ;;  %v2936_v61 = vadd.f32 %v4894_v20, %v2892_v14  ;;  %v2952_v22 = vmul.f32 %v2934_v29, %v2933_v15  ;;  %v3046_v8 = vadd.f32 %v3045_v12, %v6160_v41  ;;  %v2606_v27 = vadd.f32 %v2574_v9, %v2534_v40 }
 0x327   : > { %v2789_v53 = vmul.f32 %v4852_v4, %v6141_v37  ;;  %v1874_v7 = vrot.slane %v1710_v0, 7  ;;  %v2162_v49 = vsel %vm2080_vm3, %v2157_v45, %v2161_v17  ;;  %v2241_v5 = vsel %vm6199_vm7, %v2160_v6, 0.0 }
 0x328   : > { %v2953_v57 = vmul.f32 %v2936_v61, %v2935_v55  ;;  %v3420_v21 = vpack.c.bf16 %v2952_v22, %v6160_v41  ;;  %v3047_v34 = vadd.f32 %v3046_v8, %v2952_v22  ;;  %v2678_v23 = vadd.f32 %v2646_v54, %v2606_v27 }
 0x329   : > { %v1875_v48 = vsel %vm1793_vm0, %v1870_v62, %v1874_v7  ;;  %v2821_v10 = vadd.f32 %v2789_v53, %v2749_v16  ;;  %v2242_v37 = vsel %vm6199_vm7, %v2162_v49, 0.0  ;;  %v2861_v41 = vmul.f32 %v5991_v63, %v2241_v5 }
 0x32a   : > { %v2718_v38 = vmul.f32 %v4865_v26, %v1875_v48  ;;  %3432 = vst [vmem:[%s5467_s14 + $0x30] sm:$0xff] %v3420_v21   ;;  %v3048_v4 = vadd.f32 %v3047_v34, %v2953_v57  ;;  %v2790_v52 = vmul.f32 %v6674_v2, %v1348_v18  ;;  %v2862_v62 = vmul.f32 %v6010_v56, %v2242_v37 }
 0x32b   : > { %v2893_v51 = vadd.f32 %v2861_v41, %v2821_v10 }
 0x32c   : > { %v2750_v60 = vadd.f32 %v2718_v38, %v2678_v23 }
 0x32d   : > { %v2937_v36 = vadd.f32 %v4891_v44, %v2893_v51 }
 0x32e   : > { %v2822_v46 = vadd.f32 %v2790_v52, %v2750_v60 }
 0x330   : > { %v2894_v50 = vadd.f32 %v2862_v62, %v2822_v46 }
 0x332   : > { %v2938_v26 = vadd.f32 %v4894_v20, %v2894_v50 }
 0x334   : > { %v2954_v3 = vmul.f32 %v2938_v26, %v2937_v36 }
 0x336   : > { %v3425_v24 = vpack.c.bf16 %v2954_v3, %v2953_v57  ;;  %v3049_v33 = vadd.f32 %v3048_v4, %v2954_v3 }
 0x338   : > { %3433 = vst [vmem:[%s5467_s14 + $0x38] sm:$0xff] %v3425_v24   ;;  %v3050_v45 = vrot.slane %v3049_v33, 4 }
 0x33a   : > { %v3051_v43 = vadd.f32 %v3050_v45, %v3049_v33 }
 0x33c   : > { %v3052_v63 = vrot.slane %v3051_v43, 2 }
 0x33e   : > { %v3053_v47 = vadd.f32 %v3052_v63, %v3051_v43  ;;  %3059 = sbr.rel (%p3356_p8) target bundleno = 837 (0x345), region = 80 }
 0x340   : > { %v3054_v13 = vrot.slane %v3053_v47, 1 }
 0x342   : > { %v3055_v2 = vadd.f32 %v3054_v13, %v3053_v47 }
 0x344   : > { %3060 = vst [vmem:[%s6229_s1] sm:$0x1] %v3055_v2 }
 0x345 PF: > { %s6727_s12 = sld [smem:[#allocation30_spill]] }
 0x34b   : > { %p3357_p12 = scmp.le.s32.totalorder %s6727_s12, 0 }
 0x34d   : > { %3063 = sbr.rel (%p3357_p12) target bundleno = 854 (0x356), region = 84 }
 0x352   : > { %v3064_v44 = vld [vmem:[%s6229_s1] sm:$0x1] }
 0x353   : > { %v3065_v20 = vadd.f32 %v3064_v44, %v3055_v2 }
 0x355   : > { %3066 = vst [vmem:[%s6229_s1] sm:$0x1] %v3065_v20 }
 0x356 PF: > { %s6728_s6 = sld [smem:[#allocation30_spill]]  ;;  %s3087_s13 = sshll.u32 %s5467_s14, 4  ;;  %s6239_s13 = int_to_ptr.vmem [resolvable:$true] %s3087_s13 }
 0x357   : > { %s6729_s4 = sld [smem:[#allocation31_spill]]  ;;  %s3068_s18 = scalar_lea.sflag [#allocation6], %s4456_s5 }
 0x358   : > { %s6730_s30 = sld [smem:[#allocation37_spill]]  ;;  %s3845_s26 = scalar_lea.vmem %s6239_s13, 1024 }
 0x359   : > { %s6731_s16 = sld [smem:[#allocation97_spill]]  ;;  %p3846_p13 = scmp.ne.s32.totalorder %s6239_s13, %s3845_s26 }
 0x35a   : > { %s4067_s0 = smov [#allocation13]  }
 0x35b   : > { %s3849_s9 = sshll.u32 %s4067_s0, 4  ;;  %s3850_s9 = int_to_ptr.vmem [resolvable:$false] %s3849_s9 }
 0x35c   : > { %s3359_s27 = sshll.u32 %s6728_s6, 4  ;;  %s3851_s20 = scalar_lea.vmem %s3850_s9, 2048 }
 0x35d   : > { %s3360_s11 = sshll.u32 %s6729_s4, 5  ;;  %p3852_p6 = scmp.lt.s32.totalorder %s6239_s13, %s3850_s9 }
 0x35e   : > { %s3084_s25 = sadd.s32 %s3360_s11, %s3359_s27  ;;  %p6733_p10 = scmp.ne.s32.totalorder %s6730_s30, 0 }
 0x35f   : > { %s3361_s28 = sshll.u32 %s3084_s25, 6  ;;  %s6732_s2 = smov %s6731_s16 }
 0x360   : > { %s6244_s3 = scalar_lea.hbm %s6731_s16, %s3361_s28  ;;  %p3847_p11 = pnand %p3846_p13, %p6733_p10 }
 0x361   : > { %p3853_p5 = scmp.lt.s32.totalorder %s3851_s20, %s3845_s26 }
 0x362   : > { %p3848_p0 = pneg %p3847_p11 }
 0x363   : > { %p3854_p1 = por %p3853_p5, %p3852_p6 }
 0x365   : > { %p3855_p7 = pnand %p3854_p1, %p3848_p0 }
 0x367   : > { %3858 = shalt.err (!%p3855_p7)
}
 0x368   : > { %s3859_s14 = scalar_lea.hbm %s6244_s3, 1024  ;;  %s3863_s6 = scalar_lea.hbm %s6732_s2, 4096 }
 0x369   : > { %p3860_p2 = scmp.ne.s32.totalorder %s6244_s3, %s3859_s14  ;;  %p3864_p3 = scmp.lt.s32.totalorder %s6244_s3, %s6732_s2 }
 0x36a   : > { %p3865_p8 = scmp.lt.s32.totalorder %s3863_s6, %s3859_s14 }
 0x36b   : > { %p3861_p4 = pnand %p3860_p2, %p6733_p10 }
 0x36c   : > { %p3866_p12 = por %p3865_p8, %p3864_p3 }
 0x36d   : > { %p3862_p9 = pneg %p3861_p4 }
 0x36f   : > { %p3867_p13 = pnand %p3866_p12, %p3862_p9 }
 0x371   : > { %3870 = shalt.err (!%p3867_p13)
}
 0x372   : > { %s4068_s25 = smov 64   ;;  %s6735_s22 = sld [smem:[#allocation34_spill]] }
 0x373   : > { %s4069_s10 = smov 4   ;;  %s3362_s16 = sshll.u32 %s6729_s4, 4 }
 0x374   : > { %3464 = dma.vmem_to_hbm [thread:$0]  (%p6733_p10), %s6239_s13, 1024, %s6244_s3, %s3068_s18, %s4068_s25, %s4068_s25, %s4069_s10  }
 0x375   : > { %s6736_s9 = sld [smem:[#allocation98_spill]]  ;;  %s3103_s14 = sshll.u32 %s6229_s1, 4  ;;  %s3104_s14 = int_to_ptr.vmem [resolvable:$true] %s3103_s14 }
 0x376   : > { %s3073_s17 = scalar_lea.sflag [#allocation15], %s542_s7  ;;  %s3871_s12 = scalar_lea.vmem %s3104_s14, 16 }
 0x377   : > { %p3872_p11 = scmp.ne.s32.totalorder %s3104_s14, %s3871_s12  ;;  %s4070_s6 = smov [#allocation14]  }
 0x378   : > { %p6737_p0 = scmp.ne.s32.totalorder %s6735_s22, 0  ;;  %s3875_s27 = sshll.u32 %s4070_s6, 4  ;;  %s3876_s27 = int_to_ptr.vmem [resolvable:$false] %s3875_s27 }
 0x379   : > { %s3877_s30 = scalar_lea.vmem %s3876_s27, 32  ;;  %p3878_p1 = scmp.lt.s32.totalorder %s3104_s14, %s3876_s27 }
 0x37a   : > { %p3873_p6 = pnand %p3872_p11, %p6737_p0  ;;  %p3879_p10 = scmp.lt.s32.totalorder %s3877_s30, %s3871_s12 }
 0x37b   : > { %s3101_s20 = scalar_lea.hbm %s6736_s9, %s3362_s16 }
 0x37c   : > { %p3874_p5 = pneg %p3873_p6  ;;  %p3880_p7 = por %p3879_p10, %p3878_p1 }
 0x37e   : > { %p3881_p2 = pnand %p3880_p7, %p3874_p5 }
 0x380   : > { %3884 = shalt.err (!%p3881_p2)
}
 0x381   : > { %s3885_s5 = scalar_lea.hbm %s3101_s20, 16  ;;  %s3889_s4 = scalar_lea.hbm %s6736_s9, 32 }
 0x382   : > { %p3886_p4 = scmp.ne.s32.totalorder %s3101_s20, %s3885_s5  ;;  %p3890_p8 = scmp.lt.s32.totalorder %s3101_s20, %s6736_s9 }
 0x383   : > { %p3891_p12 = scmp.lt.s32.totalorder %s3889_s4, %s3885_s5 }
 0x384   : > { %p3887_p9 = pnand %p3886_p4, %p6737_p0 }
 0x385   : > { %p3892_p13 = por %p3891_p12, %p3890_p8 }
 0x386   : > { %p3888_p3 = pneg %p3887_p9 }
 0x388   : > { %p3893_p11 = pnand %p3892_p13, %p3888_p3 }
 0x38a   : > { %3896 = shalt.err (!%p3893_p11)
}
 0x38b   : > { %3465 = dma.vmem_to_hbm [thread:$0]  (%p6737_p0), %s3104_s14, 16, %s3101_s20, %s3073_s17  }
 0x38c PF: > { %s6738_s18 = sld [smem:[#allocation27_spill]]  ;;  %p3497_p6 = scmp.ge.s32.totalorder %s4055_s29, 2 }
 0x38d   : > { %s6739_s11 = sld [smem:[#allocation40_spill]] }
 0x392   : > { %s3115_s25 = sand.u32 1, %s6738_s18  }
 0x393   : > { %p6740_p5 = scmp.ne.s32.totalorder %s6739_s11, 0  ;;  %s3116_s28 = scalar_lea.sflag [#allocation6], %s3115_s25 }
 0x395   : > { %p3486_p1 = pnand %p3497_p6, %p6740_p5 }
 0x397   : > { %p3487_p10 = pneg %p3486_p1 }
 0x399   : > { %3982 = dma.done.wait (%p3487_p10), %s3116_s28, 1024  }
 0x39a   : > { %3984 = vsyncadd (%p3487_p10), %s3116_s28, 4294966272  ;;  %s6741_s10 = sld [smem:[#allocation22_spill]]  ;;  %p6742_p7 = scmp.ne.s32.totalorder %s6498_s19, 0 }
 0x39c   : > { %p3489_p2 = pnand %p3497_p6, %p6742_p7 }
 0x39e   : > { %p3490_p4 = pneg %p3489_p2 }
 0x3a0   : > { %s3124_s16 = sand.u32 1, %s6741_s10  }
 0x3a1   : > { %s3125_s22 = scalar_lea.sflag [#allocation15], %s3124_s16 }
 0x3a2   : > { %3986 = dma.done.wait (%p3490_p4), %s3125_s22, 16  }
 0x3a3   : > { %3988 = vsyncadd (%p3490_p4), %s3125_s22, 4294967280  ;;  %s34_s29 = sadd.s32 1, %s4055_s29   ;;  %s6744_s13 = sld [smem:[#allocation23_spill]] }
 0x3a4   : > { %p6296_p0 = scmp.ge.s32.totalorder %s34_s29, 6   ;;  %s6745_s0 = sld [smem:[#allocation42_spill]] }
 0x3a5   : > { %s6746_s16 = sld [smem:[#allocation25_spill]]  ;;  %s6755_s14 = smov %s3999_s15 }
 0x3a6   : > { %s6747_s17 = sld [smem:[#allocation26_spill]]  ;;  %s6758_s18 = smov %s6779_s21 }
 0x3a7   : > { %s6748_s19 = sld [smem:[#allocation28_spill]]  ;;  %s6760_s22 = smov %s4031_s23 }
 0x3a8   : > { %s6749_s20 = sld [smem:[#allocation29_spill]]  ;;  %s6761_s23 = smov %s4035_s24 }
 0x3a9   : > { %s6750_s12 = sld [smem:[#allocation41_spill]]  ;;  %s6762_s24 = smov %s4377_s8 }
 0x3aa   : > { %s6751_s25 = sld [smem:[#allocation32_spill]]  ;;  %s6757_s15 = smov %s6745_s0 }
 0x3ab   : > { %s6752_s6 = sld [smem:[#allocation33_spill]] }
 0x3ac   : > { %s6753_s27 = sld [smem:[#allocation36_spill]] }
 0x3ad   : > { %s6754_s28 = sld [smem:[#allocation38_spill]]  ;;  %33 = sbr.rel (!%p6296_p0) target bundleno = 29 (0x1d), region = 158 }
 0x3af   : > { %s6759_s21 = smov %s6750_s12 }
 0x3b1   : > { %s6763_s26 = smov %s6752_s6 }
 0x3b2   :  { %3129 = vsyncpa [#allocation5], 1 }
 0x3b3   :  { %3131 = vsyncpa [#allocation5 + $0x1], 1 }
 0x3b4   :  { %3132 = vsyncpa [#allocation8], 1 }
 0x3b5   :  { %3134 = vsyncpa [#allocation8 + $0x1], 1 }
 0x3b6   :  { %3135 = vsyncpa [#allocation11], 1 }
 0x3b7   :  { %3136 = vsyncpa [#allocation6], 1 }
 0x3b8   :  { %3138 = vsyncpa [#allocation6 + $0x1], 1 }
 0x3b9   :  { %3139 = vsyncpa [#allocation15], 1 }
 0x3ba   :  { %3141 = vsyncpa [#allocation15 + $0x1], 1 }

</bundles_post_ra>
